<compile_context>
chip_gen: v5e
topology: v5e:2x2
jax: 0.10.0
libtpu: 0.0.40
codegen_flags: <defaults>
</compile_context>

<pallas_src>
import functools

import jax
import jax.numpy as jnp
from jax.experimental import pallas as pl
from jax.experimental.pallas import tpu as pltpu


# ---------------------------------------------------------------------------
# Pallas kernels
# ---------------------------------------------------------------------------

def conv_bn_lrelu_kernel(p_ref, w_ref, b_ref, g_ref, be_ref, o_ref, *,
                         eps, slope):
    """Fused encoder block: patches @ W + bias -> BatchNorm (batch stats,
    biased variance, training mode) -> LeakyReLU(slope).  The full (M, Cout)
    conv output lives in a single tile, so per-channel statistics are computed
    directly on the MXU result."""
    y = jnp.dot(p_ref[...], w_ref[...], preferred_element_type=jnp.float32)
    # conv bias cancels exactly under batch-stat BN; kept for faithfulness
    # (it is a single broadcast add).
    y = y + b_ref[...]
    m = jnp.float32(y.shape[0])
    mean = jnp.sum(y, axis=0, keepdims=True) / m
    d = y - mean
    var = jnp.sum(d * d, axis=0, keepdims=True) / m
    yh = d * jax.lax.rsqrt(var + eps)
    out = g_ref[...] * yh + be_ref[...]
    o_ref[...] = jnp.where(out >= 0.0, out, slope * out).astype(o_ref.dtype)


def heads_reparam_dec3_kernel(h_ref, wm_ref, bm_ref, ws_ref, bs_ref, e_ref,
                              wd_ref, bd_ref, mean_ref, logstd_ref, o_ref):
    """encoder1 / encoder2 (1x1 convs) + noise_reparameterize + decoder3
    (1x1 conv) fused into one kernel."""
    h = h_ref[...]
    mean = jnp.dot(h, wm_ref[...],
                   preferred_element_type=jnp.float32) + bm_ref[...]
    logstd = jnp.dot(h, ws_ref[...],
                     preferred_element_type=jnp.float32) + bs_ref[...]
    # z = mean + eps * exp(logstd)   (matches noise_reparameterize)
    z = mean + e_ref[...] * jnp.exp(logstd)
    out3 = jnp.dot(z, wd_ref[...],
                   preferred_element_type=jnp.float32) + bd_ref[...]
    mean_ref[...] = mean.astype(mean_ref.dtype)
    logstd_ref[...] = logstd.astype(logstd_ref.dtype)
    o_ref[...] = out3.astype(o_ref.dtype)


def deconv_phase_kernel(p_ref, w_ref, b_ref, o_ref):
    """One sub-pixel output phase of ConvTranspose2d(k4,s2,p1) + ReLU:
    a dense (M, 4*Cin) @ (4*Cin, Cout) GEMM on the un-dilated input."""
    y = jnp.dot(p_ref[0], w_ref[0], preferred_element_type=jnp.float32)
    y = y + b_ref[...]
    o_ref[0] = jnp.maximum(y, 0.0).astype(o_ref.dtype)


# ---------------------------------------------------------------------------
# Pallas wrappers + JAX layout glue
# ---------------------------------------------------------------------------

def _full_spec(shape):
    n = len(shape)
    return pl.BlockSpec(shape, lambda i, _n=n: (0,) * _n)


def encoder_block(x_nhwc, w_oihw, b, gamma, beta, *, eps=1e-5, slope=0.2):
    """Conv2d(k3,s2,p1) -> BatchNorm2d (batch stats) -> LeakyReLU(0.2)."""
    N, H, W, Cin = x_nhwc.shape
    Cout = w_oihw.shape[0]
    Ho, Wo = H // 2, W // 2
    M = N * Ho * Wo

    xp = jnp.pad(x_nhwc, ((0, 0), (1, 1), (1, 1), (0, 0)))
    taps = [xp[:, kh:kh + 2 * Ho - 1:2, kw:kw + 2 * Wo - 1:2, :]
            for kh in range(3) for kw in range(3)]
    patches = jnp.stack(taps, axis=3).reshape(M, 9 * Cin)   # cols: (kh,kw,cin)
    w2 = jnp.transpose(w_oihw, (2, 3, 1, 0)).reshape(9 * Cin, Cout)

    y = pl.pallas_call(
        functools.partial(conv_bn_lrelu_kernel, eps=eps, slope=slope),
        out_shape=jax.ShapeDtypeStruct((M, Cout), jnp.float32),
        grid=(1,),
        in_specs=[_full_spec((M, 9 * Cin)),
                  _full_spec((9 * Cin, Cout)),
                  _full_spec((1, Cout)),
                  _full_spec((1, Cout)),
                  _full_spec((1, Cout))],
        out_specs=_full_spec((M, Cout)),
    )(patches, w2, b.reshape(1, Cout), gamma.reshape(1, Cout),
      beta.reshape(1, Cout))
    return y.reshape(N, Ho, Wo, Cout)


def heads_reparam_dec3(hf, we1, bee1, we2, bee2, wd3, bd3, eps):
    """mean / logstd heads, z = mean + eps*exp(logstd), decoder3 — one call."""
    M, C = hf.shape
    zd = we1.shape[0]
    wm = jnp.transpose(we1.reshape(zd, C))   # (C, zd)
    ws = jnp.transpose(we2.reshape(zd, C))   # (C, zd)
    wd = jnp.transpose(wd3.reshape(C, zd))   # (zd, C)

    mean, logstd, out3 = pl.pallas_call(
        heads_reparam_dec3_kernel,
        out_shape=(jax.ShapeDtypeStruct((M, zd), jnp.float32),
                   jax.ShapeDtypeStruct((M, zd), jnp.float32),
                   jax.ShapeDtypeStruct((M, C), jnp.float32)),
        grid=(1,),
        in_specs=[_full_spec((M, C)),
                  _full_spec((C, zd)), _full_spec((1, zd)),
                  _full_spec((C, zd)), _full_spec((1, zd)),
                  _full_spec((M, zd)),
                  _full_spec((zd, C)), _full_spec((1, C))],
        out_specs=(_full_spec((M, zd)), _full_spec((M, zd)),
                   _full_spec((M, C))),
    )(hf, wm, bee1.reshape(1, zd), ws, bee2.reshape(1, zd), eps, wd,
      bd3.reshape(1, C))
    return mean, logstd, out3


# Sub-pixel phase taps for ConvTranspose2d(k=4, s=2, p=1), per output parity d:
#   even outputs (d=0): out[2t]   = x[t]*w[1] + x[t-1]*w[3]
#   odd  outputs (d=1): out[2t+1] = x[t+1]*w[0] + x[t]*w[2]
# entries are (slice start into the 1-padded input, kernel index).
_DECONV_TAPS = {0: ((1, 1), (0, 3)),
                1: ((2, 0), (1, 2))}


def deconv_block(x_nhwc, w_iohw, b):
    """ConvTranspose2d(k4,s2,p1) + ReLU via sub-pixel phase decomposition."""
    N, H, W, Cin = x_nhwc.shape
    Cout = w_iohw.shape[1]
    M = N * H * W
    K4 = 4 * Cin

    xp = jnp.pad(x_nhwc, ((0, 0), (1, 1), (1, 1), (0, 0)))
    patches, weights = [], []
    for dh in range(2):
        for dw in range(2):
            cols, rows = [], []
            for sh, ah in _DECONV_TAPS[dh]:
                for sw, aw in _DECONV_TAPS[dw]:
                    cols.append(xp[:, sh:sh + H, sw:sw + W, :].reshape(M, Cin))
                    rows.append(w_iohw[:, :, ah, aw])        # (Cin, Cout)
            patches.append(jnp.concatenate(cols, axis=1))    # (M, 4*Cin)
            weights.append(jnp.concatenate(rows, axis=0))    # (4*Cin, Cout)
    patches = jnp.stack(patches)   # (4, M, 4*Cin); phase = dh*2 + dw
    weights = jnp.stack(weights)   # (4, 4*Cin, Cout)

    out = pl.pallas_call(
        deconv_phase_kernel,
        out_shape=jax.ShapeDtypeStruct((4, M, Cout), jnp.float32),
        grid=(4,),
        in_specs=[pl.BlockSpec((1, M, K4), lambda p: (p, 0, 0)),
                  pl.BlockSpec((1, K4, Cout), lambda p: (p, 0, 0)),
                  pl.BlockSpec((1, Cout), lambda p: (0, 0))],
        out_specs=pl.BlockSpec((1, M, Cout), lambda p: (p, 0, 0)),
        compiler_params=pltpu.CompilerParams(
            dimension_semantics=("parallel",)),
    )(patches, weights, b.reshape(1, Cout))

    # interleave phases: out[n, 2*th + dh, 2*tw + dw, c] = phase(dh,dw)[n,th,tw,c]
    out = out.reshape(2, 2, N, H, W, Cout)
    out = jnp.transpose(out, (2, 3, 0, 4, 1, 5)).reshape(N, 2 * H, 2 * W, Cout)
    return out


# ---------------------------------------------------------------------------
# Parameters (deterministic synthetic init) and forward pass
# ---------------------------------------------------------------------------

def init_params(key, image_channels=16, z_dim=16):
    ks = jax.random.split(key, 16)
    n = lambda k, s, sc=0.05: sc * jax.random.normal(k, s, jnp.float32)
    p = {
        # encoder
        "w1": n(ks[0], (32, image_channels, 3, 3)), "b1": n(ks[1], (32,)),
        "g1": jnp.ones((32,), jnp.float32), "be1": jnp.zeros((32,), jnp.float32),
        "w2": n(ks[2], (64, 32, 3, 3)), "b2": n(ks[3], (64,)),
        "g2": jnp.ones((64,), jnp.float32), "be2": jnp.zeros((64,), jnp.float32),
        "w3": n(ks[4], (128, 64, 3, 3)), "b3": n(ks[5], (128,)),
        "g3": jnp.ones((128,), jnp.float32), "be3": jnp.zeros((128,), jnp.float32),
        # heads (1x1 convs, PyTorch OIHW)
        "we1": n(ks[6], (z_dim, 128, 1, 1)), "bee1": n(ks[7], (z_dim,)),
        "we2": n(ks[8], (z_dim, 128, 1, 1)), "bee2": n(ks[9], (z_dim,)),
        "wd3": n(ks[10], (128, z_dim, 1, 1)), "bd3": n(ks[11], (128,)),
        # decoder (ConvTranspose2d weights: (Cin, Cout, kH, kW))
        "wt1": n(ks[12], (128, 64, 4, 4)), "bt1": n(ks[13], (64,)),
        "wt2": n(ks[14], (64, 32, 4, 4)), "bt2": n(ks[15], (32,)),
        "wt3": n(jax.random.fold_in(key, 99), (32, 16, 4, 4)),
        "bt3": jnp.zeros((16,), jnp.float32),
    }
    return p


def _vae_forward(x_nchw, p, noise_key):
    x = jnp.transpose(x_nchw, (0, 2, 3, 1))            # NCHW -> NHWC

    # encoder(x) is deterministic given the batch, so out1 == out2.
    h = encoder_block(x, p["w1"], p["b1"], p["g1"], p["be1"])
    h = encoder_block(h, p["w2"], p["b2"], p["g2"], p["be2"])
    h = encoder_block(h, p["w3"], p["b3"], p["g3"], p["be3"])   # (N,H/8,W/8,128)

    N, Hs, Ws, C = h.shape
    hf = h.reshape(N * Hs * Ws, C)
    zd = p["we1"].shape[0]

    eps = jax.random.normal(noise_key, (N * Hs * Ws, zd), jnp.float32)
    mean_f, logstd_f, out3_f = heads_reparam_dec3(
        hf, p["we1"], p["bee1"], p["we2"], p["bee2"], p["wd3"], p["bd3"], eps)

    out3 = out3_f.reshape(N, Hs, Ws, C)
    out3 = deconv_block(out3, p["wt1"], p["bt1"])
    out3 = deconv_block(out3, p["wt2"], p["bt2"])
    out3 = deconv_block(out3, p["wt3"], p["bt3"])              # (N, H, W, 16)

    # back to NCHW to match the PyTorch module outputs
    out3_nchw = jnp.transpose(out3, (0, 3, 1, 2))
    mean_nchw = jnp.transpose(mean_f.reshape(N, Hs, Ws, zd), (0, 3, 1, 2))
    logstd_nchw = jnp.transpose(logstd_f.reshape(N, Hs, Ws, zd), (0, 3, 1, 2))
    return out3_nchw, mean_nchw, logstd_nchw


vae_forward = jax.jit(_vae_forward)


if __name__ == "__main__":
    key = jax.random.PRNGKey(0)
    k_param, k_x, k_eps = jax.random.split(key, 3)

    params = init_params(k_param, image_channels=16)
    # small input consistent with the module: NCHW, channels=16, spatial=16
    x = jax.random.normal(k_x, (2, 16, 16, 16), jnp.float32)

    out3, mean, logstd = vae_forward(x, params, k_eps)
    (out3, mean, logstd) = jax.block_until_ready((out3, mean, logstd))

    assert out3.shape == (2, 16, 16, 16)
    assert mean.shape == (2, 16, 2, 2)
    assert logstd.shape == (2, 16, 2, 2)
    assert bool(jnp.all(jnp.isfinite(out3)))
    assert bool(jnp.all(jnp.isfinite(mean)))
    assert bool(jnp.all(jnp.isfinite(logstd)))
    print("KERNEL_OK")
</pallas_src>

<mosaic_0001>
module attributes {stable_mosaic.version = 11 : i64} {
  func.func @conv_bn_lrelu_kernel(%arg0: i32, %arg1: memref<128x144xf32, #tpu.memory_space<vmem>>, %arg2: memref<144x32xf32, #tpu.memory_space<vmem>>, %arg3: memref<1x32xf32, #tpu.memory_space<vmem>>, %arg4: memref<1x32xf32, #tpu.memory_space<vmem>>, %arg5: memref<1x32xf32, #tpu.memory_space<vmem>>, %arg6: memref<128x32xf32, #tpu.memory_space<vmem>>) attributes {dimension_semantics = [#tpu.dimension_semantics<arbitrary>], iteration_bounds = array<i64: 1>, scalar_prefetch = 0 : i64, scratch_operands = 0 : i64, tpu.core_type = #tpu.core_type<tc>, window_params = [{pipeline_mode = #tpu.pipeline_mode<synchronous>, transform_indices = @transform_0, window_bounds = array<i64: 128, 144>}, {pipeline_mode = #tpu.pipeline_mode<synchronous>, transform_indices = @transform_1, window_bounds = array<i64: 144, 32>}, {pipeline_mode = #tpu.pipeline_mode<synchronous>, transform_indices = @transform_2, window_bounds = array<i64: 1, 32>}, {pipeline_mode = #tpu.pipeline_mode<synchronous>, transform_indices = @transform_3, window_bounds = array<i64: 1, 32>}, {pipeline_mode = #tpu.pipeline_mode<synchronous>, transform_indices = @transform_4, window_bounds = array<i64: 1, 32>}, {pipeline_mode = #tpu.pipeline_mode<synchronous>, transform_indices = @transform_5, window_bounds = array<i64: 128, 32>}]} {
    %c0 = arith.constant 0 : index
    %c0_0 = arith.constant 0 : index
    %0 = vector.load %arg1[%c0, %c0_0] : memref<128x144xf32, #tpu.memory_space<vmem>>, vector<128x144xf32>
    %c0_1 = arith.constant 0 : index
    %c0_2 = arith.constant 0 : index
    %1 = vector.load %arg2[%c0_1, %c0_2] : memref<144x32xf32, #tpu.memory_space<vmem>>, vector<144x32xf32>
    %cst = arith.constant dense<0.000000e+00> : vector<128x32xf32>
    %2 = tpu.matmul %0, %1, %cst {dimension_numbers = #tpu.dot_dimension_numbers<[1], [0], [0], [1], [0, 0, 1, 1], [], []>} : vector<128x144xf32>, vector<144x32xf32>, vector<128x32xf32> -> vector<128x32xf32>
    %c0_3 = arith.constant 0 : index
    %c0_4 = arith.constant 0 : index
    %3 = vector.load %arg3[%c0_3, %c0_4] : memref<1x32xf32, #tpu.memory_space<vmem>>, vector<1x32xf32>
    %4 = vector.broadcast %3 : vector<1x32xf32> to vector<128x32xf32>
    %5 = arith.addf %2, %4 : vector<128x32xf32>
    %cst_5 = arith.constant dense<0.000000e+00> : vector<32xf32>
    %6 = vector.multi_reduction <add>, %5, %cst_5 [0] : vector<128x32xf32> to vector<32xf32>
    %7 = vector.shape_cast %6 : vector<32xf32> to vector<1x32xf32>
    %cst_6 = arith.constant 1.280000e+02 : f32
    %8 = vector.broadcast %cst_6 : f32 to vector<1x32xf32>
    %9 = arith.divf %7, %8 : vector<1x32xf32>
    %10 = vector.broadcast %9 : vector<1x32xf32> to vector<128x32xf32>
    %11 = arith.subf %5, %10 : vector<128x32xf32>
    %12 = arith.mulf %11, %11 : vector<128x32xf32>
    %cst_7 = arith.constant dense<0.000000e+00> : vector<32xf32>
    %13 = vector.multi_reduction <add>, %12, %cst_7 [0] : vector<128x32xf32> to vector<32xf32>
    %14 = vector.shape_cast %13 : vector<32xf32> to vector<1x32xf32>
    %cst_8 = arith.constant 1.280000e+02 : f32
    %15 = vector.broadcast %cst_8 : f32 to vector<1x32xf32>
    %16 = arith.divf %14, %15 : vector<1x32xf32>
    %cst_9 = arith.constant 9.99999974E-6 : f32
    %17 = vector.broadcast %cst_9 : f32 to vector<1x32xf32>
    %18 = arith.addf %16, %17 : vector<1x32xf32>
    %19 = math.rsqrt %18 : vector<1x32xf32>
    %20 = vector.broadcast %19 : vector<1x32xf32> to vector<128x32xf32>
    %21 = arith.mulf %11, %20 : vector<128x32xf32>
    %c0_10 = arith.constant 0 : index
    %c0_11 = arith.constant 0 : index
    %22 = vector.load %arg4[%c0_10, %c0_11] : memref<1x32xf32, #tpu.memory_space<vmem>>, vector<1x32xf32>
    %23 = vector.broadcast %22 : vector<1x32xf32> to vector<128x32xf32>
    %24 = arith.mulf %23, %21 : vector<128x32xf32>
    %c0_12 = arith.constant 0 : index
    %c0_13 = arith.constant 0 : index
    %25 = vector.load %arg5[%c0_12, %c0_13] : memref<1x32xf32, #tpu.memory_space<vmem>>, vector<1x32xf32>
    %26 = vector.broadcast %25 : vector<1x32xf32> to vector<128x32xf32>
    %27 = arith.addf %24, %26 : vector<128x32xf32>
    %cst_14 = arith.constant 0.000000e+00 : f32
    %28 = vector.broadcast %cst_14 : f32 to vector<128x32xf32>
    %29 = arith.cmpf oge, %27, %28 : vector<128x32xf32>
    %cst_15 = arith.constant 2.000000e-01 : f32
    %30 = vector.broadcast %cst_15 : f32 to vector<128x32xf32>
    %31 = arith.mulf %30, %27 : vector<128x32xf32>
    %32 = arith.select %29, %27, %31 : vector<128x32xi1>, vector<128x32xf32>
    %c0_16 = arith.constant 0 : index
    %c0_17 = arith.constant 0 : index
    %33 = vector.load %arg6[%c0_16, %c0_17] : memref<128x32xf32, #tpu.memory_space<vmem>>, vector<128x32xf32>
    tpu.vector_store %arg6[%c0_16, %c0_17], %32 {strides = array<i32>} : memref<128x32xf32, #tpu.memory_space<vmem>>, vector<128x32xf32>,
    return
  }
  func.func @transform_0(%arg0: i32) -> (i32, i32) {
    %c0_i32 = arith.constant 0 : i32
    %c0_i32_0 = arith.constant 0 : i32
    %c0_i32_1 = arith.constant 0 : i32
    return %c0_i32, %c0_i32_0 : i32, i32
  }
  func.func @transform_1(%arg0: i32) -> (i32, i32) {
    %c0_i32 = arith.constant 0 : i32
    %c0_i32_0 = arith.constant 0 : i32
    %c0_i32_1 = arith.constant 0 : i32
    return %c0_i32, %c0_i32_0 : i32, i32
  }
  func.func @transform_2(%arg0: i32) -> (i32, i32) {
    %c0_i32 = arith.constant 0 : i32
    %c0_i32_0 = arith.constant 0 : i32
    %c0_i32_1 = arith.constant 0 : i32
    return %c0_i32, %c0_i32_0 : i32, i32
  }
  func.func @transform_3(%arg0: i32) -> (i32, i32) {
    %c0_i32 = arith.constant 0 : i32
    %c0_i32_0 = arith.constant 0 : i32
    %c0_i32_1 = arith.constant 0 : i32
    return %c0_i32, %c0_i32_0 : i32, i32
  }
  func.func @transform_4(%arg0: i32) -> (i32, i32) {
    %c0_i32 = arith.constant 0 : i32
    %c0_i32_0 = arith.constant 0 : i32
    %c0_i32_1 = arith.constant 0 : i32
    return %c0_i32, %c0_i32_0 : i32, i32
  }
  func.func @transform_5(%arg0: i32) -> (i32, i32) {
    %c0_i32 = arith.constant 0 : i32
    %c0_i32_0 = arith.constant 0 : i32
    %c0_i32_1 = arith.constant 0 : i32
    return %c0_i32, %c0_i32_0 : i32, i32
  }
}

module attributes {stable_mosaic.version = 11 : i64} {
  func.func @conv_bn_lrelu_kernel(%arg0: i32, %arg1: memref<32x288xf32, #tpu.memory_space<vmem>>, %arg2: memref<288x64xf32, #tpu.memory_space<vmem>>, %arg3: memref<1x64xf32, #tpu.memory_space<vmem>>, %arg4: memref<1x64xf32, #tpu.memory_space<vmem>>, %arg5: memref<1x64xf32, #tpu.memory_space<vmem>>, %arg6: memref<32x64xf32, #tpu.memory_space<vmem>>) attributes {dimension_semantics = [#tpu.dimension_semantics<arbitrary>], iteration_bounds = array<i64: 1>, scalar_prefetch = 0 : i64, scratch_operands = 0 : i64, tpu.core_type = #tpu.core_type<tc>, window_params = [{pipeline_mode = #tpu.pipeline_mode<synchronous>, transform_indices = @transform_0, window_bounds = array<i64: 32, 288>}, {pipeline_mode = #tpu.pipeline_mode<synchronous>, transform_indices = @transform_1, window_bounds = array<i64: 288, 64>}, {pipeline_mode = #tpu.pipeline_mode<synchronous>, transform_indices = @transform_2, window_bounds = array<i64: 1, 64>}, {pipeline_mode = #tpu.pipeline_mode<synchronous>, transform_indices = @transform_3, window_bounds = array<i64: 1, 64>}, {pipeline_mode = #tpu.pipeline_mode<synchronous>, transform_indices = @transform_4, window_bounds = array<i64: 1, 64>}, {pipeline_mode = #tpu.pipeline_mode<synchronous>, transform_indices = @transform_5, window_bounds = array<i64: 32, 64>}]} {
    %c0 = arith.constant 0 : index
    %c0_0 = arith.constant 0 : index
    %0 = vector.load %arg1[%c0, %c0_0] : memref<32x288xf32, #tpu.memory_space<vmem>>, vector<32x288xf32>
    %c0_1 = arith.constant 0 : index
    %c0_2 = arith.constant 0 : index
    %1 = vector.load %arg2[%c0_1, %c0_2] : memref<288x64xf32, #tpu.memory_space<vmem>>, vector<288x64xf32>
    %cst = arith.constant dense<0.000000e+00> : vector<32x64xf32>
    %2 = tpu.matmul %0, %1, %cst {dimension_numbers = #tpu.dot_dimension_numbers<[1], [0], [0], [1], [0, 0, 1, 1], [], []>} : vector<32x288xf32>, vector<288x64xf32>, vector<32x64xf32> -> vector<32x64xf32>
    %c0_3 = arith.constant 0 : index
    %c0_4 = arith.constant 0 : index
    %3 = vector.load %arg3[%c0_3, %c0_4] : memref<1x64xf32, #tpu.memory_space<vmem>>, vector<1x64xf32>
    %4 = vector.broadcast %3 : vector<1x64xf32> to vector<32x64xf32>
    %5 = arith.addf %2, %4 : vector<32x64xf32>
    %cst_5 = arith.constant dense<0.000000e+00> : vector<64xf32>
    %6 = vector.multi_reduction <add>, %5, %cst_5 [0] : vector<32x64xf32> to vector<64xf32>
    %7 = vector.shape_cast %6 : vector<64xf32> to vector<1x64xf32>
    %cst_6 = arith.constant 3.200000e+01 : f32
    %8 = vector.broadcast %cst_6 : f32 to vector<1x64xf32>
    %9 = arith.divf %7, %8 : vector<1x64xf32>
    %10 = vector.broadcast %9 : vector<1x64xf32> to vector<32x64xf32>
    %11 = arith.subf %5, %10 : vector<32x64xf32>
    %12 = arith.mulf %11, %11 : vector<32x64xf32>
    %cst_7 = arith.constant dense<0.000000e+00> : vector<64xf32>
    %13 = vector.multi_reduction <add>, %12, %cst_7 [0] : vector<32x64xf32> to vector<64xf32>
    %14 = vector.shape_cast %13 : vector<64xf32> to vector<1x64xf32>
    %cst_8 = arith.constant 3.200000e+01 : f32
    %15 = vector.broadcast %cst_8 : f32 to vector<1x64xf32>
    %16 = arith.divf %14, %15 : vector<1x64xf32>
    %cst_9 = arith.constant 9.99999974E-6 : f32
    %17 = vector.broadcast %cst_9 : f32 to vector<1x64xf32>
    %18 = arith.addf %16, %17 : vector<1x64xf32>
    %19 = math.rsqrt %18 : vector<1x64xf32>
    %20 = vector.broadcast %19 : vector<1x64xf32> to vector<32x64xf32>
    %21 = arith.mulf %11, %20 : vector<32x64xf32>
    %c0_10 = arith.constant 0 : index
    %c0_11 = arith.constant 0 : index
    %22 = vector.load %arg4[%c0_10, %c0_11] : memref<1x64xf32, #tpu.memory_space<vmem>>, vector<1x64xf32>
    %23 = vector.broadcast %22 : vector<1x64xf32> to vector<32x64xf32>
    %24 = arith.mulf %23, %21 : vector<32x64xf32>
    %c0_12 = arith.constant 0 : index
    %c0_13 = arith.constant 0 : index
    %25 = vector.load %arg5[%c0_12, %c0_13] : memref<1x64xf32, #tpu.memory_space<vmem>>, vector<1x64xf32>
    %26 = vector.broadcast %25 : vector<1x64xf32> to vector<32x64xf32>
    %27 = arith.addf %24, %26 : vector<32x64xf32>
    %cst_14 = arith.constant 0.000000e+00 : f32
    %28 = vector.broadcast %cst_14 : f32 to vector<32x64xf32>
    %29 = arith.cmpf oge, %27, %28 : vector<32x64xf32>
    %cst_15 = arith.constant 2.000000e-01 : f32
    %30 = vector.broadcast %cst_15 : f32 to vector<32x64xf32>
    %31 = arith.mulf %30, %27 : vector<32x64xf32>
    %32 = arith.select %29, %27, %31 : vector<32x64xi1>, vector<32x64xf32>
    %c0_16 = arith.constant 0 : index
    %c0_17 = arith.constant 0 : index
    %33 = vector.load %arg6[%c0_16, %c0_17] : memref<32x64xf32, #tpu.memory_space<vmem>>, vector<32x64xf32>
    tpu.vector_store %arg6[%c0_16, %c0_17], %32 {strides = array<i32>} : memref<32x64xf32, #tpu.memory_space<vmem>>, vector<32x64xf32>,
    return
  }
  func.func @transform_0(%arg0: i32) -> (i32, i32) {
    %c0_i32 = arith.constant 0 : i32
    %c0_i32_0 = arith.constant 0 : i32
    %c0_i32_1 = arith.constant 0 : i32
    return %c0_i32, %c0_i32_0 : i32, i32
  }
  func.func @transform_1(%arg0: i32) -> (i32, i32) {
    %c0_i32 = arith.constant 0 : i32
    %c0_i32_0 = arith.constant 0 : i32
    %c0_i32_1 = arith.constant 0 : i32
    return %c0_i32, %c0_i32_0 : i32, i32
  }
  func.func @transform_2(%arg0: i32) -> (i32, i32) {
    %c0_i32 = arith.constant 0 : i32
    %c0_i32_0 = arith.constant 0 : i32
    %c0_i32_1 = arith.constant 0 : i32
    return %c0_i32, %c0_i32_0 : i32, i32
  }
  func.func @transform_3(%arg0: i32) -> (i32, i32) {
    %c0_i32 = arith.constant 0 : i32
    %c0_i32_0 = arith.constant 0 : i32
    %c0_i32_1 = arith.constant 0 : i32
    return %c0_i32, %c0_i32_0 : i32, i32
  }
  func.func @transform_4(%arg0: i32) -> (i32, i32) {
    %c0_i32 = arith.constant 0 : i32
    %c0_i32_0 = arith.constant 0 : i32
    %c0_i32_1 = arith.constant 0 : i32
    return %c0_i32, %c0_i32_0 : i32, i32
  }
  func.func @transform_5(%arg0: i32) -> (i32, i32) {
    %c0_i32 = arith.constant 0 : i32
    %c0_i32_0 = arith.constant 0 : i32
    %c0_i32_1 = arith.constant 0 : i32
    return %c0_i32, %c0_i32_0 : i32, i32
  }
}

module attributes {stable_mosaic.version = 11 : i64} {
  func.func @conv_bn_lrelu_kernel(%arg0: i32, %arg1: memref<8x576xf32, #tpu.memory_space<vmem>>, %arg2: memref<576x128xf32, #tpu.memory_space<vmem>>, %arg3: memref<1x128xf32, #tpu.memory_space<vmem>>, %arg4: memref<1x128xf32, #tpu.memory_space<vmem>>, %arg5: memref<1x128xf32, #tpu.memory_space<vmem>>, %arg6: memref<8x128xf32, #tpu.memory_space<vmem>>) attributes {dimension_semantics = [#tpu.dimension_semantics<arbitrary>], iteration_bounds = array<i64: 1>, scalar_prefetch = 0 : i64, scratch_operands = 0 : i64, tpu.core_type = #tpu.core_type<tc>, window_params = [{pipeline_mode = #tpu.pipeline_mode<synchronous>, transform_indices = @transform_0, window_bounds = array<i64: 8, 576>}, {pipeline_mode = #tpu.pipeline_mode<synchronous>, transform_indices = @transform_1, window_bounds = array<i64: 576, 128>}, {pipeline_mode = #tpu.pipeline_mode<synchronous>, transform_indices = @transform_2, window_bounds = array<i64: 1, 128>}, {pipeline_mode = #tpu.pipeline_mode<synchronous>, transform_indices = @transform_3, window_bounds = array<i64: 1, 128>}, {pipeline_mode = #tpu.pipeline_mode<synchronous>, transform_indices = @transform_4, window_bounds = array<i64: 1, 128>}, {pipeline_mode = #tpu.pipeline_mode<synchronous>, transform_indices = @transform_5, window_bounds = array<i64: 8, 128>}]} {
    %c0 = arith.constant 0 : index
    %c0_0 = arith.constant 0 : index
    %0 = vector.load %arg1[%c0, %c0_0] : memref<8x576xf32, #tpu.memory_space<vmem>>, vector<8x576xf32>
    %c0_1 = arith.constant 0 : index
    %c0_2 = arith.constant 0 : index
    %1 = vector.load %arg2[%c0_1, %c0_2] : memref<576x128xf32, #tpu.memory_space<vmem>>, vector<576x128xf32>
    %cst = arith.constant dense<0.000000e+00> : vector<8x128xf32>
    %2 = tpu.matmul %0, %1, %cst {dimension_numbers = #tpu.dot_dimension_numbers<[1], [0], [0], [1], [0, 0, 1, 1], [], []>} : vector<8x576xf32>, vector<576x128xf32>, vector<8x128xf32> -> vector<8x128xf32>
    %c0_3 = arith.constant 0 : index
    %c0_4 = arith.constant 0 : index
    %3 = vector.load %arg3[%c0_3, %c0_4] : memref<1x128xf32, #tpu.memory_space<vmem>>, vector<1x128xf32>
    %4 = vector.broadcast %3 : vector<1x128xf32> to vector<8x128xf32>
    %5 = arith.addf %2, %4 : vector<8x128xf32>
    %cst_5 = arith.constant dense<0.000000e+00> : vector<128xf32>
    %6 = vector.multi_reduction <add>, %5, %cst_5 [0] : vector<8x128xf32> to vector<128xf32>
    %7 = vector.shape_cast %6 : vector<128xf32> to vector<1x128xf32>
    %cst_6 = arith.constant 8.000000e+00 : f32
    %8 = vector.broadcast %cst_6 : f32 to vector<1x128xf32>
    %9 = arith.divf %7, %8 : vector<1x128xf32>
    %10 = vector.broadcast %9 : vector<1x128xf32> to vector<8x128xf32>
    %11 = arith.subf %5, %10 : vector<8x128xf32>
    %12 = arith.mulf %11, %11 : vector<8x128xf32>
    %cst_7 = arith.constant dense<0.000000e+00> : vector<128xf32>
    %13 = vector.multi_reduction <add>, %12, %cst_7 [0] : vector<8x128xf32> to vector<128xf32>
    %14 = vector.shape_cast %13 : vector<128xf32> to vector<1x128xf32>
    %cst_8 = arith.constant 8.000000e+00 : f32
    %15 = vector.broadcast %cst_8 : f32 to vector<1x128xf32>
    %16 = arith.divf %14, %15 : vector<1x128xf32>
    %cst_9 = arith.constant 9.99999974E-6 : f32
    %17 = vector.broadcast %cst_9 : f32 to vector<1x128xf32>
    %18 = arith.addf %16, %17 : vector<1x128xf32>
    %19 = math.rsqrt %18 : vector<1x128xf32>
    %20 = vector.broadcast %19 : vector<1x128xf32> to vector<8x128xf32>
    %21 = arith.mulf %11, %20 : vector<8x128xf32>
    %c0_10 = arith.constant 0 : index
    %c0_11 = arith.constant 0 : index
    %22 = vector.load %arg4[%c0_10, %c0_11] : memref<1x128xf32, #tpu.memory_space<vmem>>, vector<1x128xf32>
    %23 = vector.broadcast %22 : vector<1x128xf32> to vector<8x128xf32>
    %24 = arith.mulf %23, %21 : vector<8x128xf32>
    %c0_12 = arith.constant 0 : index
    %c0_13 = arith.constant 0 : index
    %25 = vector.load %arg5[%c0_12, %c0_13] : memref<1x128xf32, #tpu.memory_space<vmem>>, vector<1x128xf32>
    %26 = vector.broadcast %25 : vector<1x128xf32> to vector<8x128xf32>
    %27 = arith.addf %24, %26 : vector<8x128xf32>
    %cst_14 = arith.constant 0.000000e+00 : f32
    %28 = vector.broadcast %cst_14 : f32 to vector<8x128xf32>
    %29 = arith.cmpf oge, %27, %28 : vector<8x128xf32>
    %cst_15 = arith.constant 2.000000e-01 : f32
    %30 = vector.broadcast %cst_15 : f32 to vector<8x128xf32>
    %31 = arith.mulf %30, %27 : vector<8x128xf32>
    %32 = arith.select %29, %27, %31 : vector<8x128xi1>, vector<8x128xf32>
    %c0_16 = arith.constant 0 : index
    %c0_17 = arith.constant 0 : index
    %33 = vector.load %arg6[%c0_16, %c0_17] : memref<8x128xf32, #tpu.memory_space<vmem>>, vector<8x128xf32>
    tpu.vector_store %arg6[%c0_16, %c0_17], %32 {strides = array<i32>} : memref<8x128xf32, #tpu.memory_space<vmem>>, vector<8x128xf32>,
    return
  }
  func.func @transform_0(%arg0: i32) -> (i32, i32) {
    %c0_i32 = arith.constant 0 : i32
    %c0_i32_0 = arith.constant 0 : i32
    %c0_i32_1 = arith.constant 0 : i32
    return %c0_i32, %c0_i32_0 : i32, i32
  }
  func.func @transform_1(%arg0: i32) -> (i32, i32) {
    %c0_i32 = arith.constant 0 : i32
    %c0_i32_0 = arith.constant 0 : i32
    %c0_i32_1 = arith.constant 0 : i32
    return %c0_i32, %c0_i32_0 : i32, i32
  }
  func.func @transform_2(%arg0: i32) -> (i32, i32) {
    %c0_i32 = arith.constant 0 : i32
    %c0_i32_0 = arith.constant 0 : i32
    %c0_i32_1 = arith.constant 0 : i32
    return %c0_i32, %c0_i32_0 : i32, i32
  }
  func.func @transform_3(%arg0: i32) -> (i32, i32) {
    %c0_i32 = arith.constant 0 : i32
    %c0_i32_0 = arith.constant 0 : i32
    %c0_i32_1 = arith.constant 0 : i32
    return %c0_i32, %c0_i32_0 : i32, i32
  }
  func.func @transform_4(%arg0: i32) -> (i32, i32) {
    %c0_i32 = arith.constant 0 : i32
    %c0_i32_0 = arith.constant 0 : i32
    %c0_i32_1 = arith.constant 0 : i32
    return %c0_i32, %c0_i32_0 : i32, i32
  }
  func.func @transform_5(%arg0: i32) -> (i32, i32) {
    %c0_i32 = arith.constant 0 : i32
    %c0_i32_0 = arith.constant 0 : i32
    %c0_i32_1 = arith.constant 0 : i32
    return %c0_i32, %c0_i32_0 : i32, i32
  }
}

module attributes {stable_mosaic.version = 11 : i64} {
  func.func @heads_reparam_dec3_kernel(%arg0: i32, %arg1: memref<8x128xf32, #tpu.memory_space<vmem>>, %arg2: memref<128x16xf32, #tpu.memory_space<vmem>>, %arg3: memref<1x16xf32, #tpu.memory_space<vmem>>, %arg4: memref<128x16xf32, #tpu.memory_space<vmem>>, %arg5: memref<1x16xf32, #tpu.memory_space<vmem>>, %arg6: memref<8x16xf32, #tpu.memory_space<vmem>>, %arg7: memref<16x128xf32, #tpu.memory_space<vmem>>, %arg8: memref<1x128xf32, #tpu.memory_space<vmem>>, %arg9: memref<8x16xf32, #tpu.memory_space<vmem>>, %arg10: memref<8x16xf32, #tpu.memory_space<vmem>>, %arg11: memref<8x128xf32, #tpu.memory_space<vmem>>) attributes {dimension_semantics = [#tpu.dimension_semantics<arbitrary>], iteration_bounds = array<i64: 1>, scalar_prefetch = 0 : i64, scratch_operands = 0 : i64, tpu.core_type = #tpu.core_type<tc>, window_params = [{pipeline_mode = #tpu.pipeline_mode<synchronous>, transform_indices = @transform_0, window_bounds = array<i64: 8, 128>}, {pipeline_mode = #tpu.pipeline_mode<synchronous>, transform_indices = @transform_1, window_bounds = array<i64: 128, 16>}, {pipeline_mode = #tpu.pipeline_mode<synchronous>, transform_indices = @transform_2, window_bounds = array<i64: 1, 16>}, {pipeline_mode = #tpu.pipeline_mode<synchronous>, transform_indices = @transform_3, window_bounds = array<i64: 128, 16>}, {pipeline_mode = #tpu.pipeline_mode<synchronous>, transform_indices = @transform_4, window_bounds = array<i64: 1, 16>}, {pipeline_mode = #tpu.pipeline_mode<synchronous>, transform_indices = @transform_5, window_bounds = array<i64: 8, 16>}, {pipeline_mode = #tpu.pipeline_mode<synchronous>, transform_indices = @transform_6, window_bounds = array<i64: 16, 128>}, {pipeline_mode = #tpu.pipeline_mode<synchronous>, transform_indices = @transform_7, window_bounds = array<i64: 1, 128>}, {pipeline_mode = #tpu.pipeline_mode<synchronous>, transform_indices = @transform_8, window_bounds = array<i64: 8, 16>}, {pipeline_mode = #tpu.pipeline_mode<synchronous>, transform_indices = @transform_9, window_bounds = array<i64: 8, 16>}, {pipeline_mode = #tpu.pipeline_mode<synchronous>, transform_indices = @transform_10, window_bounds = array<i64: 8, 128>}]} {
    %c0 = arith.constant 0 : index
    %c0_0 = arith.constant 0 : index
    %0 = vector.load %arg1[%c0, %c0_0] : memref<8x128xf32, #tpu.memory_space<vmem>>, vector<8x128xf32>
    %c0_1 = arith.constant 0 : index
    %c0_2 = arith.constant 0 : index
    %1 = vector.load %arg2[%c0_1, %c0_2] : memref<128x16xf32, #tpu.memory_space<vmem>>, vector<128x16xf32>
    %cst = arith.constant dense<0.000000e+00> : vector<8x16xf32>
    %2 = tpu.matmul %0, %1, %cst {dimension_numbers = #tpu.dot_dimension_numbers<[1], [0], [0], [1], [0, 0, 1, 1], [], []>} : vector<8x128xf32>, vector<128x16xf32>, vector<8x16xf32> -> vector<8x16xf32>
    %c0_3 = arith.constant 0 : index
    %c0_4 = arith.constant 0 : index
    %3 = vector.load %arg3[%c0_3, %c0_4] : memref<1x16xf32, #tpu.memory_space<vmem>>, vector<1x16xf32>
    %4 = vector.broadcast %3 : vector<1x16xf32> to vector<8x16xf32>
    %5 = arith.addf %2, %4 : vector<8x16xf32>
    %c0_5 = arith.constant 0 : index
    %c0_6 = arith.constant 0 : index
    %6 = vector.load %arg4[%c0_5, %c0_6] : memref<128x16xf32, #tpu.memory_space<vmem>>, vector<128x16xf32>
    %cst_7 = arith.constant dense<0.000000e+00> : vector<8x16xf32>
    %7 = tpu.matmul %0, %6, %cst_7 {dimension_numbers = #tpu.dot_dimension_numbers<[1], [0], [0], [1], [0, 0, 1, 1], [], []>} : vector<8x128xf32>, vector<128x16xf32>, vector<8x16xf32> -> vector<8x16xf32>
    %c0_8 = arith.constant 0 : index
    %c0_9 = arith.constant 0 : index
    %8 = vector.load %arg5[%c0_8, %c0_9] : memref<1x16xf32, #tpu.memory_space<vmem>>, vector<1x16xf32>
    %9 = vector.broadcast %8 : vector<1x16xf32> to vector<8x16xf32>
    %10 = arith.addf %7, %9 : vector<8x16xf32>
    %c0_10 = arith.constant 0 : index
    %c0_11 = arith.constant 0 : index
    %11 = vector.load %arg6[%c0_10, %c0_11] : memref<8x16xf32, #tpu.memory_space<vmem>>, vector<8x16xf32>
    %12 = math.exp %10 : vector<8x16xf32>
    %13 = arith.mulf %11, %12 : vector<8x16xf32>
    %14 = arith.addf %5, %13 : vector<8x16xf32>
    %c0_12 = arith.constant 0 : index
    %c0_13 = arith.constant 0 : index
    %15 = vector.load %arg7[%c0_12, %c0_13] : memref<16x128xf32, #tpu.memory_space<vmem>>, vector<16x128xf32>
    %cst_14 = arith.constant dense<0.000000e+00> : vector<8x128xf32>
    %16 = tpu.matmul %14, %15, %cst_14 {dimension_numbers = #tpu.dot_dimension_numbers<[1], [0], [0], [1], [0, 0, 1, 1], [], []>} : vector<8x16xf32>, vector<16x128xf32>, vector<8x128xf32> -> vector<8x128xf32>
    %c0_15 = arith.constant 0 : index
    %c0_16 = arith.constant 0 : index
    %17 = vector.load %arg8[%c0_15, %c0_16] : memref<1x128xf32, #tpu.memory_space<vmem>>, vector<1x128xf32>
    %18 = vector.broadcast %17 : vector<1x128xf32> to vector<8x128xf32>
    %19 = arith.addf %16, %18 : vector<8x128xf32>
    %c0_17 = arith.constant 0 : index
    %c0_18 = arith.constant 0 : index
    %20 = vector.load %arg9[%c0_17, %c0_18] : memref<8x16xf32, #tpu.memory_space<vmem>>, vector<8x16xf32>
    tpu.vector_store %arg9[%c0_17, %c0_18], %5 {strides = array<i32>} : memref<8x16xf32, #tpu.memory_space<vmem>>, vector<8x16xf32>,
    %c0_19 = arith.constant 0 : index
    %c0_20 = arith.constant 0 : index
    %21 = vector.load %arg10[%c0_19, %c0_20] : memref<8x16xf32, #tpu.memory_space<vmem>>, vector<8x16xf32>
    tpu.vector_store %arg10[%c0_19, %c0_20], %10 {strides = array<i32>} : memref<8x16xf32, #tpu.memory_space<vmem>>, vector<8x16xf32>,
    %c0_21 = arith.constant 0 : index
    %c0_22 = arith.constant 0 : index
    %22 = vector.load %arg11[%c0_21, %c0_22] : memref<8x128xf32, #tpu.memory_space<vmem>>, vector<8x128xf32>
    tpu.vector_store %arg11[%c0_21, %c0_22], %19 {strides = array<i32>} : memref<8x128xf32, #tpu.memory_space<vmem>>, vector<8x128xf32>,
    return
  }
  func.func @transform_0(%arg0: i32) -> (i32, i32) {
    %c0_i32 = arith.constant 0 : i32
    %c0_i32_0 = arith.constant 0 : i32
    %c0_i32_1 = arith.constant 0 : i32
    return %c0_i32, %c0_i32_0 : i32, i32
  }
  func.func @transform_1(%arg0: i32) -> (i32, i32) {
    %c0_i32 = arith.constant 0 : i32
    %c0_i32_0 = arith.constant 0 : i32
    %c0_i32_1 = arith.constant 0 : i32
    return %c0_i32, %c0_i32_0 : i32, i32
  }
  func.func @transform_2(%arg0: i32) -> (i32, i32) {
    %c0_i32 = arith.constant 0 : i32
    %c0_i32_0 = arith.constant 0 : i32
    %c0_i32_1 = arith.constant 0 : i32
    return %c0_i32, %c0_i32_0 : i32, i32
  }
  func.func @transform_3(%arg0: i32) -> (i32, i32) {
    %c0_i32 = arith.constant 0 : i32
    %c0_i32_0 = arith.constant 0 : i32
    %c0_i32_1 = arith.constant 0 : i32
    return %c0_i32, %c0_i32_0 : i32, i32
  }
  func.func @transform_4(%arg0: i32) -> (i32, i32) {
    %c0_i32 = arith.constant 0 : i32
    %c0_i32_0 = arith.constant 0 : i32
    %c0_i32_1 = arith.constant 0 : i32
    return %c0_i32, %c0_i32_0 : i32, i32
  }
  func.func @transform_5(%arg0: i32) -> (i32, i32) {
    %c0_i32 = arith.constant 0 : i32
    %c0_i32_0 = arith.constant 0 : i32
    %c0_i32_1 = arith.constant 0 : i32
    return %c0_i32, %c0_i32_0 : i32, i32
  }
  func.func @transform_6(%arg0: i32) -> (i32, i32) {
    %c0_i32 = arith.constant 0 : i32
    %c0_i32_0 = arith.constant 0 : i32
    %c0_i32_1 = arith.constant 0 : i32
    return %c0_i32, %c0_i32_0 : i32, i32
  }
  func.func @transform_7(%arg0: i32) -> (i32, i32) {
    %c0_i32 = arith.constant 0 : i32
    %c0_i32_0 = arith.constant 0 : i32
    %c0_i32_1 = arith.constant 0 : i32
    return %c0_i32, %c0_i32_0 : i32, i32
  }
  func.func @transform_8(%arg0: i32) -> (i32, i32) {
    %c0_i32 = arith.constant 0 : i32
    %c0_i32_0 = arith.constant 0 : i32
    %c0_i32_1 = arith.constant 0 : i32
    return %c0_i32, %c0_i32_0 : i32, i32
  }
  func.func @transform_9(%arg0: i32) -> (i32, i32) {
    %c0_i32 = arith.constant 0 : i32
    %c0_i32_0 = arith.constant 0 : i32
    %c0_i32_1 = arith.constant 0 : i32
    return %c0_i32, %c0_i32_0 : i32, i32
  }
  func.func @transform_10(%arg0: i32) -> (i32, i32) {
    %c0_i32 = arith.constant 0 : i32
    %c0_i32_0 = arith.constant 0 : i32
    %c0_i32_1 = arith.constant 0 : i32
    return %c0_i32, %c0_i32_0 : i32, i32
  }
}

module attributes {stable_mosaic.version = 11 : i64} {
  func.func @deconv_phase_kernel(%arg0: i32, %arg1: memref<1x8x512xf32, #tpu.memory_space<vmem>>, %arg2: memref<1x512x64xf32, #tpu.memory_space<vmem>>, %arg3: memref<1x64xf32, #tpu.memory_space<vmem>>, %arg4: memref<1x8x64xf32, #tpu.memory_space<vmem>>) attributes {dimension_semantics = [#tpu.dimension_semantics<parallel>], iteration_bounds = array<i64: 4>, scalar_prefetch = 0 : i64, scratch_operands = 0 : i64, tpu.core_type = #tpu.core_type<tc>, window_params = [{transform_indices = @transform_0, window_bounds = array<i64: 1, 8, 512>}, {transform_indices = @transform_1, window_bounds = array<i64: 1, 512, 64>}, {pipeline_mode = #tpu.pipeline_mode<synchronous>, transform_indices = @transform_2, window_bounds = array<i64: 1, 64>}, {transform_indices = @transform_3, window_bounds = array<i64: 1, 8, 64>}]} {
    %c0 = arith.constant 0 : index
    %c0_0 = arith.constant 0 : index
    %c0_1 = arith.constant 0 : index
    %0 = vector.load %arg1[%c0, %c0_0, %c0_1] : memref<1x8x512xf32, #tpu.memory_space<vmem>>, vector<1x8x512xf32>
    %1 = vector.shape_cast %0 : vector<1x8x512xf32> to vector<8x512xf32>
    %c0_2 = arith.constant 0 : index
    %c0_3 = arith.constant 0 : index
    %c0_4 = arith.constant 0 : index
    %2 = vector.load %arg2[%c0_2, %c0_3, %c0_4] : memref<1x512x64xf32, #tpu.memory_space<vmem>>, vector<1x512x64xf32>
    %3 = vector.shape_cast %2 : vector<1x512x64xf32> to vector<512x64xf32>
    %cst = arith.constant dense<0.000000e+00> : vector<8x64xf32>
    %4 = tpu.matmul %1, %3, %cst {dimension_numbers = #tpu.dot_dimension_numbers<[1], [0], [0], [1], [0, 0, 1, 1], [], []>} : vector<8x512xf32>, vector<512x64xf32>, vector<8x64xf32> -> vector<8x64xf32>
    %c0_5 = arith.constant 0 : index
    %c0_6 = arith.constant 0 : index
    %5 = vector.load %arg3[%c0_5, %c0_6] : memref<1x64xf32, #tpu.memory_space<vmem>>, vector<1x64xf32>
    %6 = vector.broadcast %5 : vector<1x64xf32> to vector<8x64xf32>
    %7 = arith.addf %4, %6 : vector<8x64xf32>
    %cst_7 = arith.constant 0.000000e+00 : f32
    %8 = vector.broadcast %cst_7 : f32 to vector<8x64xf32>
    %9 = arith.maximumf %7, %8 : vector<8x64xf32>
    %c0_8 = arith.constant 0 : index
    %c0_9 = arith.constant 0 : index
    %c0_10 = arith.constant 0 : index
    %10 = vector.load %arg4[%c0_8, %c0_9, %c0_10] : memref<1x8x64xf32, #tpu.memory_space<vmem>>, vector<1x8x64xf32>
    %11 = vector.shape_cast %10 : vector<1x8x64xf32> to vector<8x64xf32>
    %12 = vector.shape_cast %9 : vector<8x64xf32> to vector<1x8x64xf32>
    tpu.vector_store %arg4[%c0_8, %c0_9, %c0_10], %12 {strides = array<i32>} : memref<1x8x64xf32, #tpu.memory_space<vmem>>, vector<1x8x64xf32>,
    return
  }
  func.func @transform_0(%arg0: i32) -> (i32, i32, i32) {
    %c0_i32 = arith.constant 0 : i32
    %c0_i32_0 = arith.constant 0 : i32
    %c0_i32_1 = arith.constant 0 : i32
    return %arg0, %c0_i32, %c0_i32_0 : i32, i32, i32
  }
  func.func @transform_1(%arg0: i32) -> (i32, i32, i32) {
    %c0_i32 = arith.constant 0 : i32
    %c0_i32_0 = arith.constant 0 : i32
    %c0_i32_1 = arith.constant 0 : i32
    return %arg0, %c0_i32, %c0_i32_0 : i32, i32, i32
  }
  func.func @transform_2(%arg0: i32) -> (i32, i32) {
    %c0_i32 = arith.constant 0 : i32
    %c0_i32_0 = arith.constant 0 : i32
    %c0_i32_1 = arith.constant 0 : i32
    return %c0_i32, %c0_i32_0 : i32, i32
  }
  func.func @transform_3(%arg0: i32) -> (i32, i32, i32) {
    %c0_i32 = arith.constant 0 : i32
    %c0_i32_0 = arith.constant 0 : i32
    %c0_i32_1 = arith.constant 0 : i32
    return %arg0, %c0_i32, %c0_i32_0 : i32, i32, i32
  }
}

module attributes {stable_mosaic.version = 11 : i64} {
  func.func @deconv_phase_kernel(%arg0: i32, %arg1: memref<1x32x256xf32, #tpu.memory_space<vmem>>, %arg2: memref<1x256x32xf32, #tpu.memory_space<vmem>>, %arg3: memref<1x32xf32, #tpu.memory_space<vmem>>, %arg4: memref<1x32x32xf32, #tpu.memory_space<vmem>>) attributes {dimension_semantics = [#tpu.dimension_semantics<parallel>], iteration_bounds = array<i64: 4>, scalar_prefetch = 0 : i64, scratch_operands = 0 : i64, tpu.core_type = #tpu.core_type<tc>, window_params = [{transform_indices = @transform_0, window_bounds = array<i64: 1, 32, 256>}, {transform_indices = @transform_1, window_bounds = array<i64: 1, 256, 32>}, {pipeline_mode = #tpu.pipeline_mode<synchronous>, transform_indices = @transform_2, window_bounds = array<i64: 1, 32>}, {transform_indices = @transform_3, window_bounds = array<i64: 1, 32, 32>}]} {
    %c0 = arith.constant 0 : index
    %c0_0 = arith.constant 0 : index
    %c0_1 = arith.constant 0 : index
    %0 = vector.load %arg1[%c0, %c0_0, %c0_1] : memref<1x32x256xf32, #tpu.memory_space<vmem>>, vector<1x32x256xf32>
    %1 = vector.shape_cast %0 : vector<1x32x256xf32> to vector<32x256xf32>
    %c0_2 = arith.constant 0 : index
    %c0_3 = arith.constant 0 : index
    %c0_4 = arith.constant 0 : index
    %2 = vector.load %arg2[%c0_2, %c0_3, %c0_4] : memref<1x256x32xf32, #tpu.memory_space<vmem>>, vector<1x256x32xf32>
    %3 = vector.shape_cast %2 : vector<1x256x32xf32> to vector<256x32xf32>
    %cst = arith.constant dense<0.000000e+00> : vector<32x32xf32>
    %4 = tpu.matmul %1, %3, %cst {dimension_numbers = #tpu.dot_dimension_numbers<[1], [0], [0], [1], [0, 0, 1, 1], [], []>} : vector<32x256xf32>, vector<256x32xf32>, vector<32x32xf32> -> vector<32x32xf32>
    %c0_5 = arith.constant 0 : index
    %c0_6 = arith.constant 0 : index
    %5 = vector.load %arg3[%c0_5, %c0_6] : memref<1x32xf32, #tpu.memory_space<vmem>>, vector<1x32xf32>
    %6 = vector.broadcast %5 : vector<1x32xf32> to vector<32x32xf32>
    %7 = arith.addf %4, %6 : vector<32x32xf32>
    %cst_7 = arith.constant 0.000000e+00 : f32
    %8 = vector.broadcast %cst_7 : f32 to vector<32x32xf32>
    %9 = arith.maximumf %7, %8 : vector<32x32xf32>
    %c0_8 = arith.constant 0 : index
    %c0_9 = arith.constant 0 : index
    %c0_10 = arith.constant 0 : index
    %10 = vector.load %arg4[%c0_8, %c0_9, %c0_10] : memref<1x32x32xf32, #tpu.memory_space<vmem>>, vector<1x32x32xf32>
    %11 = vector.shape_cast %10 : vector<1x32x32xf32> to vector<32x32xf32>
    %12 = vector.shape_cast %9 : vector<32x32xf32> to vector<1x32x32xf32>
    tpu.vector_store %arg4[%c0_8, %c0_9, %c0_10], %12 {strides = array<i32>} : memref<1x32x32xf32, #tpu.memory_space<vmem>>, vector<1x32x32xf32>,
    return
  }
  func.func @transform_0(%arg0: i32) -> (i32, i32, i32) {
    %c0_i32 = arith.constant 0 : i32
    %c0_i32_0 = arith.constant 0 : i32
    %c0_i32_1 = arith.constant 0 : i32
    return %arg0, %c0_i32, %c0_i32_0 : i32, i32, i32
  }
  func.func @transform_1(%arg0: i32) -> (i32, i32, i32) {
    %c0_i32 = arith.constant 0 : i32
    %c0_i32_0 = arith.constant 0 : i32
    %c0_i32_1 = arith.constant 0 : i32
    return %arg0, %c0_i32, %c0_i32_0 : i32, i32, i32
  }
  func.func @transform_2(%arg0: i32) -> (i32, i32) {
    %c0_i32 = arith.constant 0 : i32
    %c0_i32_0 = arith.constant 0 : i32
    %c0_i32_1 = arith.constant 0 : i32
    return %c0_i32, %c0_i32_0 : i32, i32
  }
  func.func @transform_3(%arg0: i32) -> (i32, i32, i32) {
    %c0_i32 = arith.constant 0 : i32
    %c0_i32_0 = arith.constant 0 : i32
    %c0_i32_1 = arith.constant 0 : i32
    return %arg0, %c0_i32, %c0_i32_0 : i32, i32, i32
  }
}

module attributes {stable_mosaic.version = 11 : i64} {
  func.func @deconv_phase_kernel(%arg0: i32, %arg1: memref<1x128x128xf32, #tpu.memory_space<vmem>>, %arg2: memref<1x128x16xf32, #tpu.memory_space<vmem>>, %arg3: memref<1x16xf32, #tpu.memory_space<vmem>>, %arg4: memref<1x128x16xf32, #tpu.memory_space<vmem>>) attributes {dimension_semantics = [#tpu.dimension_semantics<parallel>], iteration_bounds = array<i64: 4>, scalar_prefetch = 0 : i64, scratch_operands = 0 : i64, tpu.core_type = #tpu.core_type<tc>, window_params = [{transform_indices = @transform_0, window_bounds = array<i64: 1, 128, 128>}, {transform_indices = @transform_1, window_bounds = array<i64: 1, 128, 16>}, {pipeline_mode = #tpu.pipeline_mode<synchronous>, transform_indices = @transform_2, window_bounds = array<i64: 1, 16>}, {transform_indices = @transform_3, window_bounds = array<i64: 1, 128, 16>}]} {
    %c0 = arith.constant 0 : index
    %c0_0 = arith.constant 0 : index
    %c0_1 = arith.constant 0 : index
    %0 = vector.load %arg1[%c0, %c0_0, %c0_1] : memref<1x128x128xf32, #tpu.memory_space<vmem>>, vector<1x128x128xf32>
    %1 = vector.shape_cast %0 : vector<1x128x128xf32> to vector<128x128xf32>
    %c0_2 = arith.constant 0 : index
    %c0_3 = arith.constant 0 : index
    %c0_4 = arith.constant 0 : index
    %2 = vector.load %arg2[%c0_2, %c0_3, %c0_4] : memref<1x128x16xf32, #tpu.memory_space<vmem>>, vector<1x128x16xf32>
    %3 = vector.shape_cast %2 : vector<1x128x16xf32> to vector<128x16xf32>
    %cst = arith.constant dense<0.000000e+00> : vector<128x16xf32>
    %4 = tpu.matmul %1, %3, %cst {dimension_numbers = #tpu.dot_dimension_numbers<[1], [0], [0], [1], [0, 0, 1, 1], [], []>} : vector<128x128xf32>, vector<128x16xf32>, vector<128x16xf32> -> vector<128x16xf32>
    %c0_5 = arith.constant 0 : index
    %c0_6 = arith.constant 0 : index
    %5 = vector.load %arg3[%c0_5, %c0_6] : memref<1x16xf32, #tpu.memory_space<vmem>>, vector<1x16xf32>
    %6 = vector.broadcast %5 : vector<1x16xf32> to vector<128x16xf32>
    %7 = arith.addf %4, %6 : vector<128x16xf32>
    %cst_7 = arith.constant 0.000000e+00 : f32
    %8 = vector.broadcast %cst_7 : f32 to vector<128x16xf32>
    %9 = arith.maximumf %7, %8 : vector<128x16xf32>
    %c0_8 = arith.constant 0 : index
    %c0_9 = arith.constant 0 : index
    %c0_10 = arith.constant 0 : index
    %10 = vector.load %arg4[%c0_8, %c0_9, %c0_10] : memref<1x128x16xf32, #tpu.memory_space<vmem>>, vector<1x128x16xf32>
    %11 = vector.shape_cast %10 : vector<1x128x16xf32> to vector<128x16xf32>
    %12 = vector.shape_cast %9 : vector<128x16xf32> to vector<1x128x16xf32>
    tpu.vector_store %arg4[%c0_8, %c0_9, %c0_10], %12 {strides = array<i32>} : memref<1x128x16xf32, #tpu.memory_space<vmem>>, vector<1x128x16xf32>,
    return
  }
  func.func @transform_0(%arg0: i32) -> (i32, i32, i32) {
    %c0_i32 = arith.constant 0 : i32
    %c0_i32_0 = arith.constant 0 : i32
    %c0_i32_1 = arith.constant 0 : i32
    return %arg0, %c0_i32, %c0_i32_0 : i32, i32, i32
  }
  func.func @transform_1(%arg0: i32) -> (i32, i32, i32) {
    %c0_i32 = arith.constant 0 : i32
    %c0_i32_0 = arith.constant 0 : i32
    %c0_i32_1 = arith.constant 0 : i32
    return %arg0, %c0_i32, %c0_i32_0 : i32, i32, i32
  }
  func.func @transform_2(%arg0: i32) -> (i32, i32) {
    %c0_i32 = arith.constant 0 : i32
    %c0_i32_0 = arith.constant 0 : i32
    %c0_i32_1 = arith.constant 0 : i32
    return %c0_i32, %c0_i32_0 : i32, i32
  }
  func.func @transform_3(%arg0: i32) -> (i32, i32, i32) {
    %c0_i32 = arith.constant 0 : i32
    %c0_i32_0 = arith.constant 0 : i32
    %c0_i32_1 = arith.constant 0 : i32
    return %arg0, %c0_i32, %c0_i32_0 : i32, i32, i32
  }
}

</mosaic_0001>

<bundles_post_ra>
// kernel: _vae_forward.7
= control target key start
LH: loop header
LB: loop body
LE: loop exit
PB: predicated region body
PF: predicated region fallthrough
CT: control target
= control target key end

     0   :  { %vm74_vm0 = vcmask 130048   ;;  %vm253_vm1 = vcmask 261120   ;;  %s1049_s1 = inlined_call_operand.vmem [shape: f32[144,32], index: 1, kind: input, shape index: {}]   ;;  %s1050_s0 = inlined_call_operand.vmem [shape: f32[128,144], index: 0, kind: input, shape index: {}]   ;;  %s1051_s2 = inlined_call_operand.vmem [shape: f32[1,32], index: 2, kind: input, shape index: {}]   ;;  %s1052_s3 = inlined_call_operand.vmem [shape: f32[1,32], index: 3, kind: input, shape index: {}]   ;;  %s1053_s4 = inlined_call_operand.vmem [shape: f32[1,32], index: 4, kind: input, shape index: {}]   ;;  %s1054_s5 = inlined_call_operand.vmem [shape: f32[128,32], index: 5, kind: output, shape index: {}]  }
   0x1   :  { %v67_v0 = vld [vmem:[%s1049_s1 + $0x78] sm:$0xff]  ;;  %v599_v1 = vld [vmem:[%s1049_s1 + $0x88] sm:$0xff]  ;;  %v66_v2 = vld [vmem:[%s1049_s1 + $0x70] sm:$0xff] }
   0x2   :  { %123 = vmatpush.msra.mxu0 %v67_v0  ;;  %520 = vmatpush.msra.mxu2 %v67_v0  ;;  %v607_v3 = vld [vmem:[%s1049_s1 + $0x80] sm:$0xff]  ;;  %v21_v4 = vld [vmem:[%s1050_s0 + $0x8] sm:$0xff]  ;;  %v63_v7 = vld [vmem:[%s1049_s1 + $0x58] sm:$0xff] }
   0x3   :  { %521 = vmatpush.msra.mxu3 %v67_v0  ;;  %202 = vmatpush.msra.mxu1 %v599_v1  ;;  %v65_v5 = vld [vmem:[%s1049_s1 + $0x68] sm:$0xff]  ;;  %v64_v6 = vld [vmem:[%s1049_s1 + $0x60] sm:$0xff]  ;;  %v62_v8 = vld [vmem:[%s1049_s1 + $0x50] sm:$0xff] }
   0x4   :  { %124 = vmatpush.msra.mxu0 %v66_v2  ;;  %522 = vmatpush.msra.mxu2 %v66_v2  ;;  %v23_v9 = vld [vmem:[%s1050_s0 + $0x18] sm:$0xff]  ;;  %v61_v10 = vld [vmem:[%s1049_s1 + $0x48] sm:$0xff]  ;;  %v60_v11 = vld [vmem:[%s1049_s1 + $0x40] sm:$0xff] }
   0x5   :  { %523 = vmatpush.msra.mxu3 %v66_v2  ;;  %203 = vmatpush.msra.mxu1 %v607_v3  ;;  %v59_v12 = vld [vmem:[%s1049_s1 + $0x38] sm:$0xff]  ;;  %v58_v13 = vld [vmem:[%s1049_s1 + $0x30] sm:$0xff]  ;;  %v25_v14 = vld [vmem:[%s1050_s0 + $0x28] sm:$0xff] }
   0x6   :  { %504 = vmatmul.msk.f32.vlgmr.msra.gmra.mxu1 %vm74_vm0, %v21_v4  ;;  %125 = vmatpush.msra.mxu0 %v65_v5  ;;  %v57_v15 = vld [vmem:[%s1049_s1 + $0x28] sm:$0xff]  ;;  %v56_v16 = vld [vmem:[%s1049_s1 + $0x20] sm:$0xff]  ;;  %v55_v17 = vld [vmem:[%s1049_s1 + $0x18] sm:$0xff] }
   0x7   :  { %524 = vmatpush.msra.mxu2 %v65_v5  ;;  %525 = vmatpush.msra.mxu3 %v65_v5  ;;  %v54_v18 = vld [vmem:[%s1049_s1 + $0x10] sm:$0xff]  ;;  %v27_v19 = vld [vmem:[%s1050_s0 + $0x38] sm:$0xff]  ;;  %v53_v20 = vld [vmem:[%s1049_s1 + $0x8] sm:$0xff] }
   0x8   :  { %126 = vmatpush.msra.mxu0 %v64_v6  ;;  %v52_v21 = vld [vmem:[%s1049_s1] sm:$0xff]  ;;  %v34_v23 = vld [vmem:[%s1050_s0 + $0x70] sm:$0xff]  ;;  %v29_v25 = vld [vmem:[%s1050_s0 + $0x48] sm:$0xff] }
   0x9   :  { %526 = vmatpush.msra.mxu2 %v64_v6  ;;  %527 = vmatpush.msra.mxu3 %v64_v6  ;;  %v20_v22 = vld [vmem:[%s1050_s0] sm:$0xff]  ;;  %v50_v24 = vld [vmem:[%s1050_s0 + $0xf0] sm:$0xff]  ;;  %v41_v28 = vld [vmem:[%s1050_s0 + $0xa8] sm:$0xff] }
   0xa   :  { %127 = vmatpush.msra.mxu0 %v63_v7  ;;  %v22_v26 = vld [vmem:[%s1050_s0 + $0x10] sm:$0xff]  ;;  %v36_v27 = vld [vmem:[%s1050_s0 + $0x80] sm:$0xff]  ;;  %v31_v29 = vld [vmem:[%s1050_s0 + $0x58] sm:$0xff] }
   0xb   :  { %528 = vmatpush.msra.mxu2 %v63_v7  ;;  %529 = vmatpush.msra.mxu3 %v63_v7  ;;  %v24_v30 = vld [vmem:[%s1050_s0 + $0x20] sm:$0xff]  ;;  %v38_v31 = vld [vmem:[%s1050_s0 + $0x90] sm:$0xff]  ;;  %v43_v32 = vld [vmem:[%s1050_s0 + $0xb8] sm:$0xff] }
   0xc   :  { %128 = vmatpush.msra.mxu0 %v62_v8  ;;  %v33_v33 = vld [vmem:[%s1050_s0 + $0x68] sm:$0xff]  ;;  %v26_v34 = vld [vmem:[%s1050_s0 + $0x30] sm:$0xff]  ;;  %v40_v35 = vld [vmem:[%s1050_s0 + $0xa0] sm:$0xff] }
   0xd   :  { %530 = vmatpush.msra.mxu2 %v62_v8  ;;  %531 = vmatpush.msra.mxu3 %v62_v8  ;;  %v45_v36 = vld [vmem:[%s1050_s0 + $0xc8] sm:$0xff]  ;;  %v35_v37 = vld [vmem:[%s1050_s0 + $0x78] sm:$0xff]  ;;  %v28_v38 = vld [vmem:[%s1050_s0 + $0x40] sm:$0xff] }
   0xe   :  { %505 = vmatmul.msk.f32.gmra.mxu1 %vm74_vm0, %v23_v9  ;;  %129 = vmatpush.msra.mxu0 %v61_v10  ;;  %v42_v39 = vld [vmem:[%s1050_s0 + $0xb0] sm:$0xff]  ;;  %v47_v40 = vld [vmem:[%s1050_s0 + $0xd8] sm:$0xff]  ;;  %v37_v41 = vld [vmem:[%s1050_s0 + $0x88] sm:$0xff] }
   0xf   :  { %532 = vmatpush.msra.mxu2 %v61_v10  ;;  %533 = vmatpush.msra.mxu3 %v61_v10  ;;  %v30_v42 = vld [vmem:[%s1050_s0 + $0x50] sm:$0xff]  ;;  %v44_v43 = vld [vmem:[%s1050_s0 + $0xc0] sm:$0xff]  ;;  %v49_v44 = vld [vmem:[%s1050_s0 + $0xe8] sm:$0xff] }
  0x10   :  { %130 = vmatpush.msra.mxu0 %v60_v11  ;;  %v39_v45 = vld [vmem:[%s1050_s0 + $0x98] sm:$0xff]  ;;  %v32_v46 = vld [vmem:[%s1050_s0 + $0x60] sm:$0xff]  ;;  %v46_v47 = vld [vmem:[%s1050_s0 + $0xd0] sm:$0xff] }
  0x11   :  { %534 = vmatpush.msra.mxu2 %v60_v11  ;;  %535 = vmatpush.msra.mxu3 %v60_v11  ;;  %v51_v48 = vld [vmem:[%s1050_s0 + $0xf8] sm:$0xff]  ;;  %v48_v49 = vld [vmem:[%s1050_s0 + $0xe0] sm:$0xff] }
  0x12   :  { %131 = vmatpush.msra.mxu0 %v59_v12  ;;  %v772_v4 = vld [vmem:[%s1051_s2] ss:$0 sm:$0xff] }
  0x13   :  { %536 = vmatpush.msra.mxu2 %v59_v12  ;;  %537 = vmatpush.msra.mxu3 %v59_v12 }
  0x14   :  { %132 = vmatpush.msra.mxu0 %v58_v13 }
  0x15   :  { %538 = vmatpush.msra.mxu2 %v58_v13  ;;  %539 = vmatpush.msra.mxu3 %v58_v13 }
  0x16   :  { %506 = vmatmul.msk.f32.gmra.mxu1 %vm74_vm0, %v25_v14  ;;  %133 = vmatpush.msra.mxu0 %v57_v15 }
  0x17   :  { %540 = vmatpush.msra.mxu2 %v57_v15  ;;  %541 = vmatpush.msra.mxu3 %v57_v15 }
  0x18   :  { %134 = vmatpush.msra.mxu0 %v56_v16 }
  0x19   :  { %542 = vmatpush.msra.mxu2 %v56_v16  ;;  %543 = vmatpush.msra.mxu3 %v56_v16 }
  0x1a   :  { %135 = vmatpush.msra.mxu0 %v55_v17 }
  0x1b   :  { %544 = vmatpush.msra.mxu2 %v55_v17  ;;  %545 = vmatpush.msra.mxu3 %v55_v17 }
  0x1c   :  { %136 = vmatpush.msra.mxu0 %v54_v18 }
  0x1d   :  { %546 = vmatpush.msra.mxu2 %v54_v18  ;;  %547 = vmatpush.msra.mxu3 %v54_v18 }
  0x1e   :  { %507 = vmatmul.msk.f32.gmra.mxu1 %vm74_vm0, %v27_v19  ;;  %137 = vmatpush.msra.mxu0 %v53_v20 }
  0x1f   :  { %548 = vmatpush.msra.mxu2 %v53_v20  ;;  %549 = vmatpush.msra.mxu3 %v53_v20 }
  0x20   :  { %138 = vmatpush.msra.mxu0 %v52_v21 }
  0x21   :  { %550 = vmatpush.msra.mxu2 %v52_v21  ;;  %551 = vmatpush.msra.mxu3 %v52_v21 }
  0x22   :  { %139 = vmatmul.f32.vlgmr.msra.gmra.mxu0 %v20_v22  ;;  %160 = vmatmul.f32.vlgmr.msra.gmra.mxu2 %v34_v23 }
  0x23   :  { %184 = vmatmul.f32.vlgmr.msra.gmra.mxu3 %v50_v24 }
  0x24   :  { %552 = vmatpush.msrb.mxu3 %v599_v1 }
  0x26   :  { %508 = vmatmul.msk.f32.gmra.mxu1 %vm74_vm0, %v29_v25  ;;  %553 = vmatpush.msrb.mxu3 %v607_v3 }
  0x2a   :  { %142 = vmatmul.f32.gmra.mxu0 %v22_v26  ;;  %163 = vmatmul.f32.gmra.mxu2 %v36_v27 }
  0x2b   :  { %514 = vmatmul.msk.f32.vlgmr.msrb.gmra.mxu3 %vm74_vm0, %v41_v28 }
  0x2e   :  { %509 = vmatmul.msk.f32.gmra.mxu1 %vm74_vm0, %v31_v29 }
  0x32   :  { %145 = vmatmul.f32.gmra.mxu0 %v24_v30  ;;  %166 = vmatmul.f32.gmra.mxu2 %v38_v31 }
  0x33   :  { %515 = vmatmul.msk.f32.gmra.mxu3 %vm74_vm0, %v43_v32 }
  0x36   :  { %510 = vmatmul.msk.f32.gmra.mxu1 %vm74_vm0, %v33_v33 }
  0x3a   :  { %148 = vmatmul.f32.gmra.mxu0 %v26_v34  ;;  %169 = vmatmul.f32.gmra.mxu2 %v40_v35 }
  0x3b   :  { %516 = vmatmul.msk.f32.gmra.mxu3 %vm74_vm0, %v45_v36 }
  0x3e   :  { %511 = vmatmul.msk.f32.gmra.mxu1 %vm74_vm0, %v35_v37 }
  0x42   :  { %151 = vmatmul.f32.gmra.mxu0 %v28_v38  ;;  %172 = vmatmul.f32.gmra.mxu2 %v42_v39 }
  0x43   :  { %517 = vmatmul.msk.f32.gmra.mxu3 %vm74_vm0, %v47_v40 }
  0x46   :  { %512 = vmatmul.msk.f32.gmra.mxu1 %vm74_vm0, %v37_v41 }
  0x4a   :  { %154 = vmatmul.f32.gmra.mxu0 %v30_v42  ;;  %175 = vmatmul.f32.gmra.mxu2 %v44_v43 }
  0x4b   :  { %518 = vmatmul.msk.f32.gmra.mxu3 %vm74_vm0, %v49_v44 }
  0x4e   :  { %513 = vmatmul.msk.f32.gmra.mxu1 %vm74_vm0, %v39_v45 }
  0x52   :  { %157 = vmatmul.f32.gmra.mxu0 %v32_v46  ;;  %178 = vmatmul.f32.gmra.mxu2 %v46_v47 }
  0x53   :  { %519 = vmatmul.msk.f32.gmra.mxu3 %vm74_vm0, %v51_v48 }
  0x5a   :  { %181 = vmatmul.f32.gmra.mxu2 %v48_v49 }
  0x83   :  { %v205_v50 = vpop.f32.mrf.mxu1 }
  0x8b   :  { %v208_v51 = vpop.f32.mrf.mxu1 }
  0x93   :  { %v211_v52 = vpop.f32.mrf.mxu1 }
  0x9b   :  { %v214_v53 = vpop.f32.mrf.mxu1 }
  0x9f   :  { %v140_v54 = vpop.f32.mrf.mxu0 }
  0xa0   :  { %v141_v9 = vadd.f32 %v772_v4, %v140_v54 }
  0xa2   :  { %v780_v14 = vadd.f32 %v205_v50, %v141_v9 }
  0xa3   :  { %v217_v55 = vpop.f32.mrf.mxu1 }
  0xa4   :  { %v254_v22 = vsel %vm253_vm1, %v780_v14, 0.0 }
  0xa5   :  { %v161_v56 = vpop.f32.mrf.mxu2 }
  0xa6   :  { %v767_v57 = vpop.f32.mrf.mxu3  ;;  %v162_v34 = vadd.f32 %v772_v4, %v161_v56 }
  0xa7   :  { %v143_v58 = vpop.f32.mrf.mxu0 }
  0xa8   :  { %v144_v7 = vadd.f32 %v772_v4, %v143_v58 }
  0xaa   :  { %v777_v11 = vadd.f32 %v208_v51, %v144_v7 }
  0xab   :  { %v220_v59 = vpop.f32.mrf.mxu1 }
  0xac   :  { %v255_v18 = vsel %vm253_vm1, %v777_v11, 0.0 }
  0xad   :  { %v164_v60 = vpop.f32.mrf.mxu2  ;;  %v256_v25 = vadd.f32 %v255_v18, %v254_v22 }
  0xae   :  { %v235_v61 = vpop.f32.mrf.mxu3  ;;  %v165_v38 = vadd.f32 %v772_v4, %v164_v60 }
  0xaf   :  { %v146_v62 = vpop.f32.mrf.mxu0 }
  0xb0   :  { %v147_v10 = vadd.f32 %v772_v4, %v146_v62 }
  0xb2   :  { %v782_v15 = vadd.f32 %v211_v52, %v147_v10 }
  0xb3   :  { %v223_v63 = vpop.f32.mrf.mxu1 }
  0xb4   :  { %v257_v23 = vsel %vm253_vm1, %v782_v15, 0.0 }
  0xb5   :  { %v167_v0 = vpop.f32.mrf.mxu2  ;;  %v258_v29 = vadd.f32 %v257_v23, %v256_v25 }
  0xb6   :  { %v238_v1 = vpop.f32.mrf.mxu3  ;;  %v168_v43 = vadd.f32 %v772_v4, %v167_v0 }
  0xb7   :  { %v149_v2 = vpop.f32.mrf.mxu0 }
  0xb8   :  { %v150_v12 = vadd.f32 %v772_v4, %v149_v2 }
  0xba   :  { %v787_v19 = vadd.f32 %v214_v53, %v150_v12 }
  0xbb   :  { %v226_v5 = vpop.f32.mrf.mxu1 }
  0xbc   :  { %v259_v27 = vsel %vm253_vm1, %v787_v19, 0.0  ;;  %v807_v39 = vadd.f32 %v226_v5, %v162_v34 }
  0xbd   :  { %v170_v3 = vpop.f32.mrf.mxu2  ;;  %v260_v32 = vadd.f32 %v259_v27, %v258_v29 }
  0xbe   :  { %v241_v8 = vpop.f32.mrf.mxu3  ;;  %v171_v44 = vadd.f32 %v772_v4, %v170_v3  ;;  %v267_v50 = vsel %vm253_vm1, %v807_v39, 0.0 }
  0xbf   :  { %v152_v6 = vpop.f32.mrf.mxu0 }
  0xc0   :  { %v153_v16 = vadd.f32 %v772_v4, %v152_v6  ;;  %v822_v54 = vadd.f32 %v235_v61, %v171_v44 }
  0xc2   :  { %v794_v24 = vadd.f32 %v217_v55, %v153_v16  ;;  %v273_v61 = vsel %vm253_vm1, %v822_v54, 0.0 }
  0xc3   :  { %v229_v21 = vpop.f32.mrf.mxu1 }
  0xc4   :  { %v261_v31 = vsel %vm253_vm1, %v794_v24, 0.0  ;;  %v813_v45 = vadd.f32 %v229_v21, %v165_v38 }
  0xc5   :  { %v173_v13 = vpop.f32.mrf.mxu2  ;;  %v262_v37 = vadd.f32 %v261_v31, %v260_v32 }
  0xc6   :  { %v244_v26 = vpop.f32.mrf.mxu3  ;;  %v174_v51 = vadd.f32 %v772_v4, %v173_v13  ;;  %v269_v55 = vsel %vm253_vm1, %v813_v45, 0.0  ;;  %v186_v13 = vadd.f32 %v772_v4, %v767_v57 }
  0xc7   :  { %v155_v17 = vpop.f32.mrf.mxu0 }
  0xc8   :  { %v156_v20 = vadd.f32 %v772_v4, %v155_v17  ;;  %v827_v60 = vadd.f32 %v238_v1, %v174_v51 }
  0xca   :  { %v798_v28 = vadd.f32 %v220_v59, %v156_v20  ;;  %v562_v59 = vmov 128.0   ;;  %v275_v6 = vsel %vm253_vm1, %v827_v60, 0.0 }
  0xcb   :  { %v232_v42 = vpop.f32.mrf.mxu1  ;;  %558 = vrcp.f32 %v562_v59 }
  0xcc   :  { %v263_v35 = vsel %vm253_vm1, %v798_v28, 0.0  ;;  %v820_v52 = vadd.f32 %v232_v42, %v168_v43 }
  0xcd   :  { %v176_v30 = vpop.f32.mrf.mxu2  ;;  %v264_v41 = vadd.f32 %v263_v35, %v262_v37 }
  0xce   :  { %v247_v47 = vpop.f32.mrf.mxu3  ;;  %v177_v56 = vadd.f32 %v772_v4, %v176_v30  ;;  %v271_v62 = vsel %vm253_vm1, %v820_v52, 0.0 }
  0xcf   :  { %v158_v33 = vpop.f32.mrf.mxu0 }
  0xd0   :  { %v159_v36 = vadd.f32 %v772_v4, %v158_v33  ;;  %v834_v2 = vadd.f32 %v241_v8, %v177_v56 }
  0xd1   :  { %v559_v9 = vpop.eup %558 }
  0xd2   :  { %v809_v40 = vadd.f32 %v223_v63, %v159_v36  ;;  %v277_v16 = vsel %vm253_vm1, %v834_v2, 0.0  ;;  %v292_v21 = vmul.f32 128.0, %v559_v9  ;;  %vm296_vm2 = vweird.f32 %v559_v9 }
  0xd4   :  { %v265_v46 = vsel %vm253_vm1, %v809_v40, 0.0 }
  0xd5   :  { %v266_v48 = vadd.f32 %v265_v46, %v264_v41  ;;  %v179_v49 = vpop.f32.mrf.mxu2 }
  0xd6   :  { %v180_v63 = vadd.f32 %v772_v4, %v179_v49  ;;  %v250_v12 = vpop.f32.mrf.mxu3 }
  0xd7   :  { %v268_v53 = vadd.f32 %v267_v50, %v266_v48  ;;  %v849_v20 = vadd.f32 %v250_v12, %v186_v13 }
  0xd8   :  { %v838_v7 = vadd.f32 %v244_v26, %v180_v63 }
  0xd9   :  { %v270_v58 = vadd.f32 %v269_v55, %v268_v53  ;;  %v283_v57 = vsel %vm253_vm1, %v849_v20, 0.0 }
  0xda   :  { %v279_v18 = vsel %vm253_vm1, %v838_v7, 0.0 }
  0xdb   :  { %v272_v0 = vadd.f32 %v271_v62, %v270_v58 }
  0xdd   :  { %v274_v3 = vadd.f32 %v273_v61, %v272_v0  ;;  %v182_v5 = vpop.f32.mrf.mxu2 }
  0xde   :  { %v183_v1 = vadd.f32 %v772_v4, %v182_v5  ;;  %v293_v4 = vsub.f32 1.0, %v292_v21 }
  0xdf   :  { %v276_v10 = vadd.f32 %v275_v6, %v274_v3 }
  0xe0   :  { %v845_v8 = vadd.f32 %v247_v47, %v183_v1  ;;  %v294_v29 = vmul.f32 %v559_v9, %v293_v4 }
  0xe1   :  { %v278_v17 = vadd.f32 %v277_v16, %v276_v10 }
  0xe2   :  { %v281_v23 = vsel %vm253_vm1, %v845_v8, 0.0  ;;  %v295_v32 = vadd.f32 %v559_v9, %v294_v29 }
  0xe3   :  { %v280_v22 = vadd.f32 %v279_v18, %v278_v17 }
  0xe4   :  { %v855_v35 = vsel %vm296_vm2, %v559_v9, %v295_v32 }
  0xe5   :  { %v282_v25 = vadd.f32 %v281_v23, %v280_v22 }
  0xe7   :  { %v284_v26 = vadd.f32 %v283_v57, %v282_v25 }
  0xe9   :  { %v285_v27 = vrot.slane %v284_v26, 4 }
  0xeb   :  { %v286_v30 = vadd.f32 %v285_v27, %v284_v26 }
  0xed   :  { %v287_v31 = vrot.slane %v286_v30, 2 }
  0xef   :  { %v288_v33 = vadd.f32 %v287_v31, %v286_v30 }
  0xf1   :  { %v289_v34 = vrot.slane %v288_v33, 1 }
  0xf3   :  { %v290_v36 = vadd.f32 %v289_v34, %v288_v33 }
  0xf5   :  { %v298_v37 = vmul.f32 %v855_v35, %v290_v36 }
  0xf7   :  { %v859_v38 = vsub.f32 %v780_v14, %v298_v37  ;;  %v862_v41 = vsub.f32 %v777_v11, %v298_v37  ;;  %v865_v42 = vsub.f32 %v782_v15, %v298_v37  ;;  %v868_v43 = vsub.f32 %v787_v19, %v298_v37 }
  0xf8   :  { %v875_v47 = vsub.f32 %v794_v24, %v298_v37  ;;  %v880_v11 = vsub.f32 %v798_v28, %v298_v37  ;;  %v887_v50 = vsub.f32 %v809_v40, %v298_v37  ;;  %v893_v28 = vsub.f32 %v807_v39, %v298_v37 }
  0xf9   :  { %v315_v44 = vmul.f32 %v859_v38, %v859_v38  ;;  %v316_v46 = vmul.f32 %v862_v41, %v862_v41  ;;  %v317_v14 = vmul.f32 %v865_v42, %v865_v42  ;;  %v318_v15 = vmul.f32 %v868_v43, %v868_v43 }
  0xfa   :  { %v319_v24 = vmul.f32 %v875_v47, %v875_v47  ;;  %v320_v55 = vmul.f32 %v880_v11, %v880_v11  ;;  %v899_v59 = vsub.f32 %v813_v45, %v298_v37  ;;  %v321_v40 = vmul.f32 %v887_v50, %v887_v50 }
  0xfb   :  { %v331_v19 = vsel %vm253_vm1, %v315_v44, 0.0  ;;  %v332_v48 = vsel %vm253_vm1, %v316_v46, 0.0  ;;  %v334_v51 = vsel %vm253_vm1, %v317_v14, 0.0  ;;  %v336_v56 = vsel %vm253_vm1, %v318_v15, 0.0 }
  0xfc   :  { %v333_v49 = vadd.f32 %v332_v48, %v331_v19  ;;  %v338_v62 = vsel %vm253_vm1, %v319_v24, 0.0  ;;  %v905_v0 = vsub.f32 %v820_v52, %v298_v37  ;;  %v322_v39 = vmul.f32 %v893_v28, %v893_v28 }
  0xfd   :  { %v340_v61 = vsel %vm253_vm1, %v320_v55, 0.0  ;;  %v911_v5 = vsub.f32 %v822_v54, %v298_v37  ;;  %v323_v45 = vmul.f32 %v899_v59, %v899_v59  ;;  %v342_v6 = vsel %vm253_vm1, %v321_v40, 0.0 }
  0xfe   :  { %v335_v53 = vadd.f32 %v334_v51, %v333_v49  ;;  %v917_v9 = vsub.f32 %v827_v60, %v298_v37  ;;  %v324_v52 = vmul.f32 %v905_v0, %v905_v0  ;;  %v344_v10 = vsel %vm253_vm1, %v322_v39, 0.0 }
  0xff   :  { %v923_v13 = vsub.f32 %v834_v2, %v298_v37  ;;  %v325_v54 = vmul.f32 %v911_v5, %v911_v5  ;;  %v346_v16 = vsel %vm253_vm1, %v323_v45, 0.0  ;;  %v312_v18 = vsub.f32 %v838_v7, %v298_v37 }
 0x100   :  { %v337_v58 = vadd.f32 %v336_v56, %v335_v53  ;;  %v326_v60 = vmul.f32 %v917_v9, %v917_v9  ;;  %v348_v21 = vsel %vm253_vm1, %v324_v52, 0.0  ;;  %v313_v23 = vsub.f32 %v845_v8, %v298_v37 }
 0x101   :  { %v327_v2 = vmul.f32 %v923_v13, %v923_v13  ;;  %v350_v25 = vsel %vm253_vm1, %v325_v54, 0.0  ;;  %v314_v4 = vsub.f32 %v849_v20, %v298_v37  ;;  %v328_v26 = vmul.f32 %v312_v18, %v312_v18 }
 0x102   :  { %v339_v63 = vadd.f32 %v338_v62, %v337_v58  ;;  %v352_v27 = vsel %vm253_vm1, %v326_v60, 0.0  ;;  %v329_v29 = vmul.f32 %v313_v23, %v313_v23 }
 0x103   :  { %v354_v30 = vsel %vm253_vm1, %v327_v2, 0.0  ;;  %v330_v32 = vmul.f32 %v314_v4, %v314_v4  ;;  %v356_v33 = vsel %vm253_vm1, %v328_v26, 0.0 }
 0x104   :  { %v341_v3 = vadd.f32 %v340_v61, %v339_v63  ;;  %v358_v34 = vsel %vm253_vm1, %v329_v29, 0.0 }
 0x105   :  { %v360_v44 = vsel %vm253_vm1, %v330_v32, 0.0 }
 0x106   :  { %v343_v1 = vadd.f32 %v342_v6, %v341_v3 }
 0x108   :  { %v345_v12 = vadd.f32 %v344_v10, %v343_v1 }
 0x10a   :  { %v347_v17 = vadd.f32 %v346_v16, %v345_v12 }
 0x10c   :  { %v349_v22 = vadd.f32 %v348_v21, %v347_v17 }
 0x10e   :  { %v351_v57 = vadd.f32 %v350_v25, %v349_v22 }
 0x110   :  { %v353_v7 = vadd.f32 %v352_v27, %v351_v57 }
 0x112   :  { %v355_v31 = vadd.f32 %v354_v30, %v353_v7 }
 0x114   :  { %v357_v8 = vadd.f32 %v356_v33, %v355_v31 }
 0x116   :  { %v359_v36 = vadd.f32 %v358_v34, %v357_v8 }
 0x118   :  { %v361_v46 = vadd.f32 %v360_v44, %v359_v36 }
 0x11a   :  { %v362_v14 = vrot.slane %v361_v46, 4 }
 0x11c   :  { %v363_v20 = vadd.f32 %v362_v14, %v361_v46 }
 0x11e   :  { %v364_v37 = vrot.slane %v363_v20, 2 }
 0x120   :  { %v365_v15 = vadd.f32 %v364_v37, %v363_v20 }
 0x122   :  { %v366_v19 = vrot.slane %v365_v15, 1 }
 0x124   :  { %v367_v48 = vadd.f32 %v366_v19, %v365_v15 }
 0x126   :  { %v368_v49 = vmul.f32 %v367_v48, %v855_v35  ;;  %v556_v35 = vld [vmem:[%s1052_s3] ss:$0 sm:$0xff] }
 0x128   :  { %v369_v24 = vadd.f32 1e-05, %v368_v49 }
 0x12a   :  { %560 = vrsqrt.f32 %v369_v24  ;;  %vm376_vm4 = vweird.f32 %v369_v24 }
 0x130   :  { %v561_v51 = vpop.eup %560 }
 0x131   :  { %v371_v53 = vmul.f32 %v561_v51, %v369_v24  ;;  %vm377_vm3 = vweird.f32 %v561_v51 }
 0x132   :  { %vm378_vm5 = vmor %vm376_vm4, %vm377_vm3 }
 0x133   :  { %v372_v55 = vmul.f32 %v561_v51, %v371_v53 }
 0x135   :  { %v373_v56 = vmul.f32 0.5, %v372_v55 }
 0x137   :  { %v374_v58 = vsub.f32 1.5, %v373_v56 }
 0x139   :  { %v375_v40 = vmul.f32 %v561_v51, %v374_v58 }
 0x13b   :  { %v379_v62 = vsel %vm378_vm5, %v561_v51, %v375_v40 }
 0x13c   :  { %v380_v63 = vmul.f32 %v379_v62, %v859_v38  ;;  %v381_v39 = vmul.f32 %v379_v62, %v862_v41  ;;  %v382_v61 = vmul.f32 %v379_v62, %v865_v42  ;;  %v383_v3 = vmul.f32 %v379_v62, %v868_v43  ;;  %v955_v38 = vld [vmem:[%s1053_s4] ss:$0 sm:$0xff] }
 0x13d   :  { %v384_v45 = vmul.f32 %v379_v62, %v875_v47  ;;  %v385_v6 = vmul.f32 %v379_v62, %v880_v11  ;;  %v386_v41 = vmul.f32 %v379_v62, %v887_v50  ;;  %v387_v10 = vmul.f32 %v379_v62, %v893_v28 }
 0x13e   :  { %v400_v1 = vmul.f32 %v556_v35, %v380_v63  ;;  %v401_v52 = vmul.f32 %v556_v35, %v381_v39  ;;  %v402_v12 = vmul.f32 %v556_v35, %v382_v61  ;;  %v388_v42 = vmul.f32 %v379_v62, %v899_v59 }
 0x13f   :  { %v389_v43 = vmul.f32 %v379_v62, %v905_v0  ;;  %v390_v47 = vmul.f32 %v379_v62, %v911_v5  ;;  %v403_v54 = vmul.f32 %v556_v35, %v383_v3  ;;  %v391_v11 = vmul.f32 %v379_v62, %v917_v9 }
 0x140   :  { %v392_v16 = vmul.f32 %v379_v62, %v923_v13  ;;  %v393_v17 = vmul.f32 %v379_v62, %v312_v18  ;;  %v404_v60 = vmul.f32 %v556_v35, %v384_v45  ;;  %v394_v21 = vmul.f32 %v379_v62, %v313_v23 }
 0x141   :  { %v405_v22 = vmul.f32 %v556_v35, %v385_v6  ;;  %v420_v50 = vadd.f32 %v955_v38, %v400_v1  ;;  %v421_v28 = vadd.f32 %v955_v38, %v401_v52  ;;  %v395_v2 = vmul.f32 %v379_v62, %v314_v4 }
 0x142   :  { %v406_v25 = vmul.f32 %v556_v35, %v386_v41  ;;  %v407_v59 = vmul.f32 %v556_v35, %v387_v10  ;;  %v422_v0 = vadd.f32 %v955_v38, %v402_v12  ;;  %v408_v57 = vmul.f32 %v556_v35, %v388_v42 }
 0x143   :  { %v409_v5 = vmul.f32 %v556_v35, %v389_v43  ;;  %v410_v26 = vmul.f32 %v556_v35, %v390_v47  ;;  %v423_v9 = vadd.f32 %v955_v38, %v403_v54  ;;  %v411_v27 = vmul.f32 %v556_v35, %v391_v11 }
 0x144   :  { %v412_v13 = vmul.f32 %v556_v35, %v392_v16  ;;  %v413_v18 = vmul.f32 %v556_v35, %v393_v17  ;;  %v424_v23 = vadd.f32 %v955_v38, %v404_v60  ;;  %v414_v7 = vmul.f32 %v556_v35, %v394_v21 }
 0x145   :  { %v425_v29 = vadd.f32 %v955_v38, %v405_v22  ;;  %vm436_vm6 = vcmp.ge.f32.partialorder %v420_v50, 0.0  ;;  %vm437_vm7 = vcmp.ge.f32.partialorder %v421_v28, 0.0  ;;  %v426_v4 = vadd.f32 %v955_v38, %v406_v25 }
 0x146   :  { %v452_v30 = vmul.f32 0.2, %v420_v50  ;;  %v453_v31 = vmul.f32 0.2, %v421_v28  ;;  %v454_v32 = vmul.f32 0.2, %v422_v0  ;;  %v415_v33 = vmul.f32 %v556_v35, %v395_v2 }
 0x147   :  { %v427_v8 = vadd.f32 %v955_v38, %v407_v59  ;;  %vm438_vm8 = vcmp.ge.f32.partialorder %v422_v0, 0.0  ;;  %v455_v34 = vmul.f32 0.2, %v423_v9  ;;  %v428_v36 = vadd.f32 %v955_v38, %v408_v57 }
 0x148   :  { %vm439_vm9 = vcmp.ge.f32.partialorder %v423_v9, 0.0  ;;  %v456_v44 = vmul.f32 0.2, %v424_v23  ;;  %v468_v46 = vsel %vm436_vm6, %v420_v50, %v452_v30  ;;  %v429_v14 = vadd.f32 %v955_v38, %v409_v5 }
 0x149   :  { %vm440_vm10 = vcmp.ge.f32.partialorder %v424_v23, 0.0  ;;  %v457_v20 = vmul.f32 0.2, %v425_v29  ;;  %v469_v37 = vsel %vm437_vm7, %v421_v28, %v453_v31  ;;  %v430_v15 = vadd.f32 %v955_v38, %v410_v26  ;;  %484 = vst.msk [vmem:[%s1054_s5] sm:$0xff] %vm253_vm1, %v468_v46 }
 0x14a   :  { %vm441_vm11 = vcmp.ge.f32.partialorder %v425_v29, 0.0  ;;  %v458_v19 = vmul.f32 0.2, %v426_v4  ;;  %v470_v48 = vsel %vm438_vm8, %v422_v0, %v454_v32  ;;  %v431_v49 = vadd.f32 %v955_v38, %v411_v27  ;;  %485 = vst.msk [vmem:[%s1054_s5 + $0x8] sm:$0xff] %vm253_vm1, %v469_v37 }
 0x14b   :  { %vm442_vm12 = vcmp.ge.f32.partialorder %v426_v4, 0.0  ;;  %v459_v24 = vmul.f32 0.2, %v427_v8  ;;  %v471_v51 = vsel %vm439_vm9, %v423_v9, %v455_v34  ;;  %v432_v53 = vadd.f32 %v955_v38, %v412_v13  ;;  %486 = vst.msk [vmem:[%s1054_s5 + $0x10] sm:$0xff] %vm253_vm1, %v470_v48 }
 0x14c   :  { %vm443_vm13 = vcmp.ge.f32.partialorder %v427_v8, 0.0  ;;  %v460_v55 = vmul.f32 0.2, %v428_v36  ;;  %v472_v56 = vsel %vm440_vm10, %v424_v23, %v456_v44  ;;  %v433_v58 = vadd.f32 %v955_v38, %v413_v18  ;;  %487 = vst.msk [vmem:[%s1054_s5 + $0x18] sm:$0xff] %vm253_vm1, %v471_v51 }
 0x14d   :  { %vm444_vm14 = vcmp.ge.f32.partialorder %v428_v36, 0.0  ;;  %v461_v40 = vmul.f32 0.2, %v429_v14  ;;  %v473_v62 = vsel %vm441_vm11, %v425_v29, %v457_v20  ;;  %v434_v63 = vadd.f32 %v955_v38, %v414_v7  ;;  %488 = vst.msk [vmem:[%s1054_s5 + $0x20] sm:$0xff] %vm253_vm1, %v472_v56 }
 0x14e   :  { %vm445_vm15 = vcmp.ge.f32.partialorder %v429_v14, 0.0  ;;  %v462_v39 = vmul.f32 0.2, %v430_v15  ;;  %v474_v35 = vsel %vm442_vm12, %v426_v4, %v458_v19  ;;  %v435_v61 = vadd.f32 %v955_v38, %v415_v33  ;;  %489 = vst.msk [vmem:[%s1054_s5 + $0x28] sm:$0xff] %vm253_vm1, %v473_v62 }
 0x14f   :  { %vm446_vm0 = vcmp.ge.f32.partialorder %v430_v15, 0.0  ;;  %v463_v3 = vmul.f32 0.2, %v431_v49  ;;  %v475_v45 = vsel %vm443_vm13, %v427_v8, %v459_v24  ;;  %vm447_vm2 = vcmp.ge.f32.partialorder %v431_v49, 0.0  ;;  %490 = vst.msk [vmem:[%s1054_s5 + $0x30] sm:$0xff] %vm253_vm1, %v474_v35 }
 0x150   :  { %v464_v6 = vmul.f32 0.2, %v432_v53  ;;  %v476_v1 = vsel %vm444_vm14, %v428_v36, %v460_v55  ;;  %vm448_vm3 = vcmp.ge.f32.partialorder %v432_v53, 0.0  ;;  %v465_v52 = vmul.f32 0.2, %v433_v58  ;;  %491 = vst.msk [vmem:[%s1054_s5 + $0x38] sm:$0xff] %vm253_vm1, %v475_v45 }
 0x151   :  { %v477_v38 = vsel %vm445_vm15, %v429_v14, %v461_v40  ;;  %vm449_vm4 = vcmp.ge.f32.partialorder %v433_v58, 0.0  ;;  %v466_v41 = vmul.f32 0.2, %v434_v63  ;;  %v478_v10 = vsel %vm446_vm0, %v430_v15, %v462_v39  ;;  %492 = vst.msk [vmem:[%s1054_s5 + $0x40] sm:$0xff] %vm253_vm1, %v476_v1 }
 0x152   :  { %vm450_vm5 = vcmp.ge.f32.partialorder %v434_v63, 0.0  ;;  %v467_v12 = vmul.f32 0.2, %v435_v61  ;;  %v479_v42 = vsel %vm447_vm2, %v431_v49, %v463_v3  ;;  %vm451_vm6 = vcmp.ge.f32.partialorder %v435_v61, 0.0  ;;  %493 = vst.msk [vmem:[%s1054_s5 + $0x48] sm:$0xff] %vm253_vm1, %v477_v38 }
 0x153   :  { %v480_v43 = vsel %vm448_vm3, %v432_v53, %v464_v6  ;;  %v481_v47 = vsel %vm449_vm4, %v433_v58, %v465_v52  ;;  %494 = vst.msk [vmem:[%s1054_s5 + $0x50] sm:$0xff] %vm253_vm1, %v478_v10  ;;  %v482_v54 = vsel %vm450_vm5, %v434_v63, %v466_v41 }
 0x154   :  { %495 = vst.msk [vmem:[%s1054_s5 + $0x58] sm:$0xff] %vm253_vm1, %v479_v42  ;;  %v483_v11 = vsel %vm451_vm6, %v435_v61, %v467_v12 }
 0x155   :  { %496 = vst.msk [vmem:[%s1054_s5 + $0x60] sm:$0xff] %vm253_vm1, %v480_v43 }
 0x156   :  { %497 = vst.msk [vmem:[%s1054_s5 + $0x68] sm:$0xff] %vm253_vm1, %v481_v47 }
 0x157   :  { %498 = vst.msk [vmem:[%s1054_s5 + $0x70] sm:$0xff] %vm253_vm1, %v482_v54 }
 0x158   :  { %499 = vst.msk [vmem:[%s1054_s5 + $0x78] sm:$0xff] %vm253_vm1, %v483_v11 }

// kernel: _vae_forward.8
= control target key start
LH: loop header
LB: loop body
LE: loop exit
PB: predicated region body
PF: predicated region fallthrough
CT: control target
= control target key end

     0   :  { %vm72_vm0 = vcmask 261120   ;;  %v295_v62 = vmov 32.0   ;;  %vm172_vm1 = vcmask 523264   ;;  %s507_s1 = inlined_call_operand.vmem [shape: f32[288,64], index: 1, kind: input, shape index: {}]   ;;  %s508_s0 = inlined_call_operand.vmem [shape: f32[32,288], index: 0, kind: input, shape index: {}]   ;;  %s509_s2 = inlined_call_operand.vmem [shape: f32[1,64], index: 2, kind: input, shape index: {}]   ;;  %s510_s3 = inlined_call_operand.vmem [shape: f32[1,64], index: 3, kind: input, shape index: {}]   ;;  %s511_s4 = inlined_call_operand.vmem [shape: f32[1,64], index: 4, kind: input, shape index: {}]   ;;  %s512_s5 = inlined_call_operand.vmem [shape: f32[32,64], index: 5, kind: output, shape index: {}]  }
   0x1   :  { %v47_v0 = vld [vmem:[%s507_s1 + $0x78] sm:$0xff]  ;;  %v46_v2 = vld [vmem:[%s507_s1 + $0x70] sm:$0xff]  ;;  %v45_v4 = vld [vmem:[%s507_s1 + $0x68] sm:$0xff]  ;;  %291 = vrcp.f32 %v295_v62 }
   0x2   :  { %v63_v1 = vld [vmem:[%s507_s1 + $0xf8] sm:$0xff]  ;;  %85 = vmatpush.msra.mxu0 %v47_v0  ;;  %271 = vmatpush.msra.mxu3 %v47_v0  ;;  %v62_v3 = vld [vmem:[%s507_s1 + $0xf0] sm:$0xff]  ;;  %v61_v5 = vld [vmem:[%s507_s1 + $0xe8] sm:$0xff] }
   0x3   :  { %114 = vmatpush.msra.mxu1 %v63_v1  ;;  %v44_v6 = vld [vmem:[%s507_s1 + $0x60] sm:$0xff]  ;;  %v43_v8 = vld [vmem:[%s507_s1 + $0x58] sm:$0xff]  ;;  %v42_v11 = vld [vmem:[%s507_s1 + $0x50] sm:$0xff] }
   0x4   :  { %86 = vmatpush.msra.mxu0 %v46_v2  ;;  %272 = vmatpush.msra.mxu3 %v46_v2  ;;  %v60_v7 = vld [vmem:[%s507_s1 + $0xe0] sm:$0xff]  ;;  %v59_v9 = vld [vmem:[%s507_s1 + $0xd8] sm:$0xff]  ;;  %v66_v12 = vld [vmem:[%s507_s1 + $0x110] sm:$0xff] }
   0x5   :  { %115 = vmatpush.msra.mxu1 %v62_v3  ;;  %v67_v10 = vld [vmem:[%s507_s1 + $0x118] sm:$0xff]  ;;  %v58_v13 = vld [vmem:[%s507_s1 + $0xd0] sm:$0xff]  ;;  %v65_v14 = vld [vmem:[%s507_s1 + $0x108] sm:$0xff] }
   0x6   :  { %87 = vmatpush.msra.mxu0 %v45_v4  ;;  %273 = vmatpush.msra.mxu3 %v45_v4  ;;  %v41_v15 = vld [vmem:[%s507_s1 + $0x48] sm:$0xff]  ;;  %v64_v17 = vld [vmem:[%s507_s1 + $0x100] sm:$0xff]  ;;  %v22_v20 = vld [vmem:[%s508_s0 + $0x10] sm:$0xff] }
   0x7   :  { %116 = vmatpush.msra.mxu1 %v61_v5  ;;  %155 = vmatpush.msra.mxu2 %v67_v10  ;;  %v57_v16 = vld [vmem:[%s507_s1 + $0xc8] sm:$0xff]  ;;  %v40_v18 = vld [vmem:[%s507_s1 + $0x40] sm:$0xff]  ;;  %v39_v21 = vld [vmem:[%s507_s1 + $0x38] sm:$0xff]  ;;  %v292_v4 = vpop.eup %291 }
   0x8   :  { %88 = vmatpush.msra.mxu0 %v44_v6  ;;  %274 = vmatpush.msra.mxu3 %v44_v6  ;;  %v56_v19 = vld [vmem:[%s507_s1 + $0xc0] sm:$0xff]  ;;  %v55_v22 = vld [vmem:[%s507_s1 + $0xb8] sm:$0xff]  ;;  %v38_v23 = vld [vmem:[%s507_s1 + $0x30] sm:$0xff]  ;;  %vm191_vm2 = vweird.f32 %v292_v4 }
   0x9   :  { %117 = vmatpush.msra.mxu1 %v60_v7  ;;  %156 = vmatpush.msra.mxu2 %v66_v12  ;;  %v54_v24 = vld [vmem:[%s507_s1 + $0xb0] sm:$0xff]  ;;  %v37_v25 = vld [vmem:[%s507_s1 + $0x28] sm:$0xff]  ;;  %v36_v27 = vld [vmem:[%s507_s1 + $0x20] sm:$0xff] }
   0xa   :  { %89 = vmatpush.msra.mxu0 %v43_v8  ;;  %275 = vmatpush.msra.mxu3 %v43_v8  ;;  %v53_v26 = vld [vmem:[%s507_s1 + $0xa8] sm:$0xff]  ;;  %v52_v28 = vld [vmem:[%s507_s1 + $0xa0] sm:$0xff]  ;;  %v35_v30 = vld [vmem:[%s507_s1 + $0x18] sm:$0xff] }
   0xb   :  { %118 = vmatpush.msra.mxu1 %v59_v9  ;;  %157 = vmatpush.msra.mxu2 %v65_v14  ;;  %v25_v29 = vld [vmem:[%s508_s0 + $0x28] sm:$0xff]  ;;  %v51_v31 = vld [vmem:[%s507_s1 + $0x98] sm:$0xff]  ;;  %v34_v32 = vld [vmem:[%s507_s1 + $0x10] sm:$0xff] }
   0xc   :  { %90 = vmatpush.msra.mxu0 %v42_v11  ;;  %276 = vmatpush.msra.mxu3 %v42_v11  ;;  %v50_v33 = vld [vmem:[%s507_s1 + $0x90] sm:$0xff]  ;;  %v33_v34 = vld [vmem:[%s507_s1 + $0x8] sm:$0xff]  ;;  %v32_v36 = vld [vmem:[%s507_s1] sm:$0xff] }
   0xd   :  { %119 = vmatpush.msra.mxu1 %v58_v13  ;;  %158 = vmatpush.msra.mxu2 %v64_v17  ;;  %v49_v35 = vld [vmem:[%s507_s1 + $0x88] sm:$0xff]  ;;  %v48_v37 = vld [vmem:[%s507_s1 + $0x80] sm:$0xff]  ;;  %v23_v39 = vld [vmem:[%s508_s0 + $0x18] sm:$0xff]  ;;  %v187_v13 = vmul.f32 32.0, %v292_v4 }
   0xe   :  { %91 = vmatpush.msra.mxu0 %v41_v15  ;;  %277 = vmatpush.msra.mxu3 %v41_v15  ;;  %v20_v38 = vld [vmem:[%s508_s0] sm:$0xff]  ;;  %v21_v40 = vld [vmem:[%s508_s0 + $0x8] sm:$0xff]  ;;  %v26_v42 = vld [vmem:[%s508_s0 + $0x30] sm:$0xff] }
   0xf   :  { %120 = vmatpush.msra.mxu1 %v57_v16  ;;  %267 = vmatmul.msk.f32.vlgmr.msra.gmra.mxu2 %vm72_vm0, %v22_v20  ;;  %v28_v41 = vld [vmem:[%s508_s0 + $0x40] sm:$0xff]  ;;  %v31_v44 = vld [vmem:[%s508_s0 + $0x58] sm:$0xff]  ;;  %v29_v45 = vld [vmem:[%s508_s0 + $0x48] sm:$0xff] }
  0x10   :  { %92 = vmatpush.msra.mxu0 %v40_v18  ;;  %278 = vmatpush.msra.mxu3 %v40_v18  ;;  %v24_v43 = vld [vmem:[%s508_s0 + $0x20] sm:$0xff]  ;;  %v27_v46 = vld [vmem:[%s508_s0 + $0x38] sm:$0xff]  ;;  %v30_v47 = vld [vmem:[%s508_s0 + $0x50] sm:$0xff]  ;;  %v188_v18 = vsub.f32 1.0, %v187_v13 }
  0x11   :  { %121 = vmatpush.msra.mxu1 %v56_v19  ;;  %v288_v53 = vld [vmem:[%s509_s2] ss:$0 sm:$0xff] }
  0x12   :  { %93 = vmatpush.msra.mxu0 %v39_v21  ;;  %279 = vmatpush.msra.mxu3 %v39_v21  ;;  %v189_v21 = vmul.f32 %v292_v4, %v188_v18 }
  0x13   :  { %122 = vmatpush.msra.mxu1 %v55_v22 }
  0x14   :  { %94 = vmatpush.msra.mxu0 %v38_v23  ;;  %280 = vmatpush.msra.mxu3 %v38_v23 }
  0x15   :  { %123 = vmatpush.msra.mxu1 %v54_v24  ;;  %v190_v24 = vadd.f32 %v292_v4, %v189_v21 }
  0x16   :  { %95 = vmatpush.msra.mxu0 %v37_v25  ;;  %281 = vmatpush.msra.mxu3 %v37_v25 }
  0x17   :  { %124 = vmatpush.msra.mxu1 %v53_v26  ;;  %268 = vmatmul.msk.f32.gmra.mxu2 %vm72_vm0, %v25_v29 }
  0x18   :  { %96 = vmatpush.msra.mxu0 %v36_v27  ;;  %282 = vmatpush.msra.mxu3 %v36_v27  ;;  %v192_v27 = vsel %vm191_vm2, %v292_v4, %v190_v24 }
  0x19   :  { %125 = vmatpush.msra.mxu1 %v52_v28 }
  0x1a   :  { %97 = vmatpush.msra.mxu0 %v35_v30  ;;  %283 = vmatpush.msra.mxu3 %v35_v30 }
  0x1b   :  { %126 = vmatpush.msra.mxu1 %v51_v31 }
  0x1c   :  { %98 = vmatpush.msra.mxu0 %v34_v32  ;;  %284 = vmatpush.msra.mxu3 %v34_v32 }
  0x1d   :  { %127 = vmatpush.msra.mxu1 %v50_v33 }
  0x1e   :  { %99 = vmatpush.msra.mxu0 %v33_v34  ;;  %285 = vmatpush.msra.mxu3 %v33_v34 }
  0x1f   :  { %128 = vmatpush.msra.mxu1 %v49_v35  ;;  %269 = vmatmul.msk.f32.gmra.mxu2 %vm72_vm0, %v28_v41 }
  0x20   :  { %100 = vmatpush.msra.mxu0 %v32_v36  ;;  %286 = vmatpush.msra.mxu3 %v32_v36 }
  0x21   :  { %129 = vmatpush.msra.mxu1 %v48_v37  ;;  %101 = vmatmul.f32.vlgmr.msra.gmra.mxu0 %v20_v38 }
  0x22   :  { %104 = vmatmul.f32.vlgmr.msra.gmra.mxu3 %v23_v39  ;;  %130 = vmatmul.f32.vlgmr.msra.gmra.mxu1 %v21_v40 }
  0x27   :  { %270 = vmatmul.msk.f32.gmra.mxu2 %vm72_vm0, %v31_v44 }
  0x2a   :  { %107 = vmatmul.f32.gmra.mxu3 %v26_v42  ;;  %133 = vmatmul.f32.gmra.mxu1 %v24_v43 }
  0x32   :  { %110 = vmatmul.f32.gmra.mxu3 %v29_v45  ;;  %136 = vmatmul.f32.gmra.mxu1 %v27_v46 }
  0x3a   :  { %139 = vmatmul.f32.gmra.mxu1 %v30_v47 }
  0x92   :  { %v160_v48 = vpop.f32.mrf.mxu2 }
  0x9a   :  { %v163_v50 = vpop.f32.mrf.mxu2 }
  0x9e   :  { %v102_v54 = vpop.f32.mrf.mxu0 }
  0x9f   :  { %v131_v49 = vpop.f32.mrf.mxu1  ;;  %v103_v56 = vadd.f32 %v288_v53, %v102_v54 }
  0xa1   :  { %v132_v63 = vadd.f32 %v131_v49, %v103_v56 }
  0xa2   :  { %v166_v58 = vpop.f32.mrf.mxu2 }
  0xa3   :  { %v161_v2 = vadd.f32 %v160_v48, %v132_v63 }
  0xa5   :  { %v105_v51 = vpop.f32.mrf.mxu3  ;;  %v173_v10 = vsel %vm172_vm1, %v161_v2, 0.0 }
  0xa6   :  { %v106_v55 = vadd.f32 %v288_v53, %v105_v51 }
  0xa7   :  { %v134_v52 = vpop.f32.mrf.mxu1 }
  0xa8   :  { %v135_v59 = vadd.f32 %v134_v52, %v106_v55 }
  0xaa   :  { %v164_v1 = vadd.f32 %v163_v50, %v135_v59  ;;  %v169_v9 = vpop.f32.mrf.mxu2  ;;  %v289_v59 = vld [vmem:[%s510_s3] ss:$0 sm:$0xff] }
  0xac   :  { %v174_v6 = vsel %vm172_vm1, %v164_v1, 0.0 }
  0xad   :  { %v108_v57 = vpop.f32.mrf.mxu3  ;;  %v175_v14 = vadd.f32 %v174_v6, %v173_v10 }
  0xae   :  { %v109_v60 = vadd.f32 %v288_v53, %v108_v57 }
  0xaf   :  { %v137_v61 = vpop.f32.mrf.mxu1 }
  0xb0   :  { %v138_v0 = vadd.f32 %v137_v61, %v109_v60 }
  0xb2   :  { %v167_v3 = vadd.f32 %v166_v58, %v138_v0 }
  0xb4   :  { %v176_v11 = vsel %vm172_vm1, %v167_v3, 0.0 }
  0xb5   :  { %v111_v5 = vpop.f32.mrf.mxu3  ;;  %v177_v16 = vadd.f32 %v176_v11, %v175_v14 }
  0xb6   :  { %v112_v7 = vadd.f32 %v288_v53, %v111_v5 }
  0xb7   :  { %v140_v8 = vpop.f32.mrf.mxu1 }
  0xb8   :  { %v141_v12 = vadd.f32 %v140_v8, %v112_v7 }
  0xba   :  { %v170_v15 = vadd.f32 %v169_v9, %v141_v12 }
  0xbc   :  { %v178_v17 = vsel %vm172_vm1, %v170_v15, 0.0 }
  0xbd   :  { %v179_v19 = vadd.f32 %v178_v17, %v177_v16 }
  0xbf   :  { %v180_v20 = vrot.slane %v179_v19, 4 }
  0xc1   :  { %v181_v22 = vadd.f32 %v180_v20, %v179_v19 }
  0xc3   :  { %v182_v23 = vrot.slane %v181_v22, 2 }
  0xc5   :  { %v183_v25 = vadd.f32 %v182_v23, %v181_v22 }
  0xc7   :  { %v184_v26 = vrot.slane %v183_v25, 1 }
  0xc9   :  { %v185_v28 = vadd.f32 %v184_v26, %v183_v25 }
  0xcb   :  { %v193_v29 = vmul.f32 %v192_v27, %v185_v28 }
  0xcd   :  { %v194_v30 = vsub.f32 %v161_v2, %v193_v29  ;;  %v195_v31 = vsub.f32 %v164_v1, %v193_v29  ;;  %v196_v32 = vsub.f32 %v167_v3, %v193_v29  ;;  %v197_v33 = vsub.f32 %v170_v15, %v193_v29  ;;  %v290_v1 = vld [vmem:[%s511_s4] ss:$0 sm:$0xff] }
  0xcf   :  { %v198_v34 = vmul.f32 %v194_v30, %v194_v30  ;;  %v199_v35 = vmul.f32 %v195_v31, %v195_v31  ;;  %v200_v36 = vmul.f32 %v196_v32, %v196_v32  ;;  %v201_v37 = vmul.f32 %v197_v33, %v197_v33 }
  0xd1   :  { %v202_v38 = vsel %vm172_vm1, %v198_v34, 0.0  ;;  %v203_v39 = vsel %vm172_vm1, %v199_v35, 0.0  ;;  %v205_v41 = vsel %vm172_vm1, %v200_v36, 0.0  ;;  %v207_v43 = vsel %vm172_vm1, %v201_v37, 0.0 }
  0xd2   :  { %v204_v40 = vadd.f32 %v203_v39, %v202_v38 }
  0xd4   :  { %v206_v42 = vadd.f32 %v205_v41, %v204_v40 }
  0xd6   :  { %v208_v44 = vadd.f32 %v207_v43, %v206_v42 }
  0xd8   :  { %v209_v45 = vrot.slane %v208_v44, 4 }
  0xda   :  { %v210_v46 = vadd.f32 %v209_v45, %v208_v44 }
  0xdc   :  { %v211_v47 = vrot.slane %v210_v46, 2 }
  0xde   :  { %v212_v48 = vadd.f32 %v211_v47, %v210_v46 }
  0xe0   :  { %v213_v49 = vrot.slane %v212_v48, 1 }
  0xe2   :  { %v214_v50 = vadd.f32 %v213_v49, %v212_v48 }
  0xe4   :  { %v215_v51 = vmul.f32 %v214_v50, %v192_v27 }
  0xe6   :  { %v216_v52 = vadd.f32 1e-05, %v215_v51 }
  0xe8   :  { %293 = vrsqrt.f32 %v216_v52  ;;  %vm223_vm4 = vweird.f32 %v216_v52 }
  0xee   :  { %v294_v53 = vpop.eup %293 }
  0xef   :  { %v218_v54 = vmul.f32 %v294_v53, %v216_v52  ;;  %vm224_vm3 = vweird.f32 %v294_v53 }
  0xf0   :  { %vm225_vm5 = vmor %vm223_vm4, %vm224_vm3 }
  0xf1   :  { %v219_v55 = vmul.f32 %v294_v53, %v218_v54 }
  0xf3   :  { %v220_v56 = vmul.f32 0.5, %v219_v55 }
  0xf5   :  { %v221_v57 = vsub.f32 1.5, %v220_v56 }
  0xf7   :  { %v222_v58 = vmul.f32 %v294_v53, %v221_v57 }
  0xf9   :  { %v226_v60 = vsel %vm225_vm5, %v294_v53, %v222_v58 }
  0xfa   :  { %v227_v61 = vmul.f32 %v226_v60, %v194_v30  ;;  %v228_v62 = vmul.f32 %v226_v60, %v195_v31  ;;  %v229_v63 = vmul.f32 %v226_v60, %v196_v32  ;;  %v230_v0 = vmul.f32 %v226_v60, %v197_v33 }
  0xfc   :  { %v235_v2 = vmul.f32 %v289_v59, %v227_v61  ;;  %v236_v3 = vmul.f32 %v289_v59, %v228_v62  ;;  %v237_v4 = vmul.f32 %v289_v59, %v229_v63  ;;  %v238_v5 = vmul.f32 %v289_v59, %v230_v0 }
  0xfe   :  { %v243_v6 = vadd.f32 %v290_v1, %v235_v2  ;;  %v244_v7 = vadd.f32 %v290_v1, %v236_v3  ;;  %v245_v8 = vadd.f32 %v290_v1, %v237_v4  ;;  %v246_v9 = vadd.f32 %v290_v1, %v238_v5 }
 0x100   :  { %vm247_vm6 = vcmp.ge.f32.partialorder %v243_v6, 0.0  ;;  %vm248_vm7 = vcmp.ge.f32.partialorder %v244_v7, 0.0  ;;  %vm249_vm8 = vcmp.ge.f32.partialorder %v245_v8, 0.0  ;;  %vm250_vm9 = vcmp.ge.f32.partialorder %v246_v9, 0.0 }
 0x101   :  { %v251_v10 = vmul.f32 0.2, %v243_v6  ;;  %v252_v11 = vmul.f32 0.2, %v244_v7  ;;  %v253_v12 = vmul.f32 0.2, %v245_v8 }
 0x102   :  { %v254_v13 = vmul.f32 0.2, %v246_v9 }
 0x103   :  { %v255_v14 = vsel %vm247_vm6, %v243_v6, %v251_v10  ;;  %v256_v15 = vsel %vm248_vm7, %v244_v7, %v252_v11  ;;  %v257_v16 = vsel %vm249_vm8, %v245_v8, %v253_v12 }
 0x104   :  { %v258_v17 = vsel %vm250_vm9, %v246_v9, %v254_v13  ;;  %259 = vst.msk [vmem:[%s512_s5] sm:$0xff] %vm172_vm1, %v255_v14 }
 0x105   :  { %260 = vst.msk [vmem:[%s512_s5 + $0x8] sm:$0xff] %vm172_vm1, %v256_v15 }
 0x106   :  { %261 = vst.msk [vmem:[%s512_s5 + $0x10] sm:$0xff] %vm172_vm1, %v257_v16 }
 0x107   :  { %262 = vst.msk [vmem:[%s512_s5 + $0x18] sm:$0xff] %vm172_vm1, %v258_v17 }

// kernel: _vae_forward.9
= control target key start
LH: loop header
LB: loop body
LE: loop exit
PB: predicated region body
PF: predicated region fallthrough
CT: control target
= control target key end

     0   :  { %vm101_vm0 = vcmask 523264   ;;  %s541_s1 = inlined_call_operand.vmem [shape: f32[576,128], index: 1, kind: input, shape index: {}]   ;;  %s542_s2 = inlined_call_operand.vmem [shape: f32[1,128], index: 2, kind: input, shape index: {}]   ;;  %s543_s0 = inlined_call_operand.vmem [shape: f32[8,576], index: 0, kind: input, shape index: {}]   ;;  %s544_s3 = inlined_call_operand.vmem [shape: f32[1,128], index: 3, kind: input, shape index: {}]   ;;  %s545_s4 = inlined_call_operand.vmem [shape: f32[1,128], index: 4, kind: input, shape index: {}]   ;;  %s546_s5 = inlined_call_operand.vmem [shape: f32[8,128], index: 5, kind: output, shape index: {}]  }
   0x1   :  { %v40_v0 = vld [vmem:[%s541_s1 + $0x78] sm:$0xff]  ;;  %v39_v1 = vld [vmem:[%s541_s1 + $0x70] sm:$0xff]  ;;  %v38_v4 = vld [vmem:[%s541_s1 + $0x68] sm:$0xff] }
   0x2   :  { %105 = vmatpush.msra.mxu0 %v40_v0  ;;  %v72_v2 = vld [vmem:[%s541_s1 + $0x178] sm:$0xff]  ;;  %v71_v3 = vld [vmem:[%s541_s1 + $0x170] sm:$0xff]  ;;  %v70_v7 = vld [vmem:[%s541_s1 + $0x168] sm:$0xff] }
   0x3   :  { %145 = vmatpush.msra.mxu2 %v72_v2  ;;  %v88_v5 = vld [vmem:[%s541_s1 + $0x1f8] sm:$0xff]  ;;  %v87_v8 = vld [vmem:[%s541_s1 + $0x1f0] sm:$0xff]  ;;  %v37_v9 = vld [vmem:[%s541_s1 + $0x60] sm:$0xff] }
   0x4   :  { %v56_v6 = vld [vmem:[%s541_s1 + $0xf8] sm:$0xff]  ;;  %106 = vmatpush.msra.mxu0 %v39_v1  ;;  %165 = vmatpush.msra.mxu3 %v88_v5  ;;  %v55_v10 = vld [vmem:[%s541_s1 + $0xf0] sm:$0xff]  ;;  %v86_v11 = vld [vmem:[%s541_s1 + $0x1e8] sm:$0xff] }
   0x5   :  { %146 = vmatpush.msra.mxu2 %v71_v3  ;;  %125 = vmatpush.msra.mxu1 %v56_v6  ;;  %v69_v12 = vld [vmem:[%s541_s1 + $0x160] sm:$0xff]  ;;  %v54_v13 = vld [vmem:[%s541_s1 + $0xe8] sm:$0xff]  ;;  %v36_v14 = vld [vmem:[%s541_s1 + $0x58] sm:$0xff] }
   0x6   :  { %107 = vmatpush.msra.mxu0 %v38_v4  ;;  %166 = vmatpush.msra.mxu3 %v87_v8  ;;  %v85_v15 = vld [vmem:[%s541_s1 + $0x1e0] sm:$0xff]  ;;  %v68_v16 = vld [vmem:[%s541_s1 + $0x158] sm:$0xff]  ;;  %v35_v18 = vld [vmem:[%s541_s1 + $0x50] sm:$0xff] }
   0x7   :  { %147 = vmatpush.msra.mxu2 %v70_v7  ;;  %126 = vmatpush.msra.mxu1 %v55_v10  ;;  %v53_v17 = vld [vmem:[%s541_s1 + $0xe0] sm:$0xff]  ;;  %v84_v19 = vld [vmem:[%s541_s1 + $0x1d8] sm:$0xff]  ;;  %v67_v20 = vld [vmem:[%s541_s1 + $0x150] sm:$0xff] }
   0x8   :  { %108 = vmatpush.msra.mxu0 %v37_v9  ;;  %167 = vmatpush.msra.mxu3 %v86_v11  ;;  %v52_v21 = vld [vmem:[%s541_s1 + $0xd8] sm:$0xff]  ;;  %v34_v22 = vld [vmem:[%s541_s1 + $0x48] sm:$0xff]  ;;  %v83_v23 = vld [vmem:[%s541_s1 + $0x1d0] sm:$0xff] }
   0x9   :  { %148 = vmatpush.msra.mxu2 %v69_v12  ;;  %127 = vmatpush.msra.mxu1 %v54_v13  ;;  %v66_v24 = vld [vmem:[%s541_s1 + $0x148] sm:$0xff]  ;;  %v51_v25 = vld [vmem:[%s541_s1 + $0xd0] sm:$0xff]  ;;  %v33_v26 = vld [vmem:[%s541_s1 + $0x40] sm:$0xff] }
   0xa   :  { %109 = vmatpush.msra.mxu0 %v36_v14  ;;  %168 = vmatpush.msra.mxu3 %v85_v15  ;;  %v82_v27 = vld [vmem:[%s541_s1 + $0x1c8] sm:$0xff]  ;;  %v65_v28 = vld [vmem:[%s541_s1 + $0x140] sm:$0xff]  ;;  %v32_v30 = vld [vmem:[%s541_s1 + $0x38] sm:$0xff]  ;;  %v267_v14 = vmov 8.0  }
   0xb   :  { %149 = vmatpush.msra.mxu2 %v68_v16  ;;  %128 = vmatpush.msra.mxu1 %v53_v17  ;;  %v50_v29 = vld [vmem:[%s541_s1 + $0xc8] sm:$0xff]  ;;  %v81_v31 = vld [vmem:[%s541_s1 + $0x1c0] sm:$0xff]  ;;  %v64_v32 = vld [vmem:[%s541_s1 + $0x138] sm:$0xff]  ;;  %263 = vrcp.f32 %v267_v14 }
   0xc   :  { %110 = vmatpush.msra.mxu0 %v35_v18  ;;  %169 = vmatpush.msra.mxu3 %v84_v19  ;;  %v49_v33 = vld [vmem:[%s541_s1 + $0xc0] sm:$0xff]  ;;  %v31_v34 = vld [vmem:[%s541_s1 + $0x30] sm:$0xff]  ;;  %v80_v35 = vld [vmem:[%s541_s1 + $0x1b8] sm:$0xff] }
   0xd   :  { %150 = vmatpush.msra.mxu2 %v67_v20  ;;  %129 = vmatpush.msra.mxu1 %v52_v21  ;;  %v63_v36 = vld [vmem:[%s541_s1 + $0x130] sm:$0xff]  ;;  %v48_v37 = vld [vmem:[%s541_s1 + $0xb8] sm:$0xff]  ;;  %v30_v38 = vld [vmem:[%s541_s1 + $0x28] sm:$0xff] }
   0xe   :  { %111 = vmatpush.msra.mxu0 %v34_v22  ;;  %170 = vmatpush.msra.mxu3 %v83_v23  ;;  %v79_v39 = vld [vmem:[%s541_s1 + $0x1b0] sm:$0xff]  ;;  %v62_v40 = vld [vmem:[%s541_s1 + $0x128] sm:$0xff]  ;;  %v29_v42 = vld [vmem:[%s541_s1 + $0x20] sm:$0xff] }
   0xf   :  { %151 = vmatpush.msra.mxu2 %v66_v24  ;;  %130 = vmatpush.msra.mxu1 %v51_v25  ;;  %v47_v41 = vld [vmem:[%s541_s1 + $0xb0] sm:$0xff]  ;;  %v78_v43 = vld [vmem:[%s541_s1 + $0x1a8] sm:$0xff]  ;;  %v61_v44 = vld [vmem:[%s541_s1 + $0x120] sm:$0xff] }
  0x10   :  { %112 = vmatpush.msra.mxu0 %v33_v26  ;;  %171 = vmatpush.msra.mxu3 %v82_v27  ;;  %v46_v45 = vld [vmem:[%s541_s1 + $0xa8] sm:$0xff]  ;;  %v28_v46 = vld [vmem:[%s541_s1 + $0x18] sm:$0xff]  ;;  %v77_v47 = vld [vmem:[%s541_s1 + $0x1a0] sm:$0xff] }
  0x11   :  { %152 = vmatpush.msra.mxu2 %v65_v28  ;;  %131 = vmatpush.msra.mxu1 %v50_v29  ;;  %v60_v48 = vld [vmem:[%s541_s1 + $0x118] sm:$0xff]  ;;  %v45_v49 = vld [vmem:[%s541_s1 + $0xa0] sm:$0xff]  ;;  %v27_v50 = vld [vmem:[%s541_s1 + $0x10] sm:$0xff]  ;;  %v264_v20 = vpop.eup %263 }
  0x12   :  { %113 = vmatpush.msra.mxu0 %v32_v30  ;;  %172 = vmatpush.msra.mxu3 %v81_v31  ;;  %v76_v51 = vld [vmem:[%s541_s1 + $0x198] sm:$0xff]  ;;  %v59_v52 = vld [vmem:[%s541_s1 + $0x110] sm:$0xff]  ;;  %v26_v54 = vld [vmem:[%s541_s1 + $0x8] sm:$0xff]  ;;  %v212_v23 = vmul.f32 8.0, %v264_v20  ;;  %vm216_vm1 = vweird.f32 %v264_v20 }
  0x13   :  { %153 = vmatpush.msra.mxu2 %v64_v32  ;;  %132 = vmatpush.msra.mxu1 %v49_v33  ;;  %v44_v53 = vld [vmem:[%s541_s1 + $0x98] sm:$0xff]  ;;  %v75_v55 = vld [vmem:[%s541_s1 + $0x190] sm:$0xff]  ;;  %v58_v56 = vld [vmem:[%s541_s1 + $0x108] sm:$0xff] }
  0x14   :  { %114 = vmatpush.msra.mxu0 %v31_v34  ;;  %173 = vmatpush.msra.mxu3 %v80_v35  ;;  %v43_v57 = vld [vmem:[%s541_s1 + $0x90] sm:$0xff]  ;;  %v25_v58 = vld [vmem:[%s541_s1] sm:$0xff]  ;;  %v74_v59 = vld [vmem:[%s541_s1 + $0x188] sm:$0xff]  ;;  %v213_v26 = vsub.f32 1.0, %v212_v23 }
  0x15   :  { %154 = vmatpush.msra.mxu2 %v63_v36  ;;  %133 = vmatpush.msra.mxu1 %v48_v37  ;;  %v96_v60 = vld [vmem:[%s541_s1 + $0x238] sm:$0xff]  ;;  %v57_v61 = vld [vmem:[%s541_s1 + $0x100] sm:$0xff]  ;;  %v22_v62 = vld [vmem:[%s543_s0 + $0x10] sm:$0xff] }
  0x16   :  { %115 = vmatpush.msra.mxu0 %v30_v38  ;;  %174 = vmatpush.msra.mxu3 %v79_v39  ;;  %v42_v63 = vld [vmem:[%s541_s1 + $0x88] sm:$0xff]  ;;  %v95_v0 = vld [vmem:[%s541_s1 + $0x230] sm:$0xff]  ;;  %v73_v1 = vld [vmem:[%s541_s1 + $0x180] sm:$0xff]  ;;  %v214_v29 = vmul.f32 %v264_v20, %v213_v26 }
  0x17   :  { %155 = vmatpush.msra.mxu2 %v62_v40  ;;  %134 = vmatpush.msra.mxu1 %v47_v41  ;;  %v20_v2 = vld [vmem:[%s543_s0] sm:$0xff]  ;;  %v23_v3 = vld [vmem:[%s543_s0 + $0x18] sm:$0xff]  ;;  %v94_v4 = vld [vmem:[%s541_s1 + $0x228] sm:$0xff] }
  0x18   :  { %116 = vmatpush.msra.mxu0 %v29_v42  ;;  %175 = vmatpush.msra.mxu3 %v78_v43  ;;  %v41_v5 = vld [vmem:[%s541_s1 + $0x80] sm:$0xff]  ;;  %v21_v6 = vld [vmem:[%s543_s0 + $0x8] sm:$0xff]  ;;  %v92_v8 = vld [vmem:[%s541_s1 + $0x218] sm:$0xff]  ;;  %v215_v32 = vadd.f32 %v264_v20, %v214_v29 }
  0x19   :  { %156 = vmatpush.msra.mxu2 %v61_v44  ;;  %135 = vmatpush.msra.mxu1 %v46_v45  ;;  %v93_v7 = vld [vmem:[%s541_s1 + $0x220] sm:$0xff]  ;;  %v91_v9 = vld [vmem:[%s541_s1 + $0x210] sm:$0xff]  ;;  %v90_v10 = vld [vmem:[%s541_s1 + $0x208] sm:$0xff] }
  0x1a   :  { %117 = vmatpush.msra.mxu0 %v28_v46  ;;  %176 = vmatpush.msra.mxu3 %v77_v47  ;;  %v89_v11 = vld [vmem:[%s541_s1 + $0x200] sm:$0xff]  ;;  %v217_v35 = vsel %vm216_vm1, %v264_v20, %v215_v32 }
  0x1b   :  { %157 = vmatpush.msra.mxu2 %v60_v48  ;;  %136 = vmatpush.msra.mxu1 %v45_v49  ;;  %v24_v12 = vld [vmem:[%s543_s0 + $0x20] sm:$0xff] }
  0x1c   :  { %118 = vmatpush.msra.mxu0 %v27_v50  ;;  %177 = vmatpush.msra.mxu3 %v76_v51  ;;  %v260_v13 = vld [vmem:[%s542_s2] ss:$0 sm:$0xff] }
  0x1d   :  { %158 = vmatpush.msra.mxu2 %v59_v52  ;;  %137 = vmatpush.msra.mxu1 %v44_v53 }
  0x1e   :  { %119 = vmatpush.msra.mxu0 %v26_v54  ;;  %178 = vmatpush.msra.mxu3 %v75_v55  ;;  %v261_v54 = vld [vmem:[%s544_s3] ss:$0 sm:$0xff] }
  0x1f   :  { %159 = vmatpush.msra.mxu2 %v58_v56  ;;  %138 = vmatpush.msra.mxu1 %v43_v57  ;;  %v262_v57 = vld [vmem:[%s545_s4] ss:$0 sm:$0xff] }
  0x20   :  { %120 = vmatpush.msra.mxu0 %v25_v58  ;;  %179 = vmatpush.msra.mxu3 %v74_v59 }
  0x21   :  { %160 = vmatpush.msra.mxu2 %v57_v61  ;;  %139 = vmatpush.msra.mxu1 %v42_v63 }
  0x22   :  { %193 = vmatpush.msrb.mxu0 %v96_v60  ;;  %161 = vmatmul.f32.vlgmr.msra.gmra.mxu2 %v22_v62 }
  0x23   :  { %180 = vmatpush.msra.mxu3 %v73_v1  ;;  %121 = vmatmul.f32.vlgmr.msra.gmra.mxu0 %v20_v2 }
  0x24   :  { %194 = vmatpush.msrb.mxu0 %v95_v0  ;;  %181 = vmatmul.f32.vlgmr.msra.gmra.mxu3 %v23_v3 }
  0x25   :  { %140 = vmatpush.msra.mxu1 %v41_v5 }
  0x26   :  { %195 = vmatpush.msrb.mxu0 %v94_v4  ;;  %141 = vmatmul.f32.vlgmr.msra.gmra.mxu1 %v21_v6 }
  0x28   :  { %196 = vmatpush.msrb.mxu0 %v93_v7 }
  0x2a   :  { %197 = vmatpush.msrb.mxu0 %v92_v8 }
  0x2c   :  { %198 = vmatpush.msrb.mxu0 %v91_v9 }
  0x2e   :  { %199 = vmatpush.msrb.mxu0 %v90_v10 }
  0x30   :  { %200 = vmatpush.msrb.mxu0 %v89_v11 }
  0x31   :  { %258 = vmatmul.msk.f32.vlgmr.msrb.gmra.mxu0 %vm101_vm0, %v24_v12 }
  0xa0   :  { %v122_v15 = vpop.f32.mrf.mxu0 }
  0xa1   :  { %v123_v16 = vadd.f32 %v260_v13, %v122_v15 }
  0xa3   :  { %v142_v17 = vpop.f32.mrf.mxu1 }
  0xa4   :  { %v143_v18 = vadd.f32 %v142_v17, %v123_v16 }
  0xa5   :  { %v162_v19 = vpop.f32.mrf.mxu2 }
  0xa6   :  { %v163_v21 = vadd.f32 %v162_v19, %v143_v18 }
  0xa7   :  { %v182_v22 = vpop.f32.mrf.mxu3 }
  0xa8   :  { %v183_v24 = vadd.f32 %v182_v22, %v163_v21 }
  0xae   :  { %v202_v25 = vpop.f32.mrf.mxu0 }
  0xaf   :  { %v203_v27 = vadd.f32 %v202_v25, %v183_v24 }
  0xb1   :  { %v205_v28 = vrot.slane %v203_v27, 4 }
  0xb3   :  { %v206_v30 = vadd.f32 %v205_v28, %v203_v27 }
  0xb5   :  { %v207_v31 = vrot.slane %v206_v30, 2 }
  0xb7   :  { %v208_v33 = vadd.f32 %v207_v31, %v206_v30 }
  0xb9   :  { %v209_v34 = vrot.slane %v208_v33, 1 }
  0xbb   :  { %v210_v36 = vadd.f32 %v209_v34, %v208_v33 }
  0xbd   :  { %v218_v37 = vmul.f32 %v217_v35, %v210_v36 }
  0xbf   :  { %v219_v38 = vsub.f32 %v203_v27, %v218_v37 }
  0xc1   :  { %v220_v39 = vmul.f32 %v219_v38, %v219_v38 }
  0xc3   :  { %v221_v40 = vrot.slane %v220_v39, 4 }
  0xc5   :  { %v222_v41 = vadd.f32 %v221_v40, %v220_v39 }
  0xc7   :  { %v223_v42 = vrot.slane %v222_v41, 2 }
  0xc9   :  { %v224_v43 = vadd.f32 %v223_v42, %v222_v41 }
  0xcb   :  { %v225_v44 = vrot.slane %v224_v43, 1 }
  0xcd   :  { %v226_v45 = vadd.f32 %v225_v44, %v224_v43 }
  0xcf   :  { %v227_v46 = vmul.f32 %v226_v45, %v217_v35 }
  0xd1   :  { %v228_v47 = vadd.f32 1e-05, %v227_v46 }
  0xd3   :  { %265 = vrsqrt.f32 %v228_v47  ;;  %vm235_vm3 = vweird.f32 %v228_v47 }
  0xd9   :  { %v266_v48 = vpop.eup %265 }
  0xda   :  { %v230_v49 = vmul.f32 %v266_v48, %v228_v47  ;;  %vm236_vm2 = vweird.f32 %v266_v48 }
  0xdb   :  { %vm237_vm4 = vmor %vm235_vm3, %vm236_vm2 }
  0xdc   :  { %v231_v50 = vmul.f32 %v266_v48, %v230_v49 }
  0xde   :  { %v232_v51 = vmul.f32 0.5, %v231_v50 }
  0xe0   :  { %v233_v52 = vsub.f32 1.5, %v232_v51 }
  0xe2   :  { %v234_v53 = vmul.f32 %v266_v48, %v233_v52 }
  0xe4   :  { %v238_v55 = vsel %vm237_vm4, %v266_v48, %v234_v53 }
  0xe5   :  { %v239_v56 = vmul.f32 %v238_v55, %v219_v38 }
  0xe7   :  { %v244_v58 = vmul.f32 %v261_v54, %v239_v56 }
  0xe9   :  { %v249_v59 = vadd.f32 %v262_v57, %v244_v58 }
  0xeb   :  { %vm250_vm5 = vcmp.ge.f32.partialorder %v249_v59, 0.0  ;;  %v251_v60 = vmul.f32 0.2, %v249_v59 }
  0xed   :  { %v252_v61 = vsel %vm250_vm5, %v249_v59, %v251_v60 }
  0xee   :  { %253 = vst [vmem:[%s546_s5] sm:$0xff] %v252_v61 }

// kernel: _vae_forward.10
= control target key start
LH: loop header
LB: loop body
LE: loop exit
PB: predicated region body
PF: predicated region fallthrough
CT: control target
= control target key end

     0   :  { %16 = vsyncpa [#allocation3], 0  ;;  %s432_s0 = inlined_call_operand.vmem [shape: f32[8,128], index: 0, kind: input, shape index: {}]   ;;  %s433_s1 = inlined_call_operand.vmem [shape: f32[128,16], index: 1, kind: input, shape index: {}]   ;;  %s434_s2 = inlined_call_operand.vmem [shape: f32[1,16], index: 2, kind: input, shape index: {}]   ;;  %s435_s3 = inlined_call_operand.vmem [shape: f32[128,16], index: 3, kind: input, shape index: {}]   ;;  %s436_s4 = inlined_call_operand.vmem [shape: f32[1,16], index: 4, kind: input, shape index: {}]   ;;  %s437_s5 = inlined_call_operand.vmem [shape: f32[8,16], index: 5, kind: input, shape index: {}]   ;;  %s438_s6 = inlined_call_operand.vmem [shape: f32[16,128], index: 6, kind: input, shape index: {}]   ;;  %s439_s7 = inlined_call_operand.vmem [shape: f32[1,128], index: 7, kind: input, shape index: {}]   ;;  %s440_s8 = inlined_call_operand.hbm [shape: f32[8,16], index: 8, kind: output, shape index: {0}]   ;;  %s441_s9 = inlined_call_operand.hbm [shape: f32[8,16], index: 9, kind: output, shape index: {1}]   ;;  %s442_s10 = inlined_call_operand.vmem [shape: f32[8,128], index: 10, kind: output, shape index: {2}]  }
   0x1   :  { %v90_v0 = vld [vmem:[%s435_s3 + $0x78] sm:$0xff]  ;;  %v89_v1 = vld [vmem:[%s435_s3 + $0x70] sm:$0xff]  ;;  %v88_v2 = vld [vmem:[%s435_s3 + $0x68] sm:$0xff] }
   0x2   :  { %95 = vmatpush.msra.mxu1 %v90_v0  ;;  %v50_v3 = vld [vmem:[%s433_s1 + $0x78] sm:$0xff]  ;;  %v49_v4 = vld [vmem:[%s433_s1 + $0x70] sm:$0xff]  ;;  %v87_v5 = vld [vmem:[%s435_s3 + $0x60] sm:$0xff] }
   0x3   :  { %55 = vmatpush.msra.mxu0 %v50_v3  ;;  %v48_v6 = vld [vmem:[%s433_s1 + $0x68] sm:$0xff]  ;;  %v86_v7 = vld [vmem:[%s435_s3 + $0x58] sm:$0xff]  ;;  %v47_v8 = vld [vmem:[%s433_s1 + $0x60] sm:$0xff] }
   0x4   :  { %96 = vmatpush.msra.mxu1 %v89_v1  ;;  %v85_v9 = vld [vmem:[%s435_s3 + $0x50] sm:$0xff]  ;;  %v46_v10 = vld [vmem:[%s433_s1 + $0x58] sm:$0xff]  ;;  %v84_v11 = vld [vmem:[%s435_s3 + $0x48] sm:$0xff] }
   0x5   :  { %56 = vmatpush.msra.mxu0 %v49_v4  ;;  %v45_v12 = vld [vmem:[%s433_s1 + $0x50] sm:$0xff]  ;;  %v83_v13 = vld [vmem:[%s435_s3 + $0x40] sm:$0xff]  ;;  %v44_v14 = vld [vmem:[%s433_s1 + $0x48] sm:$0xff] }
   0x6   :  { %97 = vmatpush.msra.mxu1 %v88_v2 }
   0x7   :  { %57 = vmatpush.msra.mxu0 %v48_v6 }
   0x8   :  { %98 = vmatpush.msra.mxu1 %v87_v5 }
   0x9   :  { %58 = vmatpush.msra.mxu0 %v47_v8 }
   0xa   :  { %99 = vmatpush.msra.mxu1 %v86_v7 }
   0xb   :  { %59 = vmatpush.msra.mxu0 %v46_v10 }
   0xc   :  { %100 = vmatpush.msra.mxu1 %v85_v9 }
   0xd   :  { %17 = vsyncpa [#allocation5], 0  ;;  %60 = vmatpush.msra.mxu0 %v45_v12  ;;  %v82_v15 = vld [vmem:[%s435_s3 + $0x38] sm:$0xff]  ;;  %v43_v16 = vld [vmem:[%s433_s1 + $0x40] sm:$0xff]  ;;  %vm126_vm0 = vcmask 130048   ;;  %s160_s27 = sshll.u32 %s440_s8, 4  ;;  %s161_s27 = int_to_ptr.hbm [resolvable:$true] %s160_s27 }
   0xe   :  { %101 = vmatpush.msra.mxu1 %v84_v11  ;;  %v81_v17 = vld [vmem:[%s435_s3 + $0x30] sm:$0xff]  ;;  %v42_v18 = vld [vmem:[%s433_s1 + $0x38] sm:$0xff]  ;;  %v80_v19 = vld [vmem:[%s435_s3 + $0x28] sm:$0xff]  ;;  %s250_s28 = smov [#allocation4]   ;;  %s171_s12 = sshll.u32 %s441_s9, 4  ;;  %s172_s12 = int_to_ptr.hbm [resolvable:$true] %s171_s12 }
   0xf   :  { %61 = vmatpush.msra.mxu0 %v44_v14  ;;  %v41_v20 = vld [vmem:[%s433_s1 + $0x30] sm:$0xff]  ;;  %v79_v21 = vld [vmem:[%s435_s3 + $0x20] sm:$0xff]  ;;  %v40_v22 = vld [vmem:[%s433_s1 + $0x28] sm:$0xff]  ;;  %s169_s29 = sshll.u32 %s250_s28, 4  ;;  %s170_s29 = int_to_ptr.vmem [resolvable:$true] %s169_s29 }
  0x10   :  { %102 = vmatpush.msra.mxu1 %v83_v13  ;;  %v78_v23 = vld [vmem:[%s435_s3 + $0x18] sm:$0xff]  ;;  %v39_v24 = vld [vmem:[%s433_s1 + $0x20] sm:$0xff]  ;;  %v77_v25 = vld [vmem:[%s435_s3 + $0x10] sm:$0xff] }
  0x11   :  { %62 = vmatpush.msra.mxu0 %v43_v16  ;;  %v38_v26 = vld [vmem:[%s433_s1 + $0x18] sm:$0xff]  ;;  %v76_v27 = vld [vmem:[%s435_s3 + $0x8] sm:$0xff]  ;;  %v37_v28 = vld [vmem:[%s433_s1 + $0x10] sm:$0xff] }
  0x12   :  { %103 = vmatpush.msra.mxu1 %v82_v15  ;;  %v75_v29 = vld [vmem:[%s435_s3] sm:$0xff]  ;;  %v36_v30 = vld [vmem:[%s433_s1 + $0x8] sm:$0xff] }
  0x13   :  { %63 = vmatpush.msra.mxu0 %v42_v18  ;;  %v34_v31 = vld [vmem:[%s432_s0] sm:$0xff]  ;;  %v121_v33 = vld [vmem:[%s438_s6 + $0x8] sm:$0xff] }
  0x14   :  { %104 = vmatpush.msra.mxu1 %v81_v17  ;;  %v35_v32 = vld [vmem:[%s433_s1] sm:$0xff]  ;;  %144 = vmatpush.msra.mxu2 %v121_v33 }
  0x15   :  { %64 = vmatpush.msra.mxu0 %v41_v20  ;;  %v120_v34 = vld [vmem:[%s438_s6] sm:$0xff] }
  0x16   :  { %105 = vmatpush.msra.mxu1 %v80_v19  ;;  %145 = vmatpush.msra.mxu2 %v120_v34  ;;  %v192_v35 = vld [vmem:[%s436_s4] ss:$0 sm:$0xff]  ;;  %s249_s4 = smov [#allocation2]  }
  0x17   :  { %65 = vmatpush.msra.mxu0 %v40_v22  ;;  %v193_v36 = vld [vmem:[%s434_s2] ss:$0 sm:$0xff]  ;;  %s158_s25 = sshll.u32 %s249_s4, 4  ;;  %s159_s25 = int_to_ptr.vmem [resolvable:$true] %s158_s25 }
  0x18   :  { %106 = vmatpush.msra.mxu1 %v79_v21  ;;  %v115_v42 = vld [vmem:[%s437_s5] sm:$0xff] }
  0x19   :  { %66 = vmatpush.msra.mxu0 %v39_v24  ;;  %v194_v46 = vld [vmem:[%s439_s7] ss:$0 sm:$0xff] }
  0x1a   :  { %107 = vmatpush.msra.mxu1 %v78_v23 }
  0x1b   :  { %67 = vmatpush.msra.mxu0 %v38_v26 }
  0x1c   :  { %108 = vmatpush.msra.mxu1 %v77_v25 }
  0x1d   :  { %68 = vmatpush.msra.mxu0 %v37_v28 }
  0x1e   :  { %109 = vmatpush.msra.mxu1 %v76_v27 }
  0x1f   :  { %69 = vmatpush.msra.mxu0 %v36_v30 }
  0x20   :  { %110 = vmatpush.msra.mxu1 %v75_v29 }
  0x21   :  { %111 = vmatmul.f32.vlgmr.msra.gmra.mxu1 %v34_v31  ;;  %70 = vmatpush.msra.mxu0 %v35_v32 }
  0x22   :  { %71 = vmatmul.f32.vlgmr.msra.gmra.mxu0 %v34_v31 }
  0x9e   :  { %v112_v37 = vpop.f32.mrf.mxu1 }
  0x9f   :  { %v113_v38 = vadd.f32 %v192_v35, %v112_v37  ;;  %v72_v39 = vpop.f32.mrf.mxu0 }
  0xa0   :  { %v73_v41 = vadd.f32 %v193_v36, %v72_v39 }
  0xa1   :  { %v116_v40 = vmul.f32 1.442695, %v113_v38  ;;  %151 = vst.msk [vmem:[#allocation4] sm:$0xff] %vm126_vm0, %v113_v38 }
  0xa2   :  { %150 = vst.msk [vmem:[#allocation2] sm:$0xff] %vm126_vm0, %v73_v41  ;;  %174 = dma.vmem_to_hbm [thread:$0]  %s170_s29, 128, %s172_s12, [#allocation5]  }
  0xa3   :  { %195 = vpow2.f32 %v116_v40  ;;  %163 = dma.vmem_to_hbm [thread:$0]  %s159_s25, 128, %s161_s27, [#allocation3]  }
  0xa9   :  { %v196_v43 = vpop.eup %195 }
  0xaa   :  { %v118_v44 = vmul.f32 %v196_v43, %v115_v42 }
  0xac   :  { %v119_v45 = vadd.f32 %v118_v44, %v73_v41 }
  0xae   :  { %189 = vmatmul.msk.f32.vlgmr.msra.gmra.mxu2 %vm126_vm0, %v119_v45 }
 0x131   :  { %v147_v47 = vpop.f32.mrf.mxu2 }
 0x132   :  { %v148_v48 = vadd.f32 %v194_v46, %v147_v47 }
 0x134   :  { %152 = vst [vmem:[%s442_s10] sm:$0xff] %v148_v48 }
 0x135   :  { %245 = dma.done.wait [#allocation3], 128  }
 0x136   :  { %246 = vsyncadd [#allocation3], 4294967168 }
 0x137   :  { %247 = dma.done.wait [#allocation5], 128  }
 0x138   :  { %248 = vsyncadd [#allocation5], 4294967168 }
 0x139   :  { %187 = vsyncpa [#allocation3], 1 }
 0x13a   :  { %188 = vsyncpa [#allocation5], 1 }

// kernel: _vae_forward.11
= control target key start
LH: loop header
LB: loop body
LE: loop exit
PB: predicated region body
PF: predicated region fallthrough
CT: control target
= control target key end

     0   :  { %s460_s12 = smov 0   ;;  %s554_s0 = inlined_call_operand.vmem [shape: f32[4,8,512], index: 0, kind: input, shape index: {}]   ;;  %s555_s1 = inlined_call_operand.vmem [shape: f32[4,512,64], index: 1, kind: input, shape index: {}]   ;;  %s556_s2 = inlined_call_operand.vmem [shape: f32[1,64], index: 2, kind: input, shape index: {}]   ;;  %s557_s3 = inlined_call_operand.vmem [shape: f32[4,8,64], index: 3, kind: output, shape index: {}]  }
   0x1 LB: > { %s409_s13 = sadd.s32 4294967295, %s438_s12   ;;  %p413_p0 = scmp.ge.s32.totalorder %s438_s12, 1  ;;  %s438_s12 = sphi %s460_s12, %s13_s12  }
   0x2   : > { %p147_p1 = scmp.lt.s32.totalorder %s438_s12, 5 }
   0x4   : > { %p148_p2 = pnand %p413_p0, %p147_p1 }
   0x5   : > { %p175_p3 = scmp.lt.s32.totalorder (!%p148_p2), %s409_s13, 3 }
   0x6   : > { %151 = sbr.rel (%p148_p2) target bundleno = 186 (0xba), region = 32 }
   0xb   : > { %s559_s13 = smov (!%p175_p3, %s409_s13), 3  ;;  %vm342_vm0 = vcmask 523264  }
   0xc   : > { %s422_s14 = sshll.u32 %s559_s13, 9  ;;  %s421_s18 = sshll.u32 %s559_s13, 5 }
   0xd   : > { %s474_s17 = scalar_lea.vmem %s555_s1, %s422_s14  ;;  %s179_s21 = scalar_lea.vmem %s554_s0, %s421_s18 }
   0xe   : > { %v240_v0 = vld [vmem:[%s474_s17 + $0x178] sm:$0xff]  ;;  %v239_v2 = vld [vmem:[%s474_s17 + $0x170] sm:$0xff]  ;;  %v238_v6 = vld [vmem:[%s474_s17 + $0x168] sm:$0xff]  ;;  %s418_s24 = sshll.u32 %s559_s13, 3 }
   0xf   : > { %v208_v1 = vld [vmem:[%s474_s17 + $0x78] sm:$0xff]  ;;  %301 = vmatpush.msra.mxu2 %v240_v0  ;;  %v207_v4 = vld [vmem:[%s474_s17 + $0x70] sm:$0xff]  ;;  %v206_v8 = vld [vmem:[%s474_s17 + $0x68] sm:$0xff]  ;;  %s188_s27 = scalar_lea.vmem %s557_s3, %s418_s24 }
  0x10   : > { %261 = vmatpush.msra.mxu0 %v208_v1  ;;  %v256_v3 = vld [vmem:[%s474_s17 + $0x1f8] sm:$0xff]  ;;  %v255_v7 = vld [vmem:[%s474_s17 + $0x1f0] sm:$0xff]  ;;  %v254_v10 = vld [vmem:[%s474_s17 + $0x1e8] sm:$0xff] }
  0x11   : > { %v224_v5 = vld [vmem:[%s474_s17 + $0xf8] sm:$0xff]  ;;  %321 = vmatpush.msra.mxu3 %v256_v3  ;;  %302 = vmatpush.msra.mxu2 %v239_v2  ;;  %v223_v9 = vld [vmem:[%s474_s17 + $0xf0] sm:$0xff]  ;;  %v237_v11 = vld [vmem:[%s474_s17 + $0x160] sm:$0xff] }
  0x12   : > { %281 = vmatpush.msra.mxu1 %v224_v5  ;;  %262 = vmatpush.msra.mxu0 %v207_v4  ;;  %v205_v12 = vld [vmem:[%s474_s17 + $0x60] sm:$0xff]  ;;  %v222_v13 = vld [vmem:[%s474_s17 + $0xe8] sm:$0xff]  ;;  %v236_v16 = vld [vmem:[%s474_s17 + $0x158] sm:$0xff] }
  0x13   : > { %322 = vmatpush.msra.mxu3 %v255_v7  ;;  %303 = vmatpush.msra.mxu2 %v238_v6  ;;  %v253_v14 = vld [vmem:[%s474_s17 + $0x1e0] sm:$0xff]  ;;  %v204_v17 = vld [vmem:[%s474_s17 + $0x58] sm:$0xff]  ;;  %v235_v20 = vld [vmem:[%s474_s17 + $0x150] sm:$0xff] }
  0x14   : > { %282 = vmatpush.msra.mxu1 %v223_v9  ;;  %263 = vmatpush.msra.mxu0 %v206_v8  ;;  %v221_v15 = vld [vmem:[%s474_s17 + $0xe0] sm:$0xff]  ;;  %v252_v18 = vld [vmem:[%s474_s17 + $0x1d8] sm:$0xff]  ;;  %v203_v21 = vld [vmem:[%s474_s17 + $0x50] sm:$0xff] }
  0x15   : > { %323 = vmatpush.msra.mxu3 %v254_v10  ;;  %304 = vmatpush.msra.mxu2 %v237_v11  ;;  %v220_v19 = vld [vmem:[%s474_s17 + $0xd8] sm:$0xff]  ;;  %v251_v22 = vld [vmem:[%s474_s17 + $0x1d0] sm:$0xff]  ;;  %v234_v24 = vld [vmem:[%s474_s17 + $0x148] sm:$0xff] }
  0x16   : > { %283 = vmatpush.msra.mxu1 %v222_v13  ;;  %264 = vmatpush.msra.mxu0 %v205_v12  ;;  %v219_v23 = vld [vmem:[%s474_s17 + $0xd0] sm:$0xff]  ;;  %v202_v25 = vld [vmem:[%s474_s17 + $0x48] sm:$0xff]  ;;  %v233_v28 = vld [vmem:[%s474_s17 + $0x140] sm:$0xff] }
  0x17   : > { %324 = vmatpush.msra.mxu3 %v253_v14  ;;  %305 = vmatpush.msra.mxu2 %v236_v16  ;;  %v250_v26 = vld [vmem:[%s474_s17 + $0x1c8] sm:$0xff]  ;;  %v201_v29 = vld [vmem:[%s474_s17 + $0x40] sm:$0xff]  ;;  %v232_v32 = vld [vmem:[%s474_s17 + $0x138] sm:$0xff] }
  0x18   : > { %284 = vmatpush.msra.mxu1 %v221_v15  ;;  %265 = vmatpush.msra.mxu0 %v204_v17  ;;  %v218_v27 = vld [vmem:[%s474_s17 + $0xc8] sm:$0xff]  ;;  %v249_v30 = vld [vmem:[%s474_s17 + $0x1c0] sm:$0xff]  ;;  %v200_v33 = vld [vmem:[%s474_s17 + $0x38] sm:$0xff] }
  0x19   : > { %325 = vmatpush.msra.mxu3 %v252_v18  ;;  %306 = vmatpush.msra.mxu2 %v235_v20  ;;  %v217_v31 = vld [vmem:[%s474_s17 + $0xc0] sm:$0xff]  ;;  %v248_v34 = vld [vmem:[%s474_s17 + $0x1b8] sm:$0xff]  ;;  %v231_v36 = vld [vmem:[%s474_s17 + $0x130] sm:$0xff] }
  0x1a   : > { %285 = vmatpush.msra.mxu1 %v220_v19  ;;  %266 = vmatpush.msra.mxu0 %v203_v21  ;;  %v216_v35 = vld [vmem:[%s474_s17 + $0xb8] sm:$0xff]  ;;  %v199_v37 = vld [vmem:[%s474_s17 + $0x30] sm:$0xff]  ;;  %v230_v40 = vld [vmem:[%s474_s17 + $0x128] sm:$0xff] }
  0x1b   : > { %326 = vmatpush.msra.mxu3 %v251_v22  ;;  %307 = vmatpush.msra.mxu2 %v234_v24  ;;  %v247_v38 = vld [vmem:[%s474_s17 + $0x1b0] sm:$0xff]  ;;  %v198_v41 = vld [vmem:[%s474_s17 + $0x28] sm:$0xff]  ;;  %v229_v44 = vld [vmem:[%s474_s17 + $0x120] sm:$0xff] }
  0x1c   : > { %286 = vmatpush.msra.mxu1 %v219_v23  ;;  %267 = vmatpush.msra.mxu0 %v202_v25  ;;  %v215_v39 = vld [vmem:[%s474_s17 + $0xb0] sm:$0xff]  ;;  %v246_v42 = vld [vmem:[%s474_s17 + $0x1a8] sm:$0xff]  ;;  %v197_v45 = vld [vmem:[%s474_s17 + $0x20] sm:$0xff] }
  0x1d   : > { %327 = vmatpush.msra.mxu3 %v250_v26  ;;  %308 = vmatpush.msra.mxu2 %v233_v28  ;;  %v214_v43 = vld [vmem:[%s474_s17 + $0xa8] sm:$0xff]  ;;  %v245_v46 = vld [vmem:[%s474_s17 + $0x1a0] sm:$0xff]  ;;  %v228_v48 = vld [vmem:[%s474_s17 + $0x118] sm:$0xff] }
  0x1e   : > { %287 = vmatpush.msra.mxu1 %v218_v27  ;;  %268 = vmatpush.msra.mxu0 %v201_v29  ;;  %v213_v47 = vld [vmem:[%s474_s17 + $0xa0] sm:$0xff]  ;;  %v196_v49 = vld [vmem:[%s474_s17 + $0x18] sm:$0xff]  ;;  %v227_v52 = vld [vmem:[%s474_s17 + $0x110] sm:$0xff] }
  0x1f   : > { %328 = vmatpush.msra.mxu3 %v249_v30  ;;  %309 = vmatpush.msra.mxu2 %v232_v32  ;;  %v244_v50 = vld [vmem:[%s474_s17 + $0x198] sm:$0xff]  ;;  %v195_v53 = vld [vmem:[%s474_s17 + $0x10] sm:$0xff]  ;;  %v226_v56 = vld [vmem:[%s474_s17 + $0x108] sm:$0xff] }
  0x20   : > { %288 = vmatpush.msra.mxu1 %v217_v31  ;;  %269 = vmatpush.msra.mxu0 %v200_v33  ;;  %v212_v51 = vld [vmem:[%s474_s17 + $0x98] sm:$0xff]  ;;  %v243_v54 = vld [vmem:[%s474_s17 + $0x190] sm:$0xff]  ;;  %v194_v57 = vld [vmem:[%s474_s17 + $0x8] sm:$0xff] }
  0x21   : > { %329 = vmatpush.msra.mxu3 %v248_v34  ;;  %310 = vmatpush.msra.mxu2 %v231_v36  ;;  %v211_v55 = vld [vmem:[%s474_s17 + $0x90] sm:$0xff]  ;;  %v242_v58 = vld [vmem:[%s474_s17 + $0x188] sm:$0xff]  ;;  %v225_v60 = vld [vmem:[%s474_s17 + $0x100] sm:$0xff] }
  0x22   : > { %289 = vmatpush.msra.mxu1 %v216_v35  ;;  %270 = vmatpush.msra.mxu0 %v199_v37  ;;  %v210_v59 = vld [vmem:[%s474_s17 + $0x88] sm:$0xff]  ;;  %v193_v61 = vld [vmem:[%s474_s17] sm:$0xff]  ;;  %v191_v62 = vld [vmem:[%s179_s21 + $0x10] sm:$0xff] }
  0x23   : > { %330 = vmatpush.msra.mxu3 %v247_v38  ;;  %311 = vmatpush.msra.mxu2 %v230_v40  ;;  %v241_v63 = vld [vmem:[%s474_s17 + $0x180] sm:$0xff]  ;;  %v192_v1 = vld [vmem:[%s179_s21 + $0x18] sm:$0xff]  ;;  %v190_v3 = vld [vmem:[%s179_s21 + $0x8] sm:$0xff] }
  0x24   : > { %290 = vmatpush.msra.mxu1 %v215_v39  ;;  %271 = vmatpush.msra.mxu0 %v198_v41  ;;  %v189_v0 = vld [vmem:[%s179_s21] sm:$0xff] }
  0x25   : > { %331 = vmatpush.msra.mxu3 %v246_v42  ;;  %312 = vmatpush.msra.mxu2 %v229_v44  ;;  %v209_v2 = vld [vmem:[%s474_s17 + $0x80] sm:$0xff] }
  0x26   : > { %291 = vmatpush.msra.mxu1 %v214_v43  ;;  %272 = vmatpush.msra.mxu0 %v197_v45  ;;  %v431_v4 = vld [vmem:[%s556_s2] ss:$0 sm:$0xff] }
  0x27   : > { %332 = vmatpush.msra.mxu3 %v245_v46  ;;  %313 = vmatpush.msra.mxu2 %v228_v48 }
  0x28   : > { %292 = vmatpush.msra.mxu1 %v213_v47  ;;  %273 = vmatpush.msra.mxu0 %v196_v49 }
  0x29   : > { %333 = vmatpush.msra.mxu3 %v244_v50  ;;  %314 = vmatpush.msra.mxu2 %v227_v52 }
  0x2a   : > { %293 = vmatpush.msra.mxu1 %v212_v51  ;;  %274 = vmatpush.msra.mxu0 %v195_v53 }
  0x2b   : > { %334 = vmatpush.msra.mxu3 %v243_v54  ;;  %315 = vmatpush.msra.mxu2 %v226_v56 }
  0x2c   : > { %294 = vmatpush.msra.mxu1 %v211_v55  ;;  %275 = vmatpush.msra.mxu0 %v194_v57 }
  0x2d   : > { %335 = vmatpush.msra.mxu3 %v242_v58  ;;  %316 = vmatpush.msra.mxu2 %v225_v60 }
  0x2e   : > { %295 = vmatpush.msra.mxu1 %v210_v59  ;;  %276 = vmatpush.msra.mxu0 %v193_v61 }
  0x2f   : > { %317 = vmatmul.f32.vlgmr.msra.gmra.mxu2 %v191_v62  ;;  %336 = vmatpush.msra.mxu3 %v241_v63 }
  0x30   : > { %277 = vmatmul.f32.vlgmr.msra.gmra.mxu0 %v189_v0  ;;  %337 = vmatmul.f32.vlgmr.msra.gmra.mxu3 %v192_v1 }
  0x31   : > { %296 = vmatpush.msra.mxu1 %v209_v2 }
  0x32   : > { %297 = vmatmul.f32.vlgmr.msra.gmra.mxu1 %v190_v3 }
  0xad   : > { %v278_v5 = vpop.f32.mrf.mxu0 }
  0xae   : > { %v279_v6 = vadd.f32 %v431_v4, %v278_v5 }
  0xaf   : > { %v298_v7 = vpop.f32.mrf.mxu1 }
  0xb0   : > { %v299_v8 = vadd.f32 %v298_v7, %v279_v6 }
  0xb2   : > { %v318_v9 = vpop.f32.mrf.mxu2 }
  0xb3   : > { %v319_v10 = vadd.f32 %v318_v9, %v299_v8  ;;  %v338_v11 = vpop.f32.mrf.mxu3 }
  0xb5   : > { %v339_v12 = vadd.f32 %v338_v11, %v319_v10 }
  0xb7   : > { %v341_v13 = vmax.f32 %v339_v12, 0.0 }
  0xb9   : > { %343 = vst.msk [vmem:[%s188_s27] sm:$0xff] %vm342_vm0, %v341_v13 }
  0xba PF: > { %s13_s12 = sadd.s32 1, %s438_s12  }
  0xbb   : > { %p10_p4 = scmp.ge.s32.totalorder %s13_s12, 6  }
  0xbd   :  { %12 = sbr.rel (!%p10_p4) target bundleno = 1 (0x1), region = 65 }

// kernel: _vae_forward.12
= control target key start
LH: loop header
LB: loop body
LE: loop exit
PB: predicated region body
PF: predicated region fallthrough
CT: control target
= control target key end

     0   :  { %s454_s12 = smov 0   ;;  %s520_s0 = inlined_call_operand.vmem [shape: f32[4,32,256], index: 0, kind: input, shape index: {}]   ;;  %s521_s1 = inlined_call_operand.vmem [shape: f32[4,256,32], index: 1, kind: input, shape index: {}]   ;;  %s522_s2 = inlined_call_operand.vmem [shape: f32[1,32], index: 2, kind: input, shape index: {}]   ;;  %s523_s3 = inlined_call_operand.vmem [shape: f32[4,32,32], index: 3, kind: output, shape index: {}]  }
   0x1 LB: > { %s369_s13 = sadd.s32 4294967295, %s432_s12   ;;  %p373_p0 = scmp.ge.s32.totalorder %s432_s12, 1  ;;  %s432_s12 = sphi %s454_s12, %s13_s12  }
   0x2   : > { %p147_p1 = scmp.lt.s32.totalorder %s432_s12, 5 }
   0x4   : > { %p148_p2 = pnand %p373_p0, %p147_p1 }
   0x5   : > { %p176_p3 = scmp.lt.s32.totalorder (!%p148_p2), %s369_s13, 3 }
   0x6   : > { %151 = sbr.rel (%p148_p2) target bundleno = 193 (0xc1), region = 32 }
   0xb   : > { %s525_s13 = smov (!%p176_p3, %s369_s13), 3  ;;  %v425_v40 = vld [vmem:[%s522_s2] ss:$0 sm:$0xff]  ;;  %vm297_vm0 = vcmask 261120  }
   0xc   : > { %s383_s14 = sshll.u32 %s525_s13, 8  ;;  %s382_s18 = sshll.u32 %s525_s13, 6 }
   0xd   : > { %s468_s17 = scalar_lea.vmem %s521_s1, %s383_s14  ;;  %s180_s21 = scalar_lea.vmem %s520_s0, %s382_s18 }
   0xe   : > { %v214_v0 = vld [vmem:[%s468_s17 + $0x78] sm:$0xff]  ;;  %v213_v1 = vld [vmem:[%s468_s17 + $0x70] sm:$0xff]  ;;  %v212_v4 = vld [vmem:[%s468_s17 + $0x68] sm:$0xff]  ;;  %s384_s24 = sshll.u32 %s525_s13, 5 }
   0xf   : > { %v230_v2 = vld [vmem:[%s468_s17 + $0xf8] sm:$0xff]  ;;  %385 = vmatpush.msra.mxu2 %v214_v0  ;;  %v229_v3 = vld [vmem:[%s468_s17 + $0xf0] sm:$0xff]  ;;  %235 = vmatpush.msra.mxu0 %v214_v0  ;;  %v228_v5 = vld [vmem:[%s468_s17 + $0xe8] sm:$0xff]  ;;  %s190_s27 = scalar_lea.vmem %s523_s3, %s384_s24 }
  0x10   : > { %401 = vmatpush.msra.mxu3 %v230_v2  ;;  %264 = vmatpush.msra.mxu1 %v230_v2  ;;  %v211_v6 = vld [vmem:[%s468_s17 + $0x60] sm:$0xff]  ;;  %v210_v8 = vld [vmem:[%s468_s17 + $0x58] sm:$0xff]  ;;  %v209_v10 = vld [vmem:[%s468_s17 + $0x50] sm:$0xff] }
  0x11   : > { %386 = vmatpush.msra.mxu2 %v213_v1  ;;  %236 = vmatpush.msra.mxu0 %v213_v1  ;;  %v227_v7 = vld [vmem:[%s468_s17 + $0xe0] sm:$0xff]  ;;  %v226_v9 = vld [vmem:[%s468_s17 + $0xd8] sm:$0xff]  ;;  %v225_v11 = vld [vmem:[%s468_s17 + $0xd0] sm:$0xff] }
  0x12   : > { %402 = vmatpush.msra.mxu3 %v229_v3  ;;  %265 = vmatpush.msra.mxu1 %v229_v3  ;;  %v208_v12 = vld [vmem:[%s468_s17 + $0x48] sm:$0xff]  ;;  %v207_v14 = vld [vmem:[%s468_s17 + $0x40] sm:$0xff]  ;;  %v206_v16 = vld [vmem:[%s468_s17 + $0x38] sm:$0xff] }
  0x13   : > { %387 = vmatpush.msra.mxu2 %v212_v4  ;;  %237 = vmatpush.msra.mxu0 %v212_v4  ;;  %v224_v13 = vld [vmem:[%s468_s17 + $0xc8] sm:$0xff]  ;;  %v223_v15 = vld [vmem:[%s468_s17 + $0xc0] sm:$0xff]  ;;  %v222_v17 = vld [vmem:[%s468_s17 + $0xb8] sm:$0xff] }
  0x14   : > { %403 = vmatpush.msra.mxu3 %v228_v5  ;;  %266 = vmatpush.msra.mxu1 %v228_v5  ;;  %v205_v18 = vld [vmem:[%s468_s17 + $0x30] sm:$0xff]  ;;  %v204_v20 = vld [vmem:[%s468_s17 + $0x28] sm:$0xff]  ;;  %v203_v22 = vld [vmem:[%s468_s17 + $0x20] sm:$0xff] }
  0x15   : > { %388 = vmatpush.msra.mxu2 %v211_v6  ;;  %238 = vmatpush.msra.mxu0 %v211_v6  ;;  %v221_v19 = vld [vmem:[%s468_s17 + $0xb0] sm:$0xff]  ;;  %v220_v21 = vld [vmem:[%s468_s17 + $0xa8] sm:$0xff]  ;;  %v219_v23 = vld [vmem:[%s468_s17 + $0xa0] sm:$0xff] }
  0x16   : > { %404 = vmatpush.msra.mxu3 %v227_v7  ;;  %267 = vmatpush.msra.mxu1 %v227_v7  ;;  %v202_v24 = vld [vmem:[%s468_s17 + $0x18] sm:$0xff]  ;;  %v201_v26 = vld [vmem:[%s468_s17 + $0x10] sm:$0xff]  ;;  %v200_v28 = vld [vmem:[%s468_s17 + $0x8] sm:$0xff] }
  0x17   : > { %389 = vmatpush.msra.mxu2 %v210_v8  ;;  %239 = vmatpush.msra.mxu0 %v210_v8  ;;  %v218_v25 = vld [vmem:[%s468_s17 + $0x98] sm:$0xff]  ;;  %v217_v27 = vld [vmem:[%s468_s17 + $0x90] sm:$0xff]  ;;  %v216_v29 = vld [vmem:[%s468_s17 + $0x88] sm:$0xff] }
  0x18   : > { %405 = vmatpush.msra.mxu3 %v226_v9  ;;  %268 = vmatpush.msra.mxu1 %v226_v9  ;;  %v199_v30 = vld [vmem:[%s468_s17] sm:$0xff]  ;;  %v196_v33 = vld [vmem:[%s180_s21 + $0x28] sm:$0xff]  ;;  %v197_v36 = vld [vmem:[%s180_s21 + $0x30] sm:$0xff] }
  0x19   : > { %390 = vmatpush.msra.mxu2 %v209_v10  ;;  %240 = vmatpush.msra.mxu0 %v209_v10  ;;  %v215_v31 = vld [vmem:[%s468_s17 + $0x80] sm:$0xff]  ;;  %v192_v35 = vld [vmem:[%s180_s21 + $0x8] sm:$0xff]  ;;  %v198_v37 = vld [vmem:[%s180_s21 + $0x38] sm:$0xff] }
  0x1a   : > { %406 = vmatpush.msra.mxu3 %v225_v11  ;;  %269 = vmatpush.msra.mxu1 %v225_v11  ;;  %v195_v32 = vld [vmem:[%s180_s21 + $0x20] sm:$0xff]  ;;  %v193_v38 = vld [vmem:[%s180_s21 + $0x10] sm:$0xff]  ;;  %v194_v39 = vld [vmem:[%s180_s21 + $0x18] sm:$0xff] }
  0x1b   : > { %391 = vmatpush.msra.mxu2 %v208_v12  ;;  %241 = vmatpush.msra.mxu0 %v208_v12  ;;  %v191_v34 = vld [vmem:[%s180_s21] sm:$0xff] }
  0x1c   : > { %407 = vmatpush.msra.mxu3 %v224_v13  ;;  %270 = vmatpush.msra.mxu1 %v224_v13 }
  0x1d   : > { %392 = vmatpush.msra.mxu2 %v207_v14  ;;  %242 = vmatpush.msra.mxu0 %v207_v14 }
  0x1e   : > { %408 = vmatpush.msra.mxu3 %v223_v15  ;;  %271 = vmatpush.msra.mxu1 %v223_v15 }
  0x1f   : > { %393 = vmatpush.msra.mxu2 %v206_v16  ;;  %243 = vmatpush.msra.mxu0 %v206_v16 }
  0x20   : > { %409 = vmatpush.msra.mxu3 %v222_v17  ;;  %272 = vmatpush.msra.mxu1 %v222_v17 }
  0x21   : > { %394 = vmatpush.msra.mxu2 %v205_v18  ;;  %244 = vmatpush.msra.mxu0 %v205_v18 }
  0x22   : > { %410 = vmatpush.msra.mxu3 %v221_v19  ;;  %273 = vmatpush.msra.mxu1 %v221_v19 }
  0x23   : > { %395 = vmatpush.msra.mxu2 %v204_v20  ;;  %245 = vmatpush.msra.mxu0 %v204_v20 }
  0x24   : > { %411 = vmatpush.msra.mxu3 %v220_v21  ;;  %274 = vmatpush.msra.mxu1 %v220_v21 }
  0x25   : > { %396 = vmatpush.msra.mxu2 %v203_v22  ;;  %246 = vmatpush.msra.mxu0 %v203_v22 }
  0x26   : > { %412 = vmatpush.msra.mxu3 %v219_v23  ;;  %275 = vmatpush.msra.mxu1 %v219_v23 }
  0x27   : > { %397 = vmatpush.msra.mxu2 %v202_v24  ;;  %247 = vmatpush.msra.mxu0 %v202_v24 }
  0x28   : > { %413 = vmatpush.msra.mxu3 %v218_v25  ;;  %276 = vmatpush.msra.mxu1 %v218_v25 }
  0x29   : > { %398 = vmatpush.msra.mxu2 %v201_v26  ;;  %248 = vmatpush.msra.mxu0 %v201_v26 }
  0x2a   : > { %414 = vmatpush.msra.mxu3 %v217_v27  ;;  %277 = vmatpush.msra.mxu1 %v217_v27 }
  0x2b   : > { %399 = vmatpush.msra.mxu2 %v200_v28  ;;  %249 = vmatpush.msra.mxu0 %v200_v28 }
  0x2c   : > { %415 = vmatpush.msra.mxu3 %v216_v29  ;;  %278 = vmatpush.msra.mxu1 %v216_v29 }
  0x2d   : > { %400 = vmatpush.msra.mxu2 %v199_v30  ;;  %250 = vmatpush.msra.mxu0 %v199_v30 }
  0x2e   : > { %416 = vmatpush.msra.mxu3 %v215_v31  ;;  %257 = vmatmul.f32.vlgmr.msra.gmra.mxu2 %v195_v32 }
  0x2f   : > { %286 = vmatmul.f32.vlgmr.msra.gmra.mxu3 %v196_v33  ;;  %279 = vmatpush.msra.mxu1 %v215_v31 }
  0x30   : > { %251 = vmatmul.f32.vlgmr.msra.gmra.mxu0 %v191_v34  ;;  %280 = vmatmul.f32.vlgmr.msra.gmra.mxu1 %v192_v35 }
  0x36   : > { %260 = vmatmul.f32.gmra.mxu2 %v197_v36 }
  0x37   : > { %289 = vmatmul.f32.gmra.mxu3 %v198_v37 }
  0x38   : > { %254 = vmatmul.f32.gmra.mxu0 %v193_v38  ;;  %283 = vmatmul.f32.gmra.mxu1 %v194_v39 }
  0xad   : > { %v252_v41 = vpop.f32.mrf.mxu0  ;;  %v281_v42 = vpop.f32.mrf.mxu1 }
  0xae   : > { %v253_v43 = vadd.f32 %v425_v40, %v252_v41 }
  0xb0   : > { %v282_v44 = vadd.f32 %v281_v42, %v253_v43 }
  0xb1   : > { %v258_v45 = vpop.f32.mrf.mxu2 }
  0xb2   : > { %v287_v46 = vpop.f32.mrf.mxu3  ;;  %v259_v47 = vadd.f32 %v425_v40, %v258_v45  ;;  %v293_v48 = vmax.f32 %v282_v44, 0.0 }
  0xb4   : > { %298 = vst.msk [vmem:[%s190_s27] sm:$0xff] %vm297_vm0, %v293_v48  ;;  %v288_v49 = vadd.f32 %v287_v46, %v259_v47 }
  0xb5   : > { %v255_v50 = vpop.f32.mrf.mxu0  ;;  %v284_v51 = vpop.f32.mrf.mxu1 }
  0xb6   : > { %v295_v52 = vmax.f32 %v288_v49, 0.0  ;;  %v256_v53 = vadd.f32 %v425_v40, %v255_v50 }
  0xb8   : > { %300 = vst.msk [vmem:[%s190_s27 + $0x10] sm:$0xff] %vm297_vm0, %v295_v52  ;;  %v285_v54 = vadd.f32 %v284_v51, %v256_v53 }
  0xb9   : > { %v261_v55 = vpop.f32.mrf.mxu2 }
  0xba   : > { %v290_v56 = vpop.f32.mrf.mxu3  ;;  %v262_v57 = vadd.f32 %v425_v40, %v261_v55  ;;  %v294_v58 = vmax.f32 %v285_v54, 0.0 }
  0xbc   : > { %299 = vst.msk [vmem:[%s190_s27 + $0x8] sm:$0xff] %vm297_vm0, %v294_v58  ;;  %v291_v59 = vadd.f32 %v290_v56, %v262_v57 }
  0xbe   : > { %v296_v60 = vmax.f32 %v291_v59, 0.0 }
  0xc0   : > { %301 = vst.msk [vmem:[%s190_s27 + $0x18] sm:$0xff] %vm297_vm0, %v296_v60 }
  0xc1 PF: > { %s13_s12 = sadd.s32 1, %s432_s12  }
  0xc2   : > { %p10_p4 = scmp.ge.s32.totalorder %s13_s12, 6  }
  0xc4   :  { %12 = sbr.rel (!%p10_p4) target bundleno = 1 (0x1), region = 65 }

// kernel: _vae_forward.13
= control target key start
LH: loop header
LB: loop body
LE: loop exit
PB: predicated region body
PF: predicated region fallthrough
CT: control target
= control target key end

     0   :  { %s493_s12 = smov 0   ;;  %s591_s0 = inlined_call_operand.vmem [shape: f32[4,128,128], index: 0, kind: input, shape index: {}]   ;;  %s592_s1 = inlined_call_operand.vmem [shape: f32[4,128,16], index: 1, kind: input, shape index: {}]   ;;  %s593_s2 = inlined_call_operand.vmem [shape: f32[1,16], index: 2, kind: input, shape index: {}]   ;;  %s594_s3 = inlined_call_operand.vmem [shape: f32[4,128,16], index: 3, kind: output, shape index: {}]  }
   0x1 LB: > { %s392_s13 = sadd.s32 4294967295, %s471_s12   ;;  %p396_p0 = scmp.ge.s32.totalorder %s471_s12, 1  ;;  %s471_s12 = sphi %s493_s12, %s13_s12  }
   0x2   : > { %p147_p1 = scmp.lt.s32.totalorder %s471_s12, 5 }
   0x4   : > { %p148_p2 = pnand %p396_p0, %p147_p1 }
   0x5   : > { %p176_p3 = scmp.lt.s32.totalorder (!%p148_p2), %s392_s13, 3 }
   0x6   : > { %151 = sbr.rel (%p148_p2) target bundleno = 208 (0xd0), region = 32 }
   0xb   : > { %s596_s13 = smov (!%p176_p3, %s392_s13), 3  ;;  %v464_v32 = vld [vmem:[%s593_s2] ss:$0 sm:$0xff]  ;;  %vm308_vm0 = vcmask 130048  }
   0xc   : > { %s501_s14 = sshll.u32 %s596_s13, 7 }
   0xd   : > { %s507_s17 = scalar_lea.vmem %s592_s1, %s501_s14  ;;  %s528_s20 = scalar_lea.vmem %s591_s0, %s501_s14 }
   0xe   : > { %v222_v0 = vld [vmem:[%s507_s17 + $0x78] sm:$0xff]  ;;  %v221_v1 = vld [vmem:[%s507_s17 + $0x70] sm:$0xff]  ;;  %v220_v2 = vld [vmem:[%s507_s17 + $0x68] sm:$0xff]  ;;  %s554_s25 = scalar_lea.vmem %s594_s3, %s501_s14 }
   0xf   : > { %409 = vmatpush.msra.mxu2 %v222_v0  ;;  %410 = vmatpush.msra.mxu3 %v222_v0  ;;  %v219_v3 = vld [vmem:[%s507_s17 + $0x60] sm:$0xff]  ;;  %v218_v4 = vld [vmem:[%s507_s17 + $0x58] sm:$0xff]  ;;  %v217_v5 = vld [vmem:[%s507_s17 + $0x50] sm:$0xff] }
  0x10   : > { %227 = vmatpush.msra.mxu0 %v222_v0  ;;  %408 = vmatpush.msra.mxu1 %v222_v0  ;;  %v216_v6 = vld [vmem:[%s507_s17 + $0x48] sm:$0xff]  ;;  %v215_v7 = vld [vmem:[%s507_s17 + $0x40] sm:$0xff]  ;;  %v214_v8 = vld [vmem:[%s507_s17 + $0x38] sm:$0xff] }
  0x11   : > { %412 = vmatpush.msra.mxu2 %v221_v1  ;;  %413 = vmatpush.msra.mxu3 %v221_v1  ;;  %v213_v9 = vld [vmem:[%s507_s17 + $0x30] sm:$0xff]  ;;  %v212_v10 = vld [vmem:[%s507_s17 + $0x28] sm:$0xff]  ;;  %v211_v11 = vld [vmem:[%s507_s17 + $0x20] sm:$0xff] }
  0x12   : > { %228 = vmatpush.msra.mxu0 %v221_v1  ;;  %411 = vmatpush.msra.mxu1 %v221_v1  ;;  %v210_v12 = vld [vmem:[%s507_s17 + $0x18] sm:$0xff]  ;;  %v209_v13 = vld [vmem:[%s507_s17 + $0x10] sm:$0xff]  ;;  %v208_v14 = vld [vmem:[%s507_s17 + $0x8] sm:$0xff] }
  0x13   : > { %415 = vmatpush.msra.mxu2 %v220_v2  ;;  %416 = vmatpush.msra.mxu3 %v220_v2  ;;  %v207_v15 = vld [vmem:[%s507_s17] sm:$0xff]  ;;  %v200_v20 = vld [vmem:[%s528_s20 + $0x48] sm:$0xff]  ;;  %v201_v24 = vld [vmem:[%s528_s20 + $0x50] sm:$0xff] }
  0x14   : > { %229 = vmatpush.msra.mxu0 %v220_v2  ;;  %414 = vmatpush.msra.mxu1 %v220_v2  ;;  %v199_v16 = vld [vmem:[%s528_s20 + $0x40] sm:$0xff]  ;;  %v204_v21 = vld [vmem:[%s528_s20 + $0x68] sm:$0xff]  ;;  %v205_v25 = vld [vmem:[%s528_s20 + $0x70] sm:$0xff] }
  0x15   : > { %418 = vmatpush.msra.mxu2 %v219_v3  ;;  %419 = vmatpush.msra.mxu3 %v219_v3  ;;  %v203_v17 = vld [vmem:[%s528_s20 + $0x60] sm:$0xff]  ;;  %v192_v22 = vld [vmem:[%s528_s20 + $0x8] sm:$0xff]  ;;  %v193_v26 = vld [vmem:[%s528_s20 + $0x10] sm:$0xff] }
  0x16   : > { %230 = vmatpush.msra.mxu0 %v219_v3  ;;  %417 = vmatpush.msra.mxu1 %v219_v3  ;;  %v191_v18 = vld [vmem:[%s528_s20] sm:$0xff]  ;;  %v196_v23 = vld [vmem:[%s528_s20 + $0x28] sm:$0xff]  ;;  %v197_v27 = vld [vmem:[%s528_s20 + $0x30] sm:$0xff] }
  0x17   : > { %421 = vmatpush.msra.mxu2 %v218_v4  ;;  %422 = vmatpush.msra.mxu3 %v218_v4  ;;  %v195_v19 = vld [vmem:[%s528_s20 + $0x20] sm:$0xff]  ;;  %v202_v28 = vld [vmem:[%s528_s20 + $0x58] sm:$0xff] }
  0x18   : > { %231 = vmatpush.msra.mxu0 %v218_v4  ;;  %420 = vmatpush.msra.mxu1 %v218_v4  ;;  %v206_v29 = vld [vmem:[%s528_s20 + $0x78] sm:$0xff] }
  0x19   : > { %424 = vmatpush.msra.mxu2 %v217_v5  ;;  %425 = vmatpush.msra.mxu3 %v217_v5  ;;  %v194_v30 = vld [vmem:[%s528_s20 + $0x18] sm:$0xff] }
  0x1a   : > { %232 = vmatpush.msra.mxu0 %v217_v5  ;;  %423 = vmatpush.msra.mxu1 %v217_v5  ;;  %v198_v31 = vld [vmem:[%s528_s20 + $0x38] sm:$0xff] }
  0x1b   : > { %427 = vmatpush.msra.mxu2 %v216_v6  ;;  %428 = vmatpush.msra.mxu3 %v216_v6 }
  0x1c   : > { %233 = vmatpush.msra.mxu0 %v216_v6  ;;  %426 = vmatpush.msra.mxu1 %v216_v6 }
  0x1d   : > { %430 = vmatpush.msra.mxu2 %v215_v7  ;;  %431 = vmatpush.msra.mxu3 %v215_v7 }
  0x1e   : > { %234 = vmatpush.msra.mxu0 %v215_v7  ;;  %429 = vmatpush.msra.mxu1 %v215_v7 }
  0x1f   : > { %433 = vmatpush.msra.mxu2 %v214_v8  ;;  %434 = vmatpush.msra.mxu3 %v214_v8 }
  0x20   : > { %235 = vmatpush.msra.mxu0 %v214_v8  ;;  %432 = vmatpush.msra.mxu1 %v214_v8 }
  0x21   : > { %436 = vmatpush.msra.mxu2 %v213_v9  ;;  %437 = vmatpush.msra.mxu3 %v213_v9 }
  0x22   : > { %236 = vmatpush.msra.mxu0 %v213_v9  ;;  %435 = vmatpush.msra.mxu1 %v213_v9 }
  0x23   : > { %439 = vmatpush.msra.mxu2 %v212_v10  ;;  %440 = vmatpush.msra.mxu3 %v212_v10 }
  0x24   : > { %237 = vmatpush.msra.mxu0 %v212_v10  ;;  %438 = vmatpush.msra.mxu1 %v212_v10 }
  0x25   : > { %442 = vmatpush.msra.mxu2 %v211_v11  ;;  %443 = vmatpush.msra.mxu3 %v211_v11 }
  0x26   : > { %238 = vmatpush.msra.mxu0 %v211_v11  ;;  %441 = vmatpush.msra.mxu1 %v211_v11 }
  0x27   : > { %445 = vmatpush.msra.mxu2 %v210_v12  ;;  %446 = vmatpush.msra.mxu3 %v210_v12 }
  0x28   : > { %239 = vmatpush.msra.mxu0 %v210_v12  ;;  %444 = vmatpush.msra.mxu1 %v210_v12 }
  0x29   : > { %448 = vmatpush.msra.mxu2 %v209_v13  ;;  %449 = vmatpush.msra.mxu3 %v209_v13 }
  0x2a   : > { %240 = vmatpush.msra.mxu0 %v209_v13  ;;  %447 = vmatpush.msra.mxu1 %v209_v13 }
  0x2b   : > { %451 = vmatpush.msra.mxu2 %v208_v14  ;;  %452 = vmatpush.msra.mxu3 %v208_v14 }
  0x2c   : > { %241 = vmatpush.msra.mxu0 %v208_v14  ;;  %450 = vmatpush.msra.mxu1 %v208_v14 }
  0x2d   : > { %454 = vmatpush.msra.mxu2 %v207_v15  ;;  %455 = vmatpush.msra.mxu3 %v207_v15 }
  0x2e   : > { %267 = vmatmul.f32.vlgmr.msra.gmra.mxu2 %v199_v16  ;;  %279 = vmatmul.f32.vlgmr.msra.gmra.mxu3 %v203_v17 }
  0x2f   : > { %242 = vmatpush.msra.mxu0 %v207_v15  ;;  %453 = vmatpush.msra.mxu1 %v207_v15 }
  0x30   : > { %243 = vmatmul.f32.vlgmr.msra.gmra.mxu0 %v191_v18  ;;  %255 = vmatmul.f32.vlgmr.msra.gmra.mxu1 %v195_v19 }
  0x36   : > { %270 = vmatmul.f32.gmra.mxu2 %v200_v20  ;;  %282 = vmatmul.f32.gmra.mxu3 %v204_v21 }
  0x38   : > { %246 = vmatmul.f32.gmra.mxu0 %v192_v22  ;;  %258 = vmatmul.f32.gmra.mxu1 %v196_v23 }
  0x3e   : > { %273 = vmatmul.f32.gmra.mxu2 %v201_v24  ;;  %285 = vmatmul.f32.gmra.mxu3 %v205_v25 }
  0x40   : > { %249 = vmatmul.f32.gmra.mxu0 %v193_v26  ;;  %261 = vmatmul.f32.gmra.mxu1 %v197_v27 }
  0x46   : > { %276 = vmatmul.f32.gmra.mxu2 %v202_v28  ;;  %288 = vmatmul.f32.gmra.mxu3 %v206_v29 }
  0x48   : > { %252 = vmatmul.f32.gmra.mxu0 %v194_v30  ;;  %264 = vmatmul.f32.gmra.mxu1 %v198_v31 }
  0xad   : > { %v244_v33 = vpop.f32.mrf.mxu0  ;;  %v256_v34 = vpop.f32.mrf.mxu1 }
  0xae   : > { %v245_v35 = vadd.f32 %v464_v32, %v244_v33  ;;  %v257_v36 = vadd.f32 %v464_v32, %v256_v34 }
  0xb0   : > { %v292_v37 = vmax.f32 %v245_v35, 0.0  ;;  %v296_v38 = vmax.f32 %v257_v36, 0.0 }
  0xb1   : > { %v268_v39 = vpop.f32.mrf.mxu2  ;;  %v280_v40 = vpop.f32.mrf.mxu3 }
  0xb2   : > { %309 = vst.msk [vmem:[%s554_s25] sm:$0xff] %vm308_vm0, %v292_v37  ;;  %v269_v41 = vadd.f32 %v464_v32, %v268_v39  ;;  %v281_v42 = vadd.f32 %v464_v32, %v280_v40 }
  0xb3   : > { %313 = vst.msk [vmem:[%s554_s25 + $0x20] sm:$0xff] %vm308_vm0, %v296_v38 }
  0xb4   : > { %v300_v43 = vmax.f32 %v269_v41, 0.0  ;;  %v304_v44 = vmax.f32 %v281_v42, 0.0 }
  0xb5   : > { %v247_v45 = vpop.f32.mrf.mxu0  ;;  %v259_v46 = vpop.f32.mrf.mxu1 }
  0xb6   : > { %317 = vst.msk [vmem:[%s554_s25 + $0x40] sm:$0xff] %vm308_vm0, %v300_v43  ;;  %v248_v47 = vadd.f32 %v464_v32, %v247_v45  ;;  %v260_v48 = vadd.f32 %v464_v32, %v259_v46 }
  0xb7   : > { %321 = vst.msk [vmem:[%s554_s25 + $0x60] sm:$0xff] %vm308_vm0, %v304_v44 }
  0xb8   : > { %v293_v49 = vmax.f32 %v248_v47, 0.0  ;;  %v297_v50 = vmax.f32 %v260_v48, 0.0 }
  0xb9   : > { %v271_v51 = vpop.f32.mrf.mxu2  ;;  %v283_v52 = vpop.f32.mrf.mxu3 }
  0xba   : > { %310 = vst.msk [vmem:[%s554_s25 + $0x8] sm:$0xff] %vm308_vm0, %v293_v49  ;;  %v272_v53 = vadd.f32 %v464_v32, %v271_v51  ;;  %v284_v54 = vadd.f32 %v464_v32, %v283_v52 }
  0xbb   : > { %314 = vst.msk [vmem:[%s554_s25 + $0x28] sm:$0xff] %vm308_vm0, %v297_v50 }
  0xbc   : > { %v301_v55 = vmax.f32 %v272_v53, 0.0  ;;  %v305_v56 = vmax.f32 %v284_v54, 0.0 }
  0xbd   : > { %v250_v57 = vpop.f32.mrf.mxu0  ;;  %v262_v58 = vpop.f32.mrf.mxu1 }
  0xbe   : > { %318 = vst.msk [vmem:[%s554_s25 + $0x48] sm:$0xff] %vm308_vm0, %v301_v55  ;;  %v251_v59 = vadd.f32 %v464_v32, %v250_v57  ;;  %v263_v60 = vadd.f32 %v464_v32, %v262_v58 }
  0xbf   : > { %322 = vst.msk [vmem:[%s554_s25 + $0x68] sm:$0xff] %vm308_vm0, %v305_v56 }
  0xc0   : > { %v294_v61 = vmax.f32 %v251_v59, 0.0  ;;  %v298_v62 = vmax.f32 %v263_v60, 0.0 }
  0xc1   : > { %v274_v63 = vpop.f32.mrf.mxu2  ;;  %v286_v0 = vpop.f32.mrf.mxu3 }
  0xc2   : > { %311 = vst.msk [vmem:[%s554_s25 + $0x10] sm:$0xff] %vm308_vm0, %v294_v61  ;;  %v275_v1 = vadd.f32 %v464_v32, %v274_v63  ;;  %v287_v2 = vadd.f32 %v464_v32, %v286_v0 }
  0xc3   : > { %315 = vst.msk [vmem:[%s554_s25 + $0x30] sm:$0xff] %vm308_vm0, %v298_v62 }
  0xc4   : > { %v302_v3 = vmax.f32 %v275_v1, 0.0  ;;  %v306_v4 = vmax.f32 %v287_v2, 0.0 }
  0xc5   : > { %v253_v5 = vpop.f32.mrf.mxu0  ;;  %v265_v6 = vpop.f32.mrf.mxu1 }
  0xc6   : > { %319 = vst.msk [vmem:[%s554_s25 + $0x50] sm:$0xff] %vm308_vm0, %v302_v3  ;;  %v254_v7 = vadd.f32 %v464_v32, %v253_v5  ;;  %v266_v8 = vadd.f32 %v464_v32, %v265_v6 }
  0xc7   : > { %323 = vst.msk [vmem:[%s554_s25 + $0x70] sm:$0xff] %vm308_vm0, %v306_v4 }
  0xc8   : > { %v295_v9 = vmax.f32 %v254_v7, 0.0  ;;  %v299_v10 = vmax.f32 %v266_v8, 0.0 }
  0xc9   : > { %v277_v11 = vpop.f32.mrf.mxu2  ;;  %v289_v12 = vpop.f32.mrf.mxu3 }
  0xca   : > { %312 = vst.msk [vmem:[%s554_s25 + $0x18] sm:$0xff] %vm308_vm0, %v295_v9  ;;  %v278_v13 = vadd.f32 %v464_v32, %v277_v11  ;;  %v290_v14 = vadd.f32 %v464_v32, %v289_v12 }
  0xcb   : > { %316 = vst.msk [vmem:[%s554_s25 + $0x38] sm:$0xff] %vm308_vm0, %v299_v10 }
  0xcc   : > { %v303_v15 = vmax.f32 %v278_v13, 0.0  ;;  %v307_v16 = vmax.f32 %v290_v14, 0.0 }
  0xce   : > { %320 = vst.msk [vmem:[%s554_s25 + $0x58] sm:$0xff] %vm308_vm0, %v303_v15 }
  0xcf   : > { %324 = vst.msk [vmem:[%s554_s25 + $0x78] sm:$0xff] %vm308_vm0, %v307_v16 }
  0xd0 PF: > { %s13_s12 = sadd.s32 1, %s471_s12  }
  0xd1   : > { %p10_p4 = scmp.ge.s32.totalorder %s13_s12, 6  }
  0xd3   :  { %12 = sbr.rel (!%p10_p4) target bundleno = 1 (0x1), region = 65 }

</bundles_post_ra>
